<compile_context>
chip_gen: v7x
topology: tpu7x:2x2x1
jax: 0.10.0
libtpu: 0.0.40
codegen_flags: <defaults>
</compile_context>

<pallas_src>
import jax
import jax.numpy as jnp
from jax import lax
from jax.experimental import pallas as pl
from jax.experimental.pallas import tpu as pltpu

# ----- module-consistent config -----
NUM_CLASSES = 10
HIDDEN      = 32
MAX_FRAME   = 8
NUM_HEADS   = 4          # irrelevant to the math here (seq_len == 1)
ENC_LAYERS  = 2
DEC_LAYERS  = 2
FF          = 2048       # dim_feedforward (both default encoder and custom decoder layer)
FEAT        = MAX_FRAME * 33 * 3          # 792
LN_EPS      = 1e-5
LANES       = 128
N_BLK       = ENC_LAYERS + DEC_LAYERS     # stacked blocks: enc0, enc1, dec0, dec1

# ----- lane-dense input-projection packing -----
N_CHUNK   = 4
CHUNK     = FEAT // N_CHUNK               # 198
CHUNK_PAD = 208                           # next multiple of 16 (bf16 sublane tile)

# ----- merged f32 slab layout (rows of 128 lanes) -----
ATTN_ROW = 0                              # rows 0:32   fused Wv@Wo, 4 blocks along lanes
CLS_ROW  = HIDDEN                         # rows 32:64  classification weight (lanes 0:10)
VEC_BASE = 2 * HIDDEN                     # rows 64:104 tiny vectors (payload in lanes 0:32)
# vector-section rows (relative to VEC_BASE):
R_B_IN  = 0
R_CQ    = 1
R_ENC   = 2                               # + 6*l : attn_b, ln1w, ln1b, ln2w, ln2b, b2
R_ENCN  = R_ENC + 6 * ENC_LAYERS          # enc final norm: w, b
R_DEC   = R_ENCN + 2                      # + 8*l : attn_b, ln1w, ln1b, ln2w, ln2b, ln3w, ln3b, b2
R_DECN  = R_DEC + 8 * DEC_LAYERS          # dec final norm: w, b
R_CLS_B = R_DECN + 2                      # classification bias (lanes 0:10)
VEC_ROWS  = ((R_CLS_B + 1 + 7) // 8) * 8  # 40
SLAB_ROWS = VEC_BASE + VEC_ROWS           # 104

# ----- merged bf16 buffer row offsets -----
W2_ROW = CHUNK_PAD                        # w_lanes rows [0:208]=packed w_in, [208:2256]=w2
B1_ROW = N_BLK * HIDDEN                   # w_up rows [0:128]=w1 (4 x 32), [128:132]=b1


def _layer_norm(x, w, b):
    # var = E[x^2] - mu^2: the two lane reductions are independent (shorter XLU chain).
    mu  = jnp.mean(x, axis=-1, keepdims=True)
    ex2 = jnp.mean(x * x, axis=-1, keepdims=True)
    var = ex2 - mu * mu
    return (x - mu) * lax.rsqrt(var + LN_EPS) * w + b


def spoter_kernel(x_ref, wlanes_ref, wup_ref, slab_ref, out_ref):
    f32, bf16 = jnp.float32, jnp.bfloat16
    H = HIDDEN

    def vec(r):                                     # (1, H) f32 broadcastable row
        return slab_ref[VEC_BASE + r:VEC_BASE + r + 1, :H]

    attn_w = slab_ref[ATTN_ROW:ATTN_ROW + H, :]     # (32, 128) f32, 4 fused Wv@Wo blocks
    w_cls  = slab_ref[CLS_ROW:CLS_ROW + H, :]       # (32, 128) f32, lane-padded

    # ---- input projection: 4 lane-dense chunk dots, slice matching 32-lane block, sum ----
    w_in = wlanes_ref[0:CHUNK_PAD, :]               # (208, 128) bf16
    h = vec(R_B_IN)
    for c in range(N_CHUNK):
        yc = jnp.dot(x_ref[c], w_in, preferred_element_type=f32)   # (B, 128)
        h = h + yc[:, c * H:(c + 1) * H]

    def attn(x, idx):
        # softmax over a single key == 1 -> out_proj(v_proj(x)), pre-fused in wrapper.
        y = jnp.dot(x, attn_w, preferred_element_type=f32)         # (B, 128) lane-dense
        return y[:, H * idx:H * (idx + 1)]

    def ffn(x, idx):
        w1 = wup_ref[H * idx:H * (idx + 1), :]                     # (32, 2048) bf16
        b1 = wup_ref[B1_ROW + idx:B1_ROW + idx + 1, :]             # (1, 2048)  bf16
        ff = jnp.dot(x.astype(bf16), w1, preferred_element_type=f32) + b1.astype(f32)
        ff = jnp.maximum(ff, 0.0)                                  # relu(linear1)
        w2 = wlanes_ref[W2_ROW:W2_ROW + FF, :]                     # (2048, 128) bf16
        y = jnp.dot(ff.astype(bf16), w2, preferred_element_type=f32)   # (B, 128)
        return y[:, H * idx:H * (idx + 1)]

    # ---------- encoder (nn.TransformerEncoderLayer, post-norm, relu) ----------
    src = h
    for l in range(ENC_LAYERS):
        r = R_ENC + 6 * l
        a = attn(src, l) + vec(r + 0)
        src = _layer_norm(src + a, vec(r + 1), vec(r + 2))
        f = ffn(src, l) + vec(r + 5)
        src = _layer_norm(src + f, vec(r + 3), vec(r + 4))
    memory = _layer_norm(src, vec(R_ENCN), vec(R_ENCN + 1))        # encoder final norm

    # ---------- decoder (custom SPOTERTransformerDecoderLayer, post-norm, relu) ----------
    tgt = jnp.broadcast_to(vec(R_CQ), h.shape)                     # class_query per batch
    for l in range(DEC_LAYERS):
        r = R_DEC + 8 * l
        idx = ENC_LAYERS + l
        tgt = _layer_norm(tgt + tgt, vec(r + 1), vec(r + 2))       # tgt + dropout1(tgt)
        a = attn(memory, idx) + vec(r + 0)                         # cross-attn on memory
        tgt = _layer_norm(tgt + a, vec(r + 3), vec(r + 4))
        f = ffn(tgt, idx) + vec(r + 7)
        tgt = _layer_norm(tgt + f, vec(r + 5), vec(r + 6))
    dec_out = _layer_norm(tgt, vec(R_DECN), vec(R_DECN + 1))       # decoder final norm

    # ---- classification head, lane-dense (B, 128); sliced to NUM_CLASSES in wrapper ----
    out_ref[...] = (jnp.dot(dec_out, w_cls, preferred_element_type=f32)
                    + slab_ref[VEC_BASE + R_CLS_B:VEC_BASE + R_CLS_B + 1, :])


def spoter_forward(inputs, kparams):
    B = inputs.shape[0]
    x = inputs.reshape(B, -1).astype(jnp.float32)                  # flatten(start_dim=1)
    # chunk-pack x to match the lane-dense w_in packing; cast to bf16 here (not in-kernel)
    xc = x.reshape(B, N_CHUNK, CHUNK).transpose(1, 0, 2)           # (4, B, 198)
    xc = jnp.pad(xc, ((0, 0), (0, 0), (0, CHUNK_PAD - CHUNK))).astype(jnp.bfloat16)

    vmem = pl.BlockSpec(memory_space=pltpu.MemorySpace.VMEM)
    args = (xc,) + tuple(kparams)
    out = pl.pallas_call(
        spoter_kernel,
        out_shape=jax.ShapeDtypeStruct((B, LANES), jnp.float32),
        in_specs=[vmem] * len(args),
        out_specs=vmem,
    )(*args)
    return out[:, :NUM_CLASSES]


# ----------------------------- parameter construction -----------------------------
def init_raw_params(key):
    """Deterministic synthetic parameters in module layout (weights pre-transposed to (in,out))."""
    keys = iter(jax.random.split(key, 64))

    def u(shape, scale=0.1):
        return jax.random.uniform(next(keys), shape, jnp.float32, -scale, scale)

    ones = lambda s: jnp.ones(s, jnp.float32)
    zeros = lambda s: jnp.zeros(s, jnp.float32)

    def layer_stack(L, with_ln3):
        d = dict(
            wv=u((L, HIDDEN, HIDDEN)), bv=u((L, HIDDEN)),
            wo=u((L, HIDDEN, HIDDEN)), bo=u((L, HIDDEN)),
            ln1w=ones((L, HIDDEN)), ln1b=zeros((L, HIDDEN)),
            ln2w=ones((L, HIDDEN)), ln2b=zeros((L, HIDDEN)),
            w1=u((L, HIDDEN, FF)), b1=u((L, FF)),
            w2=u((L, FF, HIDDEN)), b2=u((L, HIDDEN)),
        )
        if with_ln3:
            d.update(ln3w=ones((L, HIDDEN)), ln3b=zeros((L, HIDDEN)))
        return d

    return dict(
        w_in=u((FEAT, HIDDEN)), b_in=u((HIDDEN,)), class_query=u((HIDDEN,)),
        enc=layer_stack(ENC_LAYERS, with_ln3=False),
        enc_norm=dict(w=ones((HIDDEN,)), b=zeros((HIDDEN,))),
        dec=layer_stack(DEC_LAYERS, with_ln3=True),
        dec_norm=dict(w=ones((HIDDEN,)), b=zeros((HIDDEN,))),
        w_cls=u((HIDDEN, NUM_CLASSES)), b_cls=u((NUM_CLASSES,)),
    )


def pack_params(raw):
    """Wrapper-side fusion / packing / casting (runs once, outside the kernel)."""
    H, f32, bf16 = HIDDEN, jnp.float32, jnp.bfloat16

    attn_ws, attn_bs, w1s, w2s, b1s = [], [], [], [], []
    for p, L in ((raw['enc'], ENC_LAYERS), (raw['dec'], DEC_LAYERS)):
        for l in range(L):
            # fused degenerate attention: x @ (Wv@Wo) + (bv@Wo + bo)
            attn_ws.append(p['wv'][l] @ p['wo'][l])                   # (H, H)
            attn_bs.append(p['bv'][l] @ p['wo'][l] + p['bo'][l])      # (H,)
            w1s.append(p['w1'][l]); w2s.append(p['w2'][l]); b1s.append(p['b1'][l])

    attn_w = jnp.concatenate(attn_ws, axis=1)                         # (H, 4H)   f32
    w1 = jnp.concatenate(w1s, axis=0)                                 # (4H, FF)
    b1 = jnp.stack(b1s, axis=0)                                       # (4, FF)
    w_up = jnp.concatenate([w1, b1], axis=0).astype(bf16)             # (132, FF) bf16
    w2 = jnp.concatenate(w2s, axis=1).astype(bf16)                    # (FF, 4H)  bf16, lane-dense

    # lane-dense packed input projection: chunk c of w_in -> lanes [c*H:(c+1)*H]
    w_in_packed = jnp.zeros((CHUNK_PAD, LANES), f32)
    for c in range(N_CHUNK):
        w_in_packed = w_in_packed.at[:CHUNK, c * H:(c + 1) * H].set(
            raw['w_in'][c * CHUNK:(c + 1) * CHUNK])
    w_lanes = jnp.concatenate([w_in_packed.astype(bf16), w2], axis=0)  # (2256, 128) bf16

    # ---- ONE merged f32 slab: fused attn weights + cls weight + all tiny vectors ----
    slab = jnp.zeros((SLAB_ROWS, LANES), f32)
    slab = slab.at[ATTN_ROW:ATTN_ROW + H, :].set(attn_w)
    slab = slab.at[CLS_ROW:CLS_ROW + H, :NUM_CLASSES].set(raw['w_cls'])

    def put(s, row, v, width=H):
        return s.at[VEC_BASE + row, :width].set(v)

    slab = put(slab, R_B_IN, raw['b_in'])
    slab = put(slab, R_CQ, raw['class_query'])
    e = raw['enc']
    for l in range(ENC_LAYERS):
        r = R_ENC + 6 * l
        slab = put(slab, r + 0, attn_bs[l])
        slab = put(slab, r + 1, e['ln1w'][l]); slab = put(slab, r + 2, e['ln1b'][l])
        slab = put(slab, r + 3, e['ln2w'][l]); slab = put(slab, r + 4, e['ln2b'][l])
        slab = put(slab, r + 5, e['b2'][l])
    slab = put(slab, R_ENCN, raw['enc_norm']['w'])
    slab = put(slab, R_ENCN + 1, raw['enc_norm']['b'])
    d = raw['dec']
    for l in range(DEC_LAYERS):
        r = R_DEC + 8 * l
        slab = put(slab, r + 0, attn_bs[ENC_LAYERS + l])
        slab = put(slab, r + 1, d['ln1w'][l]); slab = put(slab, r + 2, d['ln1b'][l])
        slab = put(slab, r + 3, d['ln2w'][l]); slab = put(slab, r + 4, d['ln2b'][l])
        slab = put(slab, r + 5, d['ln3w'][l]); slab = put(slab, r + 6, d['ln3b'][l])
        slab = put(slab, r + 7, d['b2'][l])
    slab = put(slab, R_DECN, raw['dec_norm']['w'])
    slab = put(slab, R_DECN + 1, raw['dec_norm']['b'])
    slab = put(slab, R_CLS_B, raw['b_cls'], width=NUM_CLASSES)

    return (w_lanes, w_up, slab)


# ----------------------------- pure-JAX reference (same operand precision) -----------------------------
def spoter_reference(inputs, raw):
    f32, bf16 = jnp.float32, jnp.bfloat16
    B = inputs.shape[0]
    x = inputs.reshape(B, -1).astype(f32)

    def bdot(a, b):                                   # bf16 operands, f32 accumulation
        return jnp.dot(a.astype(bf16), b.astype(bf16), preferred_element_type=f32)

    def ln(v, w, b):
        mu = jnp.mean(v, -1, keepdims=True)
        var = jnp.mean(jnp.square(v - mu), -1, keepdims=True)
        return (v - mu) / jnp.sqrt(var + LN_EPS) * w + b

    def attn(v, p, l):                                # softmax over 1 key == 1
        return (v @ p['wv'][l] + p['bv'][l]) @ p['wo'][l] + p['bo'][l]

    def ffn(v, p, l):
        ff = jnp.maximum(bdot(v, p['w1'][l]) + p['b1'][l].astype(bf16).astype(f32), 0.0)
        return bdot(ff, p['w2'][l]) + p['b2'][l]

    h = bdot(x, raw['w_in']) + raw['b_in']
    src, e = h, raw['enc']
    for l in range(ENC_LAYERS):
        src = ln(src + attn(src, e, l), e['ln1w'][l], e['ln1b'][l])
        src = ln(src + ffn(src, e, l), e['ln2w'][l], e['ln2b'][l])
    memory = ln(src, raw['enc_norm']['w'], raw['enc_norm']['b'])

    tgt, d = jnp.broadcast_to(raw['class_query'][None, :], (B, HIDDEN)), raw['dec']
    for l in range(DEC_LAYERS):
        tgt = ln(tgt + tgt, d['ln1w'][l], d['ln1b'][l])
        tgt = ln(tgt + attn(memory, d, l), d['ln2w'][l], d['ln2b'][l])
        tgt = ln(tgt + ffn(tgt, d, l), d['ln3w'][l], d['ln3b'][l])
    dec_out = ln(tgt, raw['dec_norm']['w'], raw['dec_norm']['b'])
    return dec_out @ raw['w_cls'] + raw['b_cls']


if __name__ == "__main__":
    key = jax.random.PRNGKey(0)
    pkey, xkey = jax.random.split(key)
    raw = init_raw_params(pkey)
    kparams = pack_params(raw)
    inputs = jax.random.normal(xkey, (2, MAX_FRAME, 33, 3), jnp.float32)

    out = spoter_forward(inputs, kparams)
    out = jax.block_until_ready(out)
    assert out.shape == (2, NUM_CLASSES) and out.dtype == jnp.float32

    ref = spoter_reference(inputs, raw)
    assert bool(jnp.allclose(out, ref, rtol=5e-2, atol=5e-2)), (out, ref)

    print("KERNEL_OK")
</pallas_src>

<mosaic_0001>
module attributes {stable_mosaic.version = 11 : i64} {
  func.func @spoter_kernel(%arg0: memref<4x2x208xbf16, #tpu.memory_space<vmem>>, %arg1: memref<2256x128xbf16, #tpu.memory_space<vmem>>, %arg2: memref<132x2048xbf16, #tpu.memory_space<vmem>>, %arg3: memref<104x128xf32, #tpu.memory_space<vmem>>, %arg4: memref<2x128xf32, #tpu.memory_space<vmem>>) attributes {dimension_semantics = [], scalar_prefetch = 0 : i64, scratch_operands = 0 : i64, tpu.core_type = #tpu.core_type<tc>} {
    %c0 = arith.constant 0 : index
    %c0_0 = arith.constant 0 : index
    %0 = vector.load %arg3[%c0, %c0_0] : memref<104x128xf32, #tpu.memory_space<vmem>>, vector<32x128xf32>
    %c32 = arith.constant 32 : index
    %c0_1 = arith.constant 0 : index
    %1 = vector.load %arg3[%c32, %c0_1] : memref<104x128xf32, #tpu.memory_space<vmem>>, vector<32x128xf32>
    %c0_2 = arith.constant 0 : index
    %c0_3 = arith.constant 0 : index
    %2 = vector.load %arg1[%c0_2, %c0_3] : memref<2256x128xbf16, #tpu.memory_space<vmem>>, vector<208x128xbf16>
    %c64 = arith.constant 64 : index
    %c0_4 = arith.constant 0 : index
    %3 = vector.load %arg3[%c64, %c0_4] : memref<104x128xf32, #tpu.memory_space<vmem>>, vector<1x32xf32>
    %c0_5 = arith.constant 0 : index
    %c0_6 = arith.constant 0 : index
    %c0_7 = arith.constant 0 : index
    %4 = vector.load %arg0[%c0_5, %c0_6, %c0_7] : memref<4x2x208xbf16, #tpu.memory_space<vmem>>, vector<1x2x208xbf16>
    %5 = vector.shape_cast %4 : vector<1x2x208xbf16> to vector<2x208xbf16>
    %cst = arith.constant dense<0.000000e+00> : vector<2x128xf32>
    %6 = tpu.matmul %5, %2, %cst {dimension_numbers = #tpu.dot_dimension_numbers<[1], [0], [0], [1], [0, 0, 1, 1], [], []>} : vector<2x208xbf16>, vector<208x128xbf16>, vector<2x128xf32> -> vector<2x128xf32>
    %7 = vector.extract_strided_slice %6 {offsets = [0, 0], sizes = [2, 32], strides = [1, 1]} : vector<2x128xf32> to vector<2x32xf32>
    %8 = vector.broadcast %3 : vector<1x32xf32> to vector<2x32xf32>
    %9 = arith.addf %8, %7 : vector<2x32xf32>
    %c1 = arith.constant 1 : index
    %c0_8 = arith.constant 0 : index
    %c0_9 = arith.constant 0 : index
    %10 = vector.load %arg0[%c1, %c0_8, %c0_9] : memref<4x2x208xbf16, #tpu.memory_space<vmem>>, vector<1x2x208xbf16>
    %11 = vector.shape_cast %10 : vector<1x2x208xbf16> to vector<2x208xbf16>
    %cst_10 = arith.constant dense<0.000000e+00> : vector<2x128xf32>
    %12 = tpu.matmul %11, %2, %cst_10 {dimension_numbers = #tpu.dot_dimension_numbers<[1], [0], [0], [1], [0, 0, 1, 1], [], []>} : vector<2x208xbf16>, vector<208x128xbf16>, vector<2x128xf32> -> vector<2x128xf32>
    %13 = vector.extract_strided_slice %12 {offsets = [0, 32], sizes = [2, 32], strides = [1, 1]} : vector<2x128xf32> to vector<2x32xf32>
    %14 = arith.addf %9, %13 : vector<2x32xf32>
    %c2 = arith.constant 2 : index
    %c0_11 = arith.constant 0 : index
    %c0_12 = arith.constant 0 : index
    %15 = vector.load %arg0[%c2, %c0_11, %c0_12] : memref<4x2x208xbf16, #tpu.memory_space<vmem>>, vector<1x2x208xbf16>
    %16 = vector.shape_cast %15 : vector<1x2x208xbf16> to vector<2x208xbf16>
    %cst_13 = arith.constant dense<0.000000e+00> : vector<2x128xf32>
    %17 = tpu.matmul %16, %2, %cst_13 {dimension_numbers = #tpu.dot_dimension_numbers<[1], [0], [0], [1], [0, 0, 1, 1], [], []>} : vector<2x208xbf16>, vector<208x128xbf16>, vector<2x128xf32> -> vector<2x128xf32>
    %18 = vector.extract_strided_slice %17 {offsets = [0, 64], sizes = [2, 32], strides = [1, 1]} : vector<2x128xf32> to vector<2x32xf32>
    %19 = arith.addf %14, %18 : vector<2x32xf32>
    %c3 = arith.constant 3 : index
    %c0_14 = arith.constant 0 : index
    %c0_15 = arith.constant 0 : index
    %20 = vector.load %arg0[%c3, %c0_14, %c0_15] : memref<4x2x208xbf16, #tpu.memory_space<vmem>>, vector<1x2x208xbf16>
    %21 = vector.shape_cast %20 : vector<1x2x208xbf16> to vector<2x208xbf16>
    %cst_16 = arith.constant dense<0.000000e+00> : vector<2x128xf32>
    %22 = tpu.matmul %21, %2, %cst_16 {dimension_numbers = #tpu.dot_dimension_numbers<[1], [0], [0], [1], [0, 0, 1, 1], [], []>} : vector<2x208xbf16>, vector<208x128xbf16>, vector<2x128xf32> -> vector<2x128xf32>
    %23 = vector.extract_strided_slice %22 {offsets = [0, 96], sizes = [2, 32], strides = [1, 1]} : vector<2x128xf32> to vector<2x32xf32>
    %24 = arith.addf %19, %23 : vector<2x32xf32>
    %cst_17 = arith.constant dense<0.000000e+00> : vector<2x128xf32>
    %25 = tpu.matmul %24, %0, %cst_17 {dimension_numbers = #tpu.dot_dimension_numbers<[1], [0], [0], [1], [0, 0, 1, 1], [], []>} : vector<2x32xf32>, vector<32x128xf32>, vector<2x128xf32> -> vector<2x128xf32>
    %26 = vector.extract_strided_slice %25 {offsets = [0, 0], sizes = [2, 32], strides = [1, 1]} : vector<2x128xf32> to vector<2x32xf32>
    %c66 = arith.constant 66 : index
    %c0_18 = arith.constant 0 : index
    %27 = vector.load %arg3[%c66, %c0_18] : memref<104x128xf32, #tpu.memory_space<vmem>>, vector<1x32xf32>
    %28 = vector.broadcast %27 : vector<1x32xf32> to vector<2x32xf32>
    %29 = arith.addf %26, %28 : vector<2x32xf32>
    %30 = arith.addf %24, %29 : vector<2x32xf32>
    %c67 = arith.constant 67 : index
    %c0_19 = arith.constant 0 : index
    %31 = vector.load %arg3[%c67, %c0_19] : memref<104x128xf32, #tpu.memory_space<vmem>>, vector<1x32xf32>
    %c68 = arith.constant 68 : index
    %c0_20 = arith.constant 0 : index
    %32 = vector.load %arg3[%c68, %c0_20] : memref<104x128xf32, #tpu.memory_space<vmem>>, vector<1x32xf32>
    %cst_21 = arith.constant dense<0.000000e+00> : vector<2xf32>
    %33 = vector.multi_reduction <add>, %30, %cst_21 [1] : vector<2x32xf32> to vector<2xf32>
    %34 = vector.shape_cast %33 : vector<2xf32> to vector<2x1xf32>
    %cst_22 = arith.constant 3.200000e+01 : f32
    %35 = vector.broadcast %cst_22 : f32 to vector<2x1xf32>
    %36 = arith.divf %34, %35 : vector<2x1xf32>
    %37 = arith.mulf %30, %30 : vector<2x32xf32>
    %cst_23 = arith.constant dense<0.000000e+00> : vector<2xf32>
    %38 = vector.multi_reduction <add>, %37, %cst_23 [1] : vector<2x32xf32> to vector<2xf32>
    %39 = vector.shape_cast %38 : vector<2xf32> to vector<2x1xf32>
    %cst_24 = arith.constant 3.200000e+01 : f32
    %40 = vector.broadcast %cst_24 : f32 to vector<2x1xf32>
    %41 = arith.divf %39, %40 : vector<2x1xf32>
    %42 = arith.mulf %36, %36 : vector<2x1xf32>
    %43 = arith.subf %41, %42 : vector<2x1xf32>
    %44 = vector.broadcast %36 : vector<2x1xf32> to vector<2x32xf32>
    %45 = arith.subf %30, %44 : vector<2x32xf32>
    %cst_25 = arith.constant 9.99999974E-6 : f32
    %46 = vector.broadcast %cst_25 : f32 to vector<2x1xf32>
    %47 = arith.addf %43, %46 : vector<2x1xf32>
    %48 = math.rsqrt %47 : vector<2x1xf32>
    %49 = vector.broadcast %48 : vector<2x1xf32> to vector<2x32xf32>
    %50 = arith.mulf %45, %49 : vector<2x32xf32>
    %51 = vector.broadcast %31 : vector<1x32xf32> to vector<2x32xf32>
    %52 = arith.mulf %50, %51 : vector<2x32xf32>
    %53 = vector.broadcast %32 : vector<1x32xf32> to vector<2x32xf32>
    %54 = arith.addf %52, %53 : vector<2x32xf32>
    %c0_26 = arith.constant 0 : index
    %c0_27 = arith.constant 0 : index
    %55 = vector.load %arg2[%c0_26, %c0_27] : memref<132x2048xbf16, #tpu.memory_space<vmem>>, vector<32x2048xbf16>
    %c128 = arith.constant 128 : index
    %c0_28 = arith.constant 0 : index
    %56 = vector.load %arg2[%c128, %c0_28] : memref<132x2048xbf16, #tpu.memory_space<vmem>>, vector<1x2048xbf16>
    %57 = arith.truncf %54 : vector<2x32xf32> to vector<2x32xbf16>
    %cst_29 = arith.constant dense<0.000000e+00> : vector<2x2048xf32>
    %58 = tpu.matmul %57, %55, %cst_29 {dimension_numbers = #tpu.dot_dimension_numbers<[1], [0], [0], [1], [0, 0, 1, 1], [], []>} : vector<2x32xbf16>, vector<32x2048xbf16>, vector<2x2048xf32> -> vector<2x2048xf32>
    %59 = arith.extf %56 : vector<1x2048xbf16> to vector<1x2048xf32>
    %60 = vector.broadcast %59 : vector<1x2048xf32> to vector<2x2048xf32>
    %61 = arith.addf %58, %60 : vector<2x2048xf32>
    %cst_30 = arith.constant 0.000000e+00 : f32
    %62 = vector.broadcast %cst_30 : f32 to vector<2x2048xf32>
    %63 = arith.maximumf %61, %62 : vector<2x2048xf32>
    %c208 = arith.constant 208 : index
    %c0_31 = arith.constant 0 : index
    %64 = vector.load %arg1[%c208, %c0_31] : memref<2256x128xbf16, #tpu.memory_space<vmem>>, vector<2048x128xbf16>
    %65 = arith.truncf %63 : vector<2x2048xf32> to vector<2x2048xbf16>
    %cst_32 = arith.constant dense<0.000000e+00> : vector<2x128xf32>
    %66 = tpu.matmul %65, %64, %cst_32 {dimension_numbers = #tpu.dot_dimension_numbers<[1], [0], [0], [1], [0, 0, 1, 1], [], []>} : vector<2x2048xbf16>, vector<2048x128xbf16>, vector<2x128xf32> -> vector<2x128xf32>
    %67 = vector.extract_strided_slice %66 {offsets = [0, 0], sizes = [2, 32], strides = [1, 1]} : vector<2x128xf32> to vector<2x32xf32>
    %c71 = arith.constant 71 : index
    %c0_33 = arith.constant 0 : index
    %68 = vector.load %arg3[%c71, %c0_33] : memref<104x128xf32, #tpu.memory_space<vmem>>, vector<1x32xf32>
    %69 = vector.broadcast %68 : vector<1x32xf32> to vector<2x32xf32>
    %70 = arith.addf %67, %69 : vector<2x32xf32>
    %71 = arith.addf %54, %70 : vector<2x32xf32>
    %c69 = arith.constant 69 : index
    %c0_34 = arith.constant 0 : index
    %72 = vector.load %arg3[%c69, %c0_34] : memref<104x128xf32, #tpu.memory_space<vmem>>, vector<1x32xf32>
    %c70 = arith.constant 70 : index
    %c0_35 = arith.constant 0 : index
    %73 = vector.load %arg3[%c70, %c0_35] : memref<104x128xf32, #tpu.memory_space<vmem>>, vector<1x32xf32>
    %cst_36 = arith.constant dense<0.000000e+00> : vector<2xf32>
    %74 = vector.multi_reduction <add>, %71, %cst_36 [1] : vector<2x32xf32> to vector<2xf32>
    %75 = vector.shape_cast %74 : vector<2xf32> to vector<2x1xf32>
    %cst_37 = arith.constant 3.200000e+01 : f32
    %76 = vector.broadcast %cst_37 : f32 to vector<2x1xf32>
    %77 = arith.divf %75, %76 : vector<2x1xf32>
    %78 = arith.mulf %71, %71 : vector<2x32xf32>
    %cst_38 = arith.constant dense<0.000000e+00> : vector<2xf32>
    %79 = vector.multi_reduction <add>, %78, %cst_38 [1] : vector<2x32xf32> to vector<2xf32>
    %80 = vector.shape_cast %79 : vector<2xf32> to vector<2x1xf32>
    %cst_39 = arith.constant 3.200000e+01 : f32
    %81 = vector.broadcast %cst_39 : f32 to vector<2x1xf32>
    %82 = arith.divf %80, %81 : vector<2x1xf32>
    %83 = arith.mulf %77, %77 : vector<2x1xf32>
    %84 = arith.subf %82, %83 : vector<2x1xf32>
    %85 = vector.broadcast %77 : vector<2x1xf32> to vector<2x32xf32>
    %86 = arith.subf %71, %85 : vector<2x32xf32>
    %cst_40 = arith.constant 9.99999974E-6 : f32
    %87 = vector.broadcast %cst_40 : f32 to vector<2x1xf32>
    %88 = arith.addf %84, %87 : vector<2x1xf32>
    %89 = math.rsqrt %88 : vector<2x1xf32>
    %90 = vector.broadcast %89 : vector<2x1xf32> to vector<2x32xf32>
    %91 = arith.mulf %86, %90 : vector<2x32xf32>
    %92 = vector.broadcast %72 : vector<1x32xf32> to vector<2x32xf32>
    %93 = arith.mulf %91, %92 : vector<2x32xf32>
    %94 = vector.broadcast %73 : vector<1x32xf32> to vector<2x32xf32>
    %95 = arith.addf %93, %94 : vector<2x32xf32>
    %cst_41 = arith.constant dense<0.000000e+00> : vector<2x128xf32>
    %96 = tpu.matmul %95, %0, %cst_41 {dimension_numbers = #tpu.dot_dimension_numbers<[1], [0], [0], [1], [0, 0, 1, 1], [], []>} : vector<2x32xf32>, vector<32x128xf32>, vector<2x128xf32> -> vector<2x128xf32>
    %97 = vector.extract_strided_slice %96 {offsets = [0, 32], sizes = [2, 32], strides = [1, 1]} : vector<2x128xf32> to vector<2x32xf32>
    %c72 = arith.constant 72 : index
    %c0_42 = arith.constant 0 : index
    %98 = vector.load %arg3[%c72, %c0_42] : memref<104x128xf32, #tpu.memory_space<vmem>>, vector<1x32xf32>
    %99 = vector.broadcast %98 : vector<1x32xf32> to vector<2x32xf32>
    %100 = arith.addf %97, %99 : vector<2x32xf32>
    %101 = arith.addf %95, %100 : vector<2x32xf32>
    %c73 = arith.constant 73 : index
    %c0_43 = arith.constant 0 : index
    %102 = vector.load %arg3[%c73, %c0_43] : memref<104x128xf32, #tpu.memory_space<vmem>>, vector<1x32xf32>
    %c74 = arith.constant 74 : index
    %c0_44 = arith.constant 0 : index
    %103 = vector.load %arg3[%c74, %c0_44] : memref<104x128xf32, #tpu.memory_space<vmem>>, vector<1x32xf32>
    %cst_45 = arith.constant dense<0.000000e+00> : vector<2xf32>
    %104 = vector.multi_reduction <add>, %101, %cst_45 [1] : vector<2x32xf32> to vector<2xf32>
    %105 = vector.shape_cast %104 : vector<2xf32> to vector<2x1xf32>
    %cst_46 = arith.constant 3.200000e+01 : f32
    %106 = vector.broadcast %cst_46 : f32 to vector<2x1xf32>
    %107 = arith.divf %105, %106 : vector<2x1xf32>
    %108 = arith.mulf %101, %101 : vector<2x32xf32>
    %cst_47 = arith.constant dense<0.000000e+00> : vector<2xf32>
    %109 = vector.multi_reduction <add>, %108, %cst_47 [1] : vector<2x32xf32> to vector<2xf32>
    %110 = vector.shape_cast %109 : vector<2xf32> to vector<2x1xf32>
    %cst_48 = arith.constant 3.200000e+01 : f32
    %111 = vector.broadcast %cst_48 : f32 to vector<2x1xf32>
    %112 = arith.divf %110, %111 : vector<2x1xf32>
    %113 = arith.mulf %107, %107 : vector<2x1xf32>
    %114 = arith.subf %112, %113 : vector<2x1xf32>
    %115 = vector.broadcast %107 : vector<2x1xf32> to vector<2x32xf32>
    %116 = arith.subf %101, %115 : vector<2x32xf32>
    %cst_49 = arith.constant 9.99999974E-6 : f32
    %117 = vector.broadcast %cst_49 : f32 to vector<2x1xf32>
    %118 = arith.addf %114, %117 : vector<2x1xf32>
    %119 = math.rsqrt %118 : vector<2x1xf32>
    %120 = vector.broadcast %119 : vector<2x1xf32> to vector<2x32xf32>
    %121 = arith.mulf %116, %120 : vector<2x32xf32>
    %122 = vector.broadcast %102 : vector<1x32xf32> to vector<2x32xf32>
    %123 = arith.mulf %121, %122 : vector<2x32xf32>
    %124 = vector.broadcast %103 : vector<1x32xf32> to vector<2x32xf32>
    %125 = arith.addf %123, %124 : vector<2x32xf32>
    %c32_50 = arith.constant 32 : index
    %c0_51 = arith.constant 0 : index
    %126 = vector.load %arg2[%c32_50, %c0_51] : memref<132x2048xbf16, #tpu.memory_space<vmem>>, vector<32x2048xbf16>
    %c129 = arith.constant 129 : index
    %c0_52 = arith.constant 0 : index
    %127 = vector.load %arg2[%c129, %c0_52] : memref<132x2048xbf16, #tpu.memory_space<vmem>>, vector<1x2048xbf16>
    %128 = arith.truncf %125 : vector<2x32xf32> to vector<2x32xbf16>
    %cst_53 = arith.constant dense<0.000000e+00> : vector<2x2048xf32>
    %129 = tpu.matmul %128, %126, %cst_53 {dimension_numbers = #tpu.dot_dimension_numbers<[1], [0], [0], [1], [0, 0, 1, 1], [], []>} : vector<2x32xbf16>, vector<32x2048xbf16>, vector<2x2048xf32> -> vector<2x2048xf32>
    %130 = arith.extf %127 : vector<1x2048xbf16> to vector<1x2048xf32>
    %131 = vector.broadcast %130 : vector<1x2048xf32> to vector<2x2048xf32>
    %132 = arith.addf %129, %131 : vector<2x2048xf32>
    %cst_54 = arith.constant 0.000000e+00 : f32
    %133 = vector.broadcast %cst_54 : f32 to vector<2x2048xf32>
    %134 = arith.maximumf %132, %133 : vector<2x2048xf32>
    %c208_55 = arith.constant 208 : index
    %c0_56 = arith.constant 0 : index
    %135 = vector.load %arg1[%c208_55, %c0_56] : memref<2256x128xbf16, #tpu.memory_space<vmem>>, vector<2048x128xbf16>
    %136 = arith.truncf %134 : vector<2x2048xf32> to vector<2x2048xbf16>
    %cst_57 = arith.constant dense<0.000000e+00> : vector<2x128xf32>
    %137 = tpu.matmul %136, %135, %cst_57 {dimension_numbers = #tpu.dot_dimension_numbers<[1], [0], [0], [1], [0, 0, 1, 1], [], []>} : vector<2x2048xbf16>, vector<2048x128xbf16>, vector<2x128xf32> -> vector<2x128xf32>
    %138 = vector.extract_strided_slice %137 {offsets = [0, 32], sizes = [2, 32], strides = [1, 1]} : vector<2x128xf32> to vector<2x32xf32>
    %c77 = arith.constant 77 : index
    %c0_58 = arith.constant 0 : index
    %139 = vector.load %arg3[%c77, %c0_58] : memref<104x128xf32, #tpu.memory_space<vmem>>, vector<1x32xf32>
    %140 = vector.broadcast %139 : vector<1x32xf32> to vector<2x32xf32>
    %141 = arith.addf %138, %140 : vector<2x32xf32>
    %142 = arith.addf %125, %141 : vector<2x32xf32>
    %c75 = arith.constant 75 : index
    %c0_59 = arith.constant 0 : index
    %143 = vector.load %arg3[%c75, %c0_59] : memref<104x128xf32, #tpu.memory_space<vmem>>, vector<1x32xf32>
    %c76 = arith.constant 76 : index
    %c0_60 = arith.constant 0 : index
    %144 = vector.load %arg3[%c76, %c0_60] : memref<104x128xf32, #tpu.memory_space<vmem>>, vector<1x32xf32>
    %cst_61 = arith.constant dense<0.000000e+00> : vector<2xf32>
    %145 = vector.multi_reduction <add>, %142, %cst_61 [1] : vector<2x32xf32> to vector<2xf32>
    %146 = vector.shape_cast %145 : vector<2xf32> to vector<2x1xf32>
    %cst_62 = arith.constant 3.200000e+01 : f32
    %147 = vector.broadcast %cst_62 : f32 to vector<2x1xf32>
    %148 = arith.divf %146, %147 : vector<2x1xf32>
    %149 = arith.mulf %142, %142 : vector<2x32xf32>
    %cst_63 = arith.constant dense<0.000000e+00> : vector<2xf32>
    %150 = vector.multi_reduction <add>, %149, %cst_63 [1] : vector<2x32xf32> to vector<2xf32>
    %151 = vector.shape_cast %150 : vector<2xf32> to vector<2x1xf32>
    %cst_64 = arith.constant 3.200000e+01 : f32
    %152 = vector.broadcast %cst_64 : f32 to vector<2x1xf32>
    %153 = arith.divf %151, %152 : vector<2x1xf32>
    %154 = arith.mulf %148, %148 : vector<2x1xf32>
    %155 = arith.subf %153, %154 : vector<2x1xf32>
    %156 = vector.broadcast %148 : vector<2x1xf32> to vector<2x32xf32>
    %157 = arith.subf %142, %156 : vector<2x32xf32>
    %cst_65 = arith.constant 9.99999974E-6 : f32
    %158 = vector.broadcast %cst_65 : f32 to vector<2x1xf32>
    %159 = arith.addf %155, %158 : vector<2x1xf32>
    %160 = math.rsqrt %159 : vector<2x1xf32>
    %161 = vector.broadcast %160 : vector<2x1xf32> to vector<2x32xf32>
    %162 = arith.mulf %157, %161 : vector<2x32xf32>
    %163 = vector.broadcast %143 : vector<1x32xf32> to vector<2x32xf32>
    %164 = arith.mulf %162, %163 : vector<2x32xf32>
    %165 = vector.broadcast %144 : vector<1x32xf32> to vector<2x32xf32>
    %166 = arith.addf %164, %165 : vector<2x32xf32>
    %c78 = arith.constant 78 : index
    %c0_66 = arith.constant 0 : index
    %167 = vector.load %arg3[%c78, %c0_66] : memref<104x128xf32, #tpu.memory_space<vmem>>, vector<1x32xf32>
    %c79 = arith.constant 79 : index
    %c0_67 = arith.constant 0 : index
    %168 = vector.load %arg3[%c79, %c0_67] : memref<104x128xf32, #tpu.memory_space<vmem>>, vector<1x32xf32>
    %cst_68 = arith.constant dense<0.000000e+00> : vector<2xf32>
    %169 = vector.multi_reduction <add>, %166, %cst_68 [1] : vector<2x32xf32> to vector<2xf32>
    %170 = vector.shape_cast %169 : vector<2xf32> to vector<2x1xf32>
    %cst_69 = arith.constant 3.200000e+01 : f32
    %171 = vector.broadcast %cst_69 : f32 to vector<2x1xf32>
    %172 = arith.divf %170, %171 : vector<2x1xf32>
    %173 = arith.mulf %166, %166 : vector<2x32xf32>
    %cst_70 = arith.constant dense<0.000000e+00> : vector<2xf32>
    %174 = vector.multi_reduction <add>, %173, %cst_70 [1] : vector<2x32xf32> to vector<2xf32>
    %175 = vector.shape_cast %174 : vector<2xf32> to vector<2x1xf32>
    %cst_71 = arith.constant 3.200000e+01 : f32
    %176 = vector.broadcast %cst_71 : f32 to vector<2x1xf32>
    %177 = arith.divf %175, %176 : vector<2x1xf32>
    %178 = arith.mulf %172, %172 : vector<2x1xf32>
    %179 = arith.subf %177, %178 : vector<2x1xf32>
    %180 = vector.broadcast %172 : vector<2x1xf32> to vector<2x32xf32>
    %181 = arith.subf %166, %180 : vector<2x32xf32>
    %cst_72 = arith.constant 9.99999974E-6 : f32
    %182 = vector.broadcast %cst_72 : f32 to vector<2x1xf32>
    %183 = arith.addf %179, %182 : vector<2x1xf32>
    %184 = math.rsqrt %183 : vector<2x1xf32>
    %185 = vector.broadcast %184 : vector<2x1xf32> to vector<2x32xf32>
    %186 = arith.mulf %181, %185 : vector<2x32xf32>
    %187 = vector.broadcast %167 : vector<1x32xf32> to vector<2x32xf32>
    %188 = arith.mulf %186, %187 : vector<2x32xf32>
    %189 = vector.broadcast %168 : vector<1x32xf32> to vector<2x32xf32>
    %190 = arith.addf %188, %189 : vector<2x32xf32>
    %c65 = arith.constant 65 : index
    %c0_73 = arith.constant 0 : index
    %191 = vector.load %arg3[%c65, %c0_73] : memref<104x128xf32, #tpu.memory_space<vmem>>, vector<1x32xf32>
    %192 = vector.shape_cast %191 : vector<1x32xf32> to vector<1x32xf32>
    %193 = vector.broadcast %192 : vector<1x32xf32> to vector<2x32xf32>
    %194 = arith.addf %193, %193 : vector<2x32xf32>
    %c81 = arith.constant 81 : index
    %c0_74 = arith.constant 0 : index
    %195 = vector.load %arg3[%c81, %c0_74] : memref<104x128xf32, #tpu.memory_space<vmem>>, vector<1x32xf32>
    %c82 = arith.constant 82 : index
    %c0_75 = arith.constant 0 : index
    %196 = vector.load %arg3[%c82, %c0_75] : memref<104x128xf32, #tpu.memory_space<vmem>>, vector<1x32xf32>
    %cst_76 = arith.constant dense<0.000000e+00> : vector<2xf32>
    %197 = vector.multi_reduction <add>, %194, %cst_76 [1] : vector<2x32xf32> to vector<2xf32>
    %198 = vector.shape_cast %197 : vector<2xf32> to vector<2x1xf32>
    %cst_77 = arith.constant 3.200000e+01 : f32
    %199 = vector.broadcast %cst_77 : f32 to vector<2x1xf32>
    %200 = arith.divf %198, %199 : vector<2x1xf32>
    %201 = arith.mulf %194, %194 : vector<2x32xf32>
    %cst_78 = arith.constant dense<0.000000e+00> : vector<2xf32>
    %202 = vector.multi_reduction <add>, %201, %cst_78 [1] : vector<2x32xf32> to vector<2xf32>
    %203 = vector.shape_cast %202 : vector<2xf32> to vector<2x1xf32>
    %cst_79 = arith.constant 3.200000e+01 : f32
    %204 = vector.broadcast %cst_79 : f32 to vector<2x1xf32>
    %205 = arith.divf %203, %204 : vector<2x1xf32>
    %206 = arith.mulf %200, %200 : vector<2x1xf32>
    %207 = arith.subf %205, %206 : vector<2x1xf32>
    %208 = vector.broadcast %200 : vector<2x1xf32> to vector<2x32xf32>
    %209 = arith.subf %194, %208 : vector<2x32xf32>
    %cst_80 = arith.constant 9.99999974E-6 : f32
    %210 = vector.broadcast %cst_80 : f32 to vector<2x1xf32>
    %211 = arith.addf %207, %210 : vector<2x1xf32>
    %212 = math.rsqrt %211 : vector<2x1xf32>
    %213 = vector.broadcast %212 : vector<2x1xf32> to vector<2x32xf32>
    %214 = arith.mulf %209, %213 : vector<2x32xf32>
    %215 = vector.broadcast %195 : vector<1x32xf32> to vector<2x32xf32>
    %216 = arith.mulf %214, %215 : vector<2x32xf32>
    %217 = vector.broadcast %196 : vector<1x32xf32> to vector<2x32xf32>
    %218 = arith.addf %216, %217 : vector<2x32xf32>
    %cst_81 = arith.constant dense<0.000000e+00> : vector<2x128xf32>
    %219 = tpu.matmul %190, %0, %cst_81 {dimension_numbers = #tpu.dot_dimension_numbers<[1], [0], [0], [1], [0, 0, 1, 1], [], []>} : vector<2x32xf32>, vector<32x128xf32>, vector<2x128xf32> -> vector<2x128xf32>
    %220 = vector.extract_strided_slice %219 {offsets = [0, 64], sizes = [2, 32], strides = [1, 1]} : vector<2x128xf32> to vector<2x32xf32>
    %c80 = arith.constant 80 : index
    %c0_82 = arith.constant 0 : index
    %221 = vector.load %arg3[%c80, %c0_82] : memref<104x128xf32, #tpu.memory_space<vmem>>, vector<1x32xf32>
    %222 = vector.broadcast %221 : vector<1x32xf32> to vector<2x32xf32>
    %223 = arith.addf %220, %222 : vector<2x32xf32>
    %224 = arith.addf %218, %223 : vector<2x32xf32>
    %c83 = arith.constant 83 : index
    %c0_83 = arith.constant 0 : index
    %225 = vector.load %arg3[%c83, %c0_83] : memref<104x128xf32, #tpu.memory_space<vmem>>, vector<1x32xf32>
    %c84 = arith.constant 84 : index
    %c0_84 = arith.constant 0 : index
    %226 = vector.load %arg3[%c84, %c0_84] : memref<104x128xf32, #tpu.memory_space<vmem>>, vector<1x32xf32>
    %cst_85 = arith.constant dense<0.000000e+00> : vector<2xf32>
    %227 = vector.multi_reduction <add>, %224, %cst_85 [1] : vector<2x32xf32> to vector<2xf32>
    %228 = vector.shape_cast %227 : vector<2xf32> to vector<2x1xf32>
    %cst_86 = arith.constant 3.200000e+01 : f32
    %229 = vector.broadcast %cst_86 : f32 to vector<2x1xf32>
    %230 = arith.divf %228, %229 : vector<2x1xf32>
    %231 = arith.mulf %224, %224 : vector<2x32xf32>
    %cst_87 = arith.constant dense<0.000000e+00> : vector<2xf32>
    %232 = vector.multi_reduction <add>, %231, %cst_87 [1] : vector<2x32xf32> to vector<2xf32>
    %233 = vector.shape_cast %232 : vector<2xf32> to vector<2x1xf32>
    %cst_88 = arith.constant 3.200000e+01 : f32
    %234 = vector.broadcast %cst_88 : f32 to vector<2x1xf32>
    %235 = arith.divf %233, %234 : vector<2x1xf32>
    %236 = arith.mulf %230, %230 : vector<2x1xf32>
    %237 = arith.subf %235, %236 : vector<2x1xf32>
    %238 = vector.broadcast %230 : vector<2x1xf32> to vector<2x32xf32>
    %239 = arith.subf %224, %238 : vector<2x32xf32>
    %cst_89 = arith.constant 9.99999974E-6 : f32
    %240 = vector.broadcast %cst_89 : f32 to vector<2x1xf32>
    %241 = arith.addf %237, %240 : vector<2x1xf32>
    %242 = math.rsqrt %241 : vector<2x1xf32>
    %243 = vector.broadcast %242 : vector<2x1xf32> to vector<2x32xf32>
    %244 = arith.mulf %239, %243 : vector<2x32xf32>
    %245 = vector.broadcast %225 : vector<1x32xf32> to vector<2x32xf32>
    %246 = arith.mulf %244, %245 : vector<2x32xf32>
    %247 = vector.broadcast %226 : vector<1x32xf32> to vector<2x32xf32>
    %248 = arith.addf %246, %247 : vector<2x32xf32>
    %c64_90 = arith.constant 64 : index
    %c0_91 = arith.constant 0 : index
    %249 = vector.load %arg2[%c64_90, %c0_91] : memref<132x2048xbf16, #tpu.memory_space<vmem>>, vector<32x2048xbf16>
    %c130 = arith.constant 130 : index
    %c0_92 = arith.constant 0 : index
    %250 = vector.load %arg2[%c130, %c0_92] : memref<132x2048xbf16, #tpu.memory_space<vmem>>, vector<1x2048xbf16>
    %251 = arith.truncf %248 : vector<2x32xf32> to vector<2x32xbf16>
    %cst_93 = arith.constant dense<0.000000e+00> : vector<2x2048xf32>
    %252 = tpu.matmul %251, %249, %cst_93 {dimension_numbers = #tpu.dot_dimension_numbers<[1], [0], [0], [1], [0, 0, 1, 1], [], []>} : vector<2x32xbf16>, vector<32x2048xbf16>, vector<2x2048xf32> -> vector<2x2048xf32>
    %253 = arith.extf %250 : vector<1x2048xbf16> to vector<1x2048xf32>
    %254 = vector.broadcast %253 : vector<1x2048xf32> to vector<2x2048xf32>
    %255 = arith.addf %252, %254 : vector<2x2048xf32>
    %cst_94 = arith.constant 0.000000e+00 : f32
    %256 = vector.broadcast %cst_94 : f32 to vector<2x2048xf32>
    %257 = arith.maximumf %255, %256 : vector<2x2048xf32>
    %c208_95 = arith.constant 208 : index
    %c0_96 = arith.constant 0 : index
    %258 = vector.load %arg1[%c208_95, %c0_96] : memref<2256x128xbf16, #tpu.memory_space<vmem>>, vector<2048x128xbf16>
    %259 = arith.truncf %257 : vector<2x2048xf32> to vector<2x2048xbf16>
    %cst_97 = arith.constant dense<0.000000e+00> : vector<2x128xf32>
    %260 = tpu.matmul %259, %258, %cst_97 {dimension_numbers = #tpu.dot_dimension_numbers<[1], [0], [0], [1], [0, 0, 1, 1], [], []>} : vector<2x2048xbf16>, vector<2048x128xbf16>, vector<2x128xf32> -> vector<2x128xf32>
    %261 = vector.extract_strided_slice %260 {offsets = [0, 64], sizes = [2, 32], strides = [1, 1]} : vector<2x128xf32> to vector<2x32xf32>
    %c87 = arith.constant 87 : index
    %c0_98 = arith.constant 0 : index
    %262 = vector.load %arg3[%c87, %c0_98] : memref<104x128xf32, #tpu.memory_space<vmem>>, vector<1x32xf32>
    %263 = vector.broadcast %262 : vector<1x32xf32> to vector<2x32xf32>
    %264 = arith.addf %261, %263 : vector<2x32xf32>
    %265 = arith.addf %248, %264 : vector<2x32xf32>
    %c85 = arith.constant 85 : index
    %c0_99 = arith.constant 0 : index
    %266 = vector.load %arg3[%c85, %c0_99] : memref<104x128xf32, #tpu.memory_space<vmem>>, vector<1x32xf32>
    %c86 = arith.constant 86 : index
    %c0_100 = arith.constant 0 : index
    %267 = vector.load %arg3[%c86, %c0_100] : memref<104x128xf32, #tpu.memory_space<vmem>>, vector<1x32xf32>
    %cst_101 = arith.constant dense<0.000000e+00> : vector<2xf32>
    %268 = vector.multi_reduction <add>, %265, %cst_101 [1] : vector<2x32xf32> to vector<2xf32>
    %269 = vector.shape_cast %268 : vector<2xf32> to vector<2x1xf32>
    %cst_102 = arith.constant 3.200000e+01 : f32
    %270 = vector.broadcast %cst_102 : f32 to vector<2x1xf32>
    %271 = arith.divf %269, %270 : vector<2x1xf32>
    %272 = arith.mulf %265, %265 : vector<2x32xf32>
    %cst_103 = arith.constant dense<0.000000e+00> : vector<2xf32>
    %273 = vector.multi_reduction <add>, %272, %cst_103 [1] : vector<2x32xf32> to vector<2xf32>
    %274 = vector.shape_cast %273 : vector<2xf32> to vector<2x1xf32>
    %cst_104 = arith.constant 3.200000e+01 : f32
    %275 = vector.broadcast %cst_104 : f32 to vector<2x1xf32>
    %276 = arith.divf %274, %275 : vector<2x1xf32>
    %277 = arith.mulf %271, %271 : vector<2x1xf32>
    %278 = arith.subf %276, %277 : vector<2x1xf32>
    %279 = vector.broadcast %271 : vector<2x1xf32> to vector<2x32xf32>
    %280 = arith.subf %265, %279 : vector<2x32xf32>
    %cst_105 = arith.constant 9.99999974E-6 : f32
    %281 = vector.broadcast %cst_105 : f32 to vector<2x1xf32>
    %282 = arith.addf %278, %281 : vector<2x1xf32>
    %283 = math.rsqrt %282 : vector<2x1xf32>
    %284 = vector.broadcast %283 : vector<2x1xf32> to vector<2x32xf32>
    %285 = arith.mulf %280, %284 : vector<2x32xf32>
    %286 = vector.broadcast %266 : vector<1x32xf32> to vector<2x32xf32>
    %287 = arith.mulf %285, %286 : vector<2x32xf32>
    %288 = vector.broadcast %267 : vector<1x32xf32> to vector<2x32xf32>
    %289 = arith.addf %287, %288 : vector<2x32xf32>
    %290 = arith.addf %289, %289 : vector<2x32xf32>
    %c89 = arith.constant 89 : index
    %c0_106 = arith.constant 0 : index
    %291 = vector.load %arg3[%c89, %c0_106] : memref<104x128xf32, #tpu.memory_space<vmem>>, vector<1x32xf32>
    %c90 = arith.constant 90 : index
    %c0_107 = arith.constant 0 : index
    %292 = vector.load %arg3[%c90, %c0_107] : memref<104x128xf32, #tpu.memory_space<vmem>>, vector<1x32xf32>
    %cst_108 = arith.constant dense<0.000000e+00> : vector<2xf32>
    %293 = vector.multi_reduction <add>, %290, %cst_108 [1] : vector<2x32xf32> to vector<2xf32>
    %294 = vector.shape_cast %293 : vector<2xf32> to vector<2x1xf32>
    %cst_109 = arith.constant 3.200000e+01 : f32
    %295 = vector.broadcast %cst_109 : f32 to vector<2x1xf32>
    %296 = arith.divf %294, %295 : vector<2x1xf32>
    %297 = arith.mulf %290, %290 : vector<2x32xf32>
    %cst_110 = arith.constant dense<0.000000e+00> : vector<2xf32>
    %298 = vector.multi_reduction <add>, %297, %cst_110 [1] : vector<2x32xf32> to vector<2xf32>
    %299 = vector.shape_cast %298 : vector<2xf32> to vector<2x1xf32>
    %cst_111 = arith.constant 3.200000e+01 : f32
    %300 = vector.broadcast %cst_111 : f32 to vector<2x1xf32>
    %301 = arith.divf %299, %300 : vector<2x1xf32>
    %302 = arith.mulf %296, %296 : vector<2x1xf32>
    %303 = arith.subf %301, %302 : vector<2x1xf32>
    %304 = vector.broadcast %296 : vector<2x1xf32> to vector<2x32xf32>
    %305 = arith.subf %290, %304 : vector<2x32xf32>
    %cst_112 = arith.constant 9.99999974E-6 : f32
    %306 = vector.broadcast %cst_112 : f32 to vector<2x1xf32>
    %307 = arith.addf %303, %306 : vector<2x1xf32>
    %308 = math.rsqrt %307 : vector<2x1xf32>
    %309 = vector.broadcast %308 : vector<2x1xf32> to vector<2x32xf32>
    %310 = arith.mulf %305, %309 : vector<2x32xf32>
    %311 = vector.broadcast %291 : vector<1x32xf32> to vector<2x32xf32>
    %312 = arith.mulf %310, %311 : vector<2x32xf32>
    %313 = vector.broadcast %292 : vector<1x32xf32> to vector<2x32xf32>
    %314 = arith.addf %312, %313 : vector<2x32xf32>
    %cst_113 = arith.constant dense<0.000000e+00> : vector<2x128xf32>
    %315 = tpu.matmul %190, %0, %cst_113 {dimension_numbers = #tpu.dot_dimension_numbers<[1], [0], [0], [1], [0, 0, 1, 1], [], []>} : vector<2x32xf32>, vector<32x128xf32>, vector<2x128xf32> -> vector<2x128xf32>
    %316 = vector.extract_strided_slice %315 {offsets = [0, 96], sizes = [2, 32], strides = [1, 1]} : vector<2x128xf32> to vector<2x32xf32>
    %c88 = arith.constant 88 : index
    %c0_114 = arith.constant 0 : index
    %317 = vector.load %arg3[%c88, %c0_114] : memref<104x128xf32, #tpu.memory_space<vmem>>, vector<1x32xf32>
    %318 = vector.broadcast %317 : vector<1x32xf32> to vector<2x32xf32>
    %319 = arith.addf %316, %318 : vector<2x32xf32>
    %320 = arith.addf %314, %319 : vector<2x32xf32>
    %c91 = arith.constant 91 : index
    %c0_115 = arith.constant 0 : index
    %321 = vector.load %arg3[%c91, %c0_115] : memref<104x128xf32, #tpu.memory_space<vmem>>, vector<1x32xf32>
    %c92 = arith.constant 92 : index
    %c0_116 = arith.constant 0 : index
    %322 = vector.load %arg3[%c92, %c0_116] : memref<104x128xf32, #tpu.memory_space<vmem>>, vector<1x32xf32>
    %cst_117 = arith.constant dense<0.000000e+00> : vector<2xf32>
    %323 = vector.multi_reduction <add>, %320, %cst_117 [1] : vector<2x32xf32> to vector<2xf32>
    %324 = vector.shape_cast %323 : vector<2xf32> to vector<2x1xf32>
    %cst_118 = arith.constant 3.200000e+01 : f32
    %325 = vector.broadcast %cst_118 : f32 to vector<2x1xf32>
    %326 = arith.divf %324, %325 : vector<2x1xf32>
    %327 = arith.mulf %320, %320 : vector<2x32xf32>
    %cst_119 = arith.constant dense<0.000000e+00> : vector<2xf32>
    %328 = vector.multi_reduction <add>, %327, %cst_119 [1] : vector<2x32xf32> to vector<2xf32>
    %329 = vector.shape_cast %328 : vector<2xf32> to vector<2x1xf32>
    %cst_120 = arith.constant 3.200000e+01 : f32
    %330 = vector.broadcast %cst_120 : f32 to vector<2x1xf32>
    %331 = arith.divf %329, %330 : vector<2x1xf32>
    %332 = arith.mulf %326, %326 : vector<2x1xf32>
    %333 = arith.subf %331, %332 : vector<2x1xf32>
    %334 = vector.broadcast %326 : vector<2x1xf32> to vector<2x32xf32>
    %335 = arith.subf %320, %334 : vector<2x32xf32>
    %cst_121 = arith.constant 9.99999974E-6 : f32
    %336 = vector.broadcast %cst_121 : f32 to vector<2x1xf32>
    %337 = arith.addf %333, %336 : vector<2x1xf32>
    %338 = math.rsqrt %337 : vector<2x1xf32>
    %339 = vector.broadcast %338 : vector<2x1xf32> to vector<2x32xf32>
    %340 = arith.mulf %335, %339 : vector<2x32xf32>
    %341 = vector.broadcast %321 : vector<1x32xf32> to vector<2x32xf32>
    %342 = arith.mulf %340, %341 : vector<2x32xf32>
    %343 = vector.broadcast %322 : vector<1x32xf32> to vector<2x32xf32>
    %344 = arith.addf %342, %343 : vector<2x32xf32>
    %c96 = arith.constant 96 : index
    %c0_122 = arith.constant 0 : index
    %345 = vector.load %arg2[%c96, %c0_122] : memref<132x2048xbf16, #tpu.memory_space<vmem>>, vector<32x2048xbf16>
    %c131 = arith.constant 131 : index
    %c0_123 = arith.constant 0 : index
    %346 = vector.load %arg2[%c131, %c0_123] : memref<132x2048xbf16, #tpu.memory_space<vmem>>, vector<1x2048xbf16>
    %347 = arith.truncf %344 : vector<2x32xf32> to vector<2x32xbf16>
    %cst_124 = arith.constant dense<0.000000e+00> : vector<2x2048xf32>
    %348 = tpu.matmul %347, %345, %cst_124 {dimension_numbers = #tpu.dot_dimension_numbers<[1], [0], [0], [1], [0, 0, 1, 1], [], []>} : vector<2x32xbf16>, vector<32x2048xbf16>, vector<2x2048xf32> -> vector<2x2048xf32>
    %349 = arith.extf %346 : vector<1x2048xbf16> to vector<1x2048xf32>
    %350 = vector.broadcast %349 : vector<1x2048xf32> to vector<2x2048xf32>
    %351 = arith.addf %348, %350 : vector<2x2048xf32>
    %cst_125 = arith.constant 0.000000e+00 : f32
    %352 = vector.broadcast %cst_125 : f32 to vector<2x2048xf32>
    %353 = arith.maximumf %351, %352 : vector<2x2048xf32>
    %c208_126 = arith.constant 208 : index
    %c0_127 = arith.constant 0 : index
    %354 = vector.load %arg1[%c208_126, %c0_127] : memref<2256x128xbf16, #tpu.memory_space<vmem>>, vector<2048x128xbf16>
    %355 = arith.truncf %353 : vector<2x2048xf32> to vector<2x2048xbf16>
    %cst_128 = arith.constant dense<0.000000e+00> : vector<2x128xf32>
    %356 = tpu.matmul %355, %354, %cst_128 {dimension_numbers = #tpu.dot_dimension_numbers<[1], [0], [0], [1], [0, 0, 1, 1], [], []>} : vector<2x2048xbf16>, vector<2048x128xbf16>, vector<2x128xf32> -> vector<2x128xf32>
    %357 = vector.extract_strided_slice %356 {offsets = [0, 96], sizes = [2, 32], strides = [1, 1]} : vector<2x128xf32> to vector<2x32xf32>
    %c95 = arith.constant 95 : index
    %c0_129 = arith.constant 0 : index
    %358 = vector.load %arg3[%c95, %c0_129] : memref<104x128xf32, #tpu.memory_space<vmem>>, vector<1x32xf32>
    %359 = vector.broadcast %358 : vector<1x32xf32> to vector<2x32xf32>
    %360 = arith.addf %357, %359 : vector<2x32xf32>
    %361 = arith.addf %344, %360 : vector<2x32xf32>
    %c93 = arith.constant 93 : index
    %c0_130 = arith.constant 0 : index
    %362 = vector.load %arg3[%c93, %c0_130] : memref<104x128xf32, #tpu.memory_space<vmem>>, vector<1x32xf32>
    %c94 = arith.constant 94 : index
    %c0_131 = arith.constant 0 : index
    %363 = vector.load %arg3[%c94, %c0_131] : memref<104x128xf32, #tpu.memory_space<vmem>>, vector<1x32xf32>
    %cst_132 = arith.constant dense<0.000000e+00> : vector<2xf32>
    %364 = vector.multi_reduction <add>, %361, %cst_132 [1] : vector<2x32xf32> to vector<2xf32>
    %365 = vector.shape_cast %364 : vector<2xf32> to vector<2x1xf32>
    %cst_133 = arith.constant 3.200000e+01 : f32
    %366 = vector.broadcast %cst_133 : f32 to vector<2x1xf32>
    %367 = arith.divf %365, %366 : vector<2x1xf32>
    %368 = arith.mulf %361, %361 : vector<2x32xf32>
    %cst_134 = arith.constant dense<0.000000e+00> : vector<2xf32>
    %369 = vector.multi_reduction <add>, %368, %cst_134 [1] : vector<2x32xf32> to vector<2xf32>
    %370 = vector.shape_cast %369 : vector<2xf32> to vector<2x1xf32>
    %cst_135 = arith.constant 3.200000e+01 : f32
    %371 = vector.broadcast %cst_135 : f32 to vector<2x1xf32>
    %372 = arith.divf %370, %371 : vector<2x1xf32>
    %373 = arith.mulf %367, %367 : vector<2x1xf32>
    %374 = arith.subf %372, %373 : vector<2x1xf32>
    %375 = vector.broadcast %367 : vector<2x1xf32> to vector<2x32xf32>
    %376 = arith.subf %361, %375 : vector<2x32xf32>
    %cst_136 = arith.constant 9.99999974E-6 : f32
    %377 = vector.broadcast %cst_136 : f32 to vector<2x1xf32>
    %378 = arith.addf %374, %377 : vector<2x1xf32>
    %379 = math.rsqrt %378 : vector<2x1xf32>
    %380 = vector.broadcast %379 : vector<2x1xf32> to vector<2x32xf32>
    %381 = arith.mulf %376, %380 : vector<2x32xf32>
    %382 = vector.broadcast %362 : vector<1x32xf32> to vector<2x32xf32>
    %383 = arith.mulf %381, %382 : vector<2x32xf32>
    %384 = vector.broadcast %363 : vector<1x32xf32> to vector<2x32xf32>
    %385 = arith.addf %383, %384 : vector<2x32xf32>
    %c96_137 = arith.constant 96 : index
    %c0_138 = arith.constant 0 : index
    %386 = vector.load %arg3[%c96_137, %c0_138] : memref<104x128xf32, #tpu.memory_space<vmem>>, vector<1x32xf32>
    %c97 = arith.constant 97 : index
    %c0_139 = arith.constant 0 : index
    %387 = vector.load %arg3[%c97, %c0_139] : memref<104x128xf32, #tpu.memory_space<vmem>>, vector<1x32xf32>
    %cst_140 = arith.constant dense<0.000000e+00> : vector<2xf32>
    %388 = vector.multi_reduction <add>, %385, %cst_140 [1] : vector<2x32xf32> to vector<2xf32>
    %389 = vector.shape_cast %388 : vector<2xf32> to vector<2x1xf32>
    %cst_141 = arith.constant 3.200000e+01 : f32
    %390 = vector.broadcast %cst_141 : f32 to vector<2x1xf32>
    %391 = arith.divf %389, %390 : vector<2x1xf32>
    %392 = arith.mulf %385, %385 : vector<2x32xf32>
    %cst_142 = arith.constant dense<0.000000e+00> : vector<2xf32>
    %393 = vector.multi_reduction <add>, %392, %cst_142 [1] : vector<2x32xf32> to vector<2xf32>
    %394 = vector.shape_cast %393 : vector<2xf32> to vector<2x1xf32>
    %cst_143 = arith.constant 3.200000e+01 : f32
    %395 = vector.broadcast %cst_143 : f32 to vector<2x1xf32>
    %396 = arith.divf %394, %395 : vector<2x1xf32>
    %397 = arith.mulf %391, %391 : vector<2x1xf32>
    %398 = arith.subf %396, %397 : vector<2x1xf32>
    %399 = vector.broadcast %391 : vector<2x1xf32> to vector<2x32xf32>
    %400 = arith.subf %385, %399 : vector<2x32xf32>
    %cst_144 = arith.constant 9.99999974E-6 : f32
    %401 = vector.broadcast %cst_144 : f32 to vector<2x1xf32>
    %402 = arith.addf %398, %401 : vector<2x1xf32>
    %403 = math.rsqrt %402 : vector<2x1xf32>
    %404 = vector.broadcast %403 : vector<2x1xf32> to vector<2x32xf32>
    %405 = arith.mulf %400, %404 : vector<2x32xf32>
    %406 = vector.broadcast %386 : vector<1x32xf32> to vector<2x32xf32>
    %407 = arith.mulf %405, %406 : vector<2x32xf32>
    %408 = vector.broadcast %387 : vector<1x32xf32> to vector<2x32xf32>
    %409 = arith.addf %407, %408 : vector<2x32xf32>
    %cst_145 = arith.constant dense<0.000000e+00> : vector<2x128xf32>
    %410 = tpu.matmul %409, %1, %cst_145 {dimension_numbers = #tpu.dot_dimension_numbers<[1], [0], [0], [1], [0, 0, 1, 1], [], []>} : vector<2x32xf32>, vector<32x128xf32>, vector<2x128xf32> -> vector<2x128xf32>
    %c98 = arith.constant 98 : index
    %c0_146 = arith.constant 0 : index
    %411 = vector.load %arg3[%c98, %c0_146] : memref<104x128xf32, #tpu.memory_space<vmem>>, vector<1x128xf32>
    %412 = vector.broadcast %411 : vector<1x128xf32> to vector<2x128xf32>
    %413 = arith.addf %410, %412 : vector<2x128xf32>
    %c0_147 = arith.constant 0 : index
    %c0_148 = arith.constant 0 : index
    %414 = vector.load %arg4[%c0_147, %c0_148] : memref<2x128xf32, #tpu.memory_space<vmem>>, vector<2x128xf32>
    tpu.vector_store %arg4[%c0_147, %c0_148], %413 {strides = array<i32>} : memref<2x128xf32, #tpu.memory_space<vmem>>, vector<2x128xf32>,
    return
  }
}

</mosaic_0001>

<bundles_post_ra>
// kernel: tpu_custom_call.1
= control target key start
LH: loop header
LB: loop body
LE: loop exit
PB: predicated region body
PF: predicated region fallthrough
CT: control target
= control target key end

     0   :  { %9 = vsyncpa [#allocation3], 0  ;;  %s9225_s0 = inlined_call_operand.hbm [shape: bf16[4,2,208], index: 0, kind: input, shape index: {}]   ;;  %s9226_s1 = inlined_call_operand.hbm [shape: bf16[2256,128], index: 1, kind: input, shape index: {}]   ;;  %s9227_s2 = inlined_call_operand.hbm [shape: bf16[132,2048], index: 2, kind: input, shape index: {}]   ;;  %s9228_s3 = inlined_call_operand.hbm [shape: f32[104,128], index: 3, kind: input, shape index: {}]   ;;  %s9229_s4 = inlined_call_operand.hbm [shape: f32[2,128], index: 4, kind: output, shape index: {}]  }
   0x1   :  { %10 = vsyncpa [#allocation6], 0 }
   0x2   :  { %11 = vsyncpa [#allocation9], 0 }
   0x3   :  { %12 = vsyncpa [#allocation4], 0  ;;  %s7724_s15 = smov [#allocation5]   ;;  %s7606_s19 = scalar_lea.hbm %s9226_s1, 18048 }
   0x4   :  { %s30_s16 = sshll.u32 %s7724_s15, 4  ;;  %p7607_p0 = scmp.ne.s32.totalorder %s9226_s1, %s7606_s19  ;;  %s31_s16 = int_to_ptr.vmem [resolvable:$true] %s30_s16 }
   0x5   :  { %p7610_p1 = scmp.lt.u32.totalorder %s7606_s19, %s9226_s1 }
   0x7   :  { %p7612_p2 = pnand %p7610_p1, %p7607_p0 }
   0x9   :  { %7615 = shalt.err (!%p7612_p2)
}
   0xa   :  { %s7616_s24 = scalar_lea.vmem %s31_s16, 18048  ;;  %p7621_p4 = scmp.lt.s32.totalorder %s31_s16, %s31_s16 }
   0xb   :  { %p7617_p3 = scmp.ne.s32.totalorder %s31_s16, %s7616_s24  ;;  %p7622_p5 = scmp.lt.s32.totalorder %s7616_s24, %s7616_s24 }
   0xd   :  { %p7623_p6 = por %p7622_p5, %p7621_p4 }
   0xf   :  { %p7624_p7 = pnand %p7623_p6, %p7617_p3 }
  0x11   :  { %7627 = shalt.err (!%p7624_p7)
}
  0x12   :  { %s7725_s25 = smov 64   ;;  %s7726_s26 = smov 4  }
  0x13   :  { %36 = dma.hbm_to_vmem [thread:$0]  %s9226_s1, 18048, %s31_s16, [#allocation6], %s7725_s25, %s7725_s25, %s7726_s26  }
  0x14   :  { %s7727_s29 = smov [#allocation2]   ;;  %s7628_s7 = scalar_lea.hbm %s9225_s0, 128 }
  0x15   :  { %s18_s30 = sshll.u32 %s7727_s29, 4  ;;  %p7629_p8 = scmp.ne.s32.totalorder %s9225_s0, %s7628_s7  ;;  %s19_s30 = int_to_ptr.vmem [resolvable:$true] %s18_s30 }
  0x16   :  { %p7632_p9 = scmp.lt.u32.totalorder %s7628_s7, %s9225_s0 }
  0x18   :  { %p7634_p10 = pnand %p7632_p9, %p7629_p8 }
  0x1a   :  { %7637 = shalt.err (!%p7634_p10)
}
  0x1b   :  { %s7638_s12 = scalar_lea.vmem %s19_s30, 128  ;;  %p7643_p12 = scmp.lt.s32.totalorder %s19_s30, %s19_s30 }
  0x1c   :  { %p7639_p11 = scmp.ne.s32.totalorder %s19_s30, %s7638_s12  ;;  %p7644_p13 = scmp.lt.s32.totalorder %s7638_s12, %s7638_s12 }
  0x1e   :  { %p7645_p0 = por %p7644_p13, %p7643_p12 }
  0x20   :  { %p7646_p1 = pnand %p7645_p0, %p7639_p11 }
  0x22   :  { %7649 = shalt.err (!%p7646_p1)
}
  0x23   :  { %s7728_s1 = smov 32   ;;  %s7729_s13 = smov 2  }
  0x24   :  { %24 = dma.hbm_to_vmem [thread:$0]  %s9225_s0, 128, %s19_s30, [#allocation3], %s7728_s1, %s7728_s1, %s7729_s13  }
  0x25   :  { %s7730_s16 = smov [#allocation7]   ;;  %s7731_s18 = smov [#allocation8]  }
  0x26   :  { %s42_s17 = sshll.u32 %s7730_s16, 4  ;;  %s54_s19 = sshll.u32 %s7731_s18, 4  ;;  %s43_s17 = int_to_ptr.vmem [resolvable:$true] %s42_s17  ;;  %s55_s19 = int_to_ptr.vmem [resolvable:$true] %s54_s19 }
  0x27   :  { %s7650_s22 = scalar_lea.hbm %s9227_s2, 17408 }
  0x28   :  { %p7651_p2 = scmp.ne.s32.totalorder %s9227_s2, %s7650_s22  ;;  %p7654_p3 = scmp.lt.u32.totalorder %s7650_s22, %s9227_s2 }
  0x2a   :  { %p7656_p4 = pnand %p7654_p3, %p7651_p2 }
  0x2c   :  { %7659 = shalt.err (!%p7656_p4)
}
  0x2d   :  { %s7660_s0 = scalar_lea.vmem %s43_s17, 17408  ;;  %p7665_p6 = scmp.lt.s32.totalorder %s43_s17, %s43_s17 }
  0x2e   :  { %p7661_p5 = scmp.ne.s32.totalorder %s43_s17, %s7660_s0  ;;  %p7666_p7 = scmp.lt.s32.totalorder %s7660_s0, %s7660_s0 }
  0x30   :  { %p7667_p8 = por %p7666_p7, %p7665_p6 }
  0x32   :  { %p7668_p9 = pnand %p7667_p8, %p7661_p5 }
  0x34   :  { %7671 = shalt.err (!%p7668_p9)
}
  0x35   :  { %s7732_s28 = smov 1024   ;;  %s7672_s7 = scalar_lea.hbm %s9228_s3, 1664 }
  0x36   :  { %48 = dma.hbm_to_vmem [thread:$0]  %s9227_s2, 17408, %s43_s17, [#allocation6], %s7732_s28, %s7732_s28, %s7725_s25  }
  0x37   :  { %p7673_p10 = scmp.ne.s32.totalorder %s9228_s3, %s7672_s7  ;;  %p7676_p11 = scmp.lt.u32.totalorder %s7672_s7, %s9228_s3 }
  0x39   :  { %p7678_p12 = pnand %p7676_p11, %p7673_p10 }
  0x3b   :  { %7681 = shalt.err (!%p7678_p12)
}
  0x3c   :  { %s7682_s12 = scalar_lea.vmem %s55_s19, 1664  ;;  %p7687_p0 = scmp.lt.s32.totalorder %s55_s19, %s55_s19 }
  0x3d   :  { %p7683_p13 = scmp.ne.s32.totalorder %s55_s19, %s7682_s12  ;;  %p7688_p1 = scmp.lt.s32.totalorder %s7682_s12, %s7682_s12 }
  0x3f   :  { %p7689_p2 = por %p7688_p1, %p7687_p0 }
  0x41   :  { %p7690_p3 = pnand %p7689_p2, %p7683_p13 }
  0x43   :  { %7693 = shalt.err (!%p7690_p3)
}
  0x44   :  { %s7733_s2 = smov 128   ;;  %s7734_s13 = smov 8  }
  0x45   :  { %60 = dma.hbm_to_vmem [thread:$0]  %s9228_s3, 1664, %s55_s19, [#allocation9], %s7733_s2, %s7733_s2, %s7734_s13  }
  0x46   :  { %7716 = dma.done.wait [#allocation3], 128  }
  0x47   :  { %7717 = vsyncadd [#allocation3], 4294967168 }
  0x48   :  { %7718 = dma.done.wait [#allocation6], 35456  }
  0x49   :  { %7719 = vsyncadd [#allocation6], 4294931840 }
  0x4a   :  { %7720 = dma.done.wait [#allocation9], 1664  }
  0x4b   :  { %7721 = vsyncadd [#allocation9], 4294965632  ;;  %v9257_v0 = vmov 0   ;;  %v7822_v1 = vld [vmem:[#allocation5] sm:$0xff]   ;;  %v7826_v2 = vld [vmem:[#allocation5 + $0x8] sm:$0xff]   ;;  %v122_v5 = vlaneseq  ;;  %vm212_vm0 = vcmask 654336  }
  0x4c   :  { %216 = vmatprep.subr.bf16.mxu0 %v9257_v0  ;;  %290 = vmatprep.subr.bf16.mxu1 %v9257_v0  ;;  %v7736_v3 = vmov 1966171168   ;;  %v7832_v6 = vld [vmem:[#allocation5 + $0x10] sm:$0xff]   ;;  %v7840_v9 = vld [vmem:[#allocation5 + $0x18] sm:$0xff]   ;;  %v7847_v11 = vld [vmem:[#allocation5 + $0x20] sm:$0xff]   ;;  %v9250_v38 = vmov 0.0|0.0  }
  0x4d   :  { %217 = vmatpush1.bf16.msra.mxu0 %v7822_v1  ;;  %291 = vmatpush1.bf16.msra.mxu1 %v7822_v1  ;;  %v120_v4 = vunpack.c.l.s4 %v7736_v3  ;;  %v7836_v8 = vshrl.u32 %v122_v5, 7  ;;  %v7849_v12 = vld.sshfl [vmem:[#allocation2] sm:$0x11 pattern:$0x75316420]  ;;  %v7857_v16 = vld [vmem:[#allocation5 + $0x28] sm:$0xff]  }
  0x4e   :  { %218 = vmatprep.subr.bf16.mxu0 %v9257_v0  ;;  %292 = vmatprep.subr.bf16.mxu1 %v9257_v0  ;;  %v118_v13 = vcombine.high %v7849_v12, %v7849_v12  ;;  %v6084_v14 = vld.sshfl [vmem:[#allocation2 + $0x2] sm:$0x11 pattern:$0x75316420]  ;;  %v7865_v19 = vld [vmem:[#allocation5 + $0x30] sm:$0xff]   ;;  %v7879_v21 = vld [vmem:[#allocation5 + $0x40] sm:$0xff]  }
  0x4f   :  { %v121_v7 = vunpack.c.0.s8 %v120_v4  ;;  %9383 = vst [vmem:[#allocation15_spill] sm:$0xff] %v7836_v8  ;;  %v271_v15 = vcombine.high %v6084_v14, %v6084_v14  ;;  %v7873_v20 = vld [vmem:[#allocation5 + $0x38] sm:$0xff]   ;;  %v7885_v22 = vld [vmem:[#allocation5 + $0x48] sm:$0xff]   ;;  %v7891_v23 = vld [vmem:[#allocation5 + $0x50] sm:$0xff]   ;;  %s7738_s3 = smov 96   ;;  %vm7739_vm1 = vmmov 0  }
  0x50   :  { %v7897_v24 = vld [vmem:[#allocation5 + $0x58] sm:$0xff]   ;;  %v7907_v27 = vld [vmem:[#allocation5 + $0x60] sm:$0xff]   ;;  %v74_v36 = vld [vmem:[#allocation8] sm:$0xff]  ;;  %v9254_v51 = vmov 0.0   ;;  %vm483_vm2 = vcmask 261120   ;;  %vm566_vm3 = vcmask 254976  }
  0x51   :  { %219 = vmatpush1.bf16.msra.mxu0 %v7826_v2  ;;  %293 = vmatpush1.bf16.msra.mxu1 %v7826_v2  ;;  %v7845_v10 = vsub.s32 %v121_v7, %v7836_v8  ;;  %v7903_v25 = vld.sshfl [vmem:[#allocation2 + $0x4] sm:$0x11 pattern:$0x75316420]  ;;  %v75_v37 = vld [vmem:[#allocation8 + $0x8] sm:$0xff]  ;;  %v77_v49 = vld [vmem:[#allocation8 + $0x18] sm:$0xff] }
  0x52   :  { %220 = vmatprep.subr.bf16.mxu0 %v9257_v0  ;;  %294 = vmatprep.subr.bf16.mxu1 %v9257_v0  ;;  %v7905_v26 = vld.sshfl [vmem:[#allocation2 + $0x6] sm:$0x11 pattern:$0x75316420]  ;;  %v345_v28 = vcombine.high %v7903_v25, %v7903_v25  ;;  %v7984_v39 = vpack.c.bf16 %v75_v37, %v74_v36  ;;  %v6083_v60 = vld [vmem:[#allocation8 + $0x40] ss:$0 sm:$0xff] }
  0x53   :  { %v132_v17 = vrot.slane %v118_v13, %v7845_v10  ;;  %v285_v18 = vrot.slane %v271_v15, %v7845_v10  ;;  %v419_v29 = vcombine.high %v7905_v26, %v7905_v26  ;;  %v125_v30 = vrot.slane %v7849_v12, %v7845_v10  ;;  %v76_v48 = vld [vmem:[#allocation8 + $0x10] sm:$0xff]  ;;  %v6091_v5 = vld [vmem:[#allocation8 + $0x42] ss:$0 sm:$0xff] }
  0x54   :  { %v278_v31 = vrot.slane %v6084_v14, %v7845_v10  ;;  %v359_v32 = vrot.slane %v345_v28, %v7845_v10  ;;  %v352_v34 = vrot.slane %v7903_v25, %v7845_v10  ;;  %v426_v35 = vrot.slane %v7905_v26, %v7845_v10  ;;  %9384 = vst [vmem:[#allocation16_spill] sm:$0xff] %v7984_v39  ;;  %v593_v14 = vld [vmem:[#allocation7] sm:$0xff]  ;;  %v618_v26 = vld [vmem:[#allocation7 + $0xc8] sm:$0xff] }
  0x55   :  { %221 = vmatpush1.bf16.msra.mxu0 %v7832_v6  ;;  %295 = vmatpush1.bf16.msra.mxu1 %v7832_v6  ;;  %v433_v33 = vrot.slane %v419_v29, %v7845_v10  ;;  %v7989_v50 = vpack.c.bf16 %v77_v49, %v76_v48  ;;  %v601_v15 = vld [vmem:[#allocation7 + $0x40] sm:$0xff] }
  0x56   :  { %222 = vmatprep.subr.bf16.mxu0 %v9257_v0  ;;  %296 = vmatprep.subr.bf16.mxu1 %v9257_v0  ;;  %v6092_v49 = vld [vmem:[#allocation8 + $0x43] ss:$0 sm:$0xff] }
  0x57   :  { %6082 = vmatprep.mubr.msk.bf16.mxu0 %vm212_vm0, %v132_v17  ;;  %6085 = vmatprep.mubr.msk.bf16.mxu1 %vm212_vm0, %v285_v18  ;;  %9385 = vst [vmem:[#allocation17_spill] sm:$0xff] %v7989_v50  ;;  %v6095_v17 = vcombine.high %v593_v14, %v601_v15  ;;  %v602_v18 = vld [vmem:[#allocation7 + $0x48] sm:$0xff] }
  0x59   :  { %223 = vmatpush1.bf16.msra.mxu0 %v7840_v9  ;;  %297 = vmatpush1.bf16.msra.mxu1 %v7840_v9 }
  0x5a   :  { %224 = vmatprep.subr.bf16.mxu0 %v9257_v0  ;;  %298 = vmatprep.subr.bf16.mxu1 %v9257_v0 }
  0x5d   :  { %225 = vmatpush1.bf16.msra.mxu0 %v7847_v11  ;;  %299 = vmatpush1.bf16.msra.mxu1 %v7847_v11 }
  0x5e   :  { %226 = vmatprep.subr.bf16.mxu0 %v9257_v0  ;;  %300 = vmatprep.subr.bf16.mxu1 %v9257_v0 }
  0x61   :  { %227 = vmatpush1.bf16.msra.mxu0 %v7857_v16  ;;  %301 = vmatpush1.bf16.msra.mxu1 %v7857_v16 }
  0x62   :  { %228 = vmatprep.subr.bf16.mxu0 %v9257_v0  ;;  %302 = vmatprep.subr.bf16.mxu1 %v9257_v0 }
  0x65   :  { %229 = vmatpush1.bf16.msra.mxu0 %v7865_v19  ;;  %303 = vmatpush1.bf16.msra.mxu1 %v7865_v19 }
  0x66   :  { %230 = vmatprep.subr.bf16.mxu0 %v9257_v0  ;;  %304 = vmatprep.subr.bf16.mxu1 %v9257_v0 }
  0x69   :  { %231 = vmatpush1.bf16.msra.mxu0 %v7873_v20  ;;  %305 = vmatpush1.bf16.msra.mxu1 %v7873_v20 }
  0x6a   :  { %232 = vmatprep.subr.bf16.mxu0 %v9257_v0  ;;  %306 = vmatprep.subr.bf16.mxu1 %v9257_v0 }
  0x6d   :  { %233 = vmatpush1.bf16.msra.mxu0 %v7879_v21  ;;  %307 = vmatpush1.bf16.msra.mxu1 %v7879_v21 }
  0x6e   :  { %234 = vmatprep.subr.bf16.mxu0 %v9257_v0  ;;  %308 = vmatprep.subr.bf16.mxu1 %v9257_v0 }
  0x71   :  { %235 = vmatpush1.bf16.msra.mxu0 %v7885_v22  ;;  %309 = vmatpush1.bf16.msra.mxu1 %v7885_v22 }
  0x72   :  { %236 = vmatprep.subr.bf16.mxu0 %v9257_v0  ;;  %310 = vmatprep.subr.bf16.mxu1 %v9257_v0 }
  0x75   :  { %237 = vmatpush1.bf16.msra.mxu0 %v7891_v23  ;;  %311 = vmatpush1.bf16.msra.mxu1 %v7891_v23 }
  0x76   :  { %238 = vmatprep.subr.bf16.mxu0 %v9257_v0  ;;  %312 = vmatprep.subr.bf16.mxu1 %v9257_v0 }
  0x79   :  { %239 = vmatpush1.bf16.msra.mxu0 %v7897_v24  ;;  %313 = vmatpush1.bf16.msra.mxu1 %v7897_v24 }
  0x7a   :  { %240 = vmatprep.subr.bf16.mxu0 %v9257_v0  ;;  %314 = vmatprep.subr.bf16.mxu1 %v9257_v0 }
  0x7d   :  { %241 = vmatpush1.bf16.msra.mxu0 %v7907_v27  ;;  %315 = vmatpush1.bf16.msra.mxu1 %v7907_v27 }
  0x7e   :  { %364 = vmatprep.subr.bf16.mxu0 %v9257_v0  ;;  %438 = vmatprep.subr.bf16.mxu1 %v9257_v0 }
  0x80   :  { %249 = vmatmul.mubr.bf16.vlgmr.msra.gmra.mrb[0].mxu0 %v125_v30  ;;  %323 = vmatmul.mubr.bf16.vlgmr.msra.gmra.mrb[0].mxu1 %v278_v31  ;;  %v595_v30 = vld [vmem:[#allocation7 + $0x10] sm:$0xff] }
  0x81   :  { %365 = vmatpush1.bf16.msra.mxu0 %v7822_v1  ;;  %439 = vmatpush1.bf16.msra.mxu1 %v7822_v1  ;;  %v603_v31 = vld [vmem:[#allocation7 + $0x50] sm:$0xff] }
  0x82   :  { %366 = vmatprep.subr.bf16.mxu0 %v9257_v0  ;;  %440 = vmatprep.subr.bf16.mxu1 %v9257_v0 }
  0x83   :  { %6087 = vmatprep.mubr.msk.bf16.mxu0 %vm212_vm0, %v359_v32  ;;  %6089 = vmatprep.mubr.msk.bf16.mxu1 %vm212_vm0, %v433_v33  ;;  %v596_v32 = vld [vmem:[#allocation7 + $0x18] sm:$0xff]  ;;  %v6099_v33 = vcombine.high %v595_v30, %v603_v31 }
  0x85   :  { %367 = vmatpush1.bf16.msra.mxu0 %v7826_v2  ;;  %441 = vmatpush1.bf16.msra.mxu1 %v7826_v2 }
  0x86   :  { %368 = vmatprep.subr.bf16.mxu0 %v9257_v0  ;;  %442 = vmatprep.subr.bf16.mxu1 %v9257_v0 }
  0x89   :  { %369 = vmatpush1.bf16.msra.mxu0 %v7832_v6  ;;  %443 = vmatpush1.bf16.msra.mxu1 %v7832_v6 }
  0x8a   :  { %370 = vmatprep.subr.bf16.mxu0 %v9257_v0  ;;  %444 = vmatprep.subr.bf16.mxu1 %v9257_v0 }
  0x8d   :  { %371 = vmatpush1.bf16.msra.mxu0 %v7840_v9  ;;  %445 = vmatpush1.bf16.msra.mxu1 %v7840_v9 }
  0x8e   :  { %372 = vmatprep.subr.bf16.mxu0 %v9257_v0  ;;  %446 = vmatprep.subr.bf16.mxu1 %v9257_v0 }
  0x91   :  { %373 = vmatpush1.bf16.msra.mxu0 %v7847_v11  ;;  %447 = vmatpush1.bf16.msra.mxu1 %v7847_v11 }
  0x92   :  { %374 = vmatprep.subr.bf16.mxu0 %v9257_v0  ;;  %448 = vmatprep.subr.bf16.mxu1 %v9257_v0 }
  0x95   :  { %375 = vmatpush1.bf16.msra.mxu0 %v7857_v16  ;;  %449 = vmatpush1.bf16.msra.mxu1 %v7857_v16  ;;  %v594_v16 = vld [vmem:[#allocation7 + $0x8] sm:$0xff] }
  0x96   :  { %376 = vmatprep.subr.bf16.mxu0 %v9257_v0  ;;  %450 = vmatprep.subr.bf16.mxu1 %v9257_v0 }
  0x99   :  { %377 = vmatpush1.bf16.msra.mxu0 %v7865_v19  ;;  %451 = vmatpush1.bf16.msra.mxu1 %v7865_v19  ;;  %v6094_v19 = vcombine.low %v593_v14, %v601_v15 }
  0x9a   :  { %378 = vmatprep.subr.bf16.mxu0 %v9257_v0  ;;  %452 = vmatprep.subr.bf16.mxu1 %v9257_v0 }
  0x9d   :  { %379 = vmatpush1.bf16.msra.mxu0 %v7873_v20  ;;  %453 = vmatpush1.bf16.msra.mxu1 %v7873_v20  ;;  %v6096_v20 = vcombine.low %v594_v16, %v602_v18 }
  0x9e   :  { %380 = vmatprep.subr.bf16.mxu0 %v9257_v0  ;;  %454 = vmatprep.subr.bf16.mxu1 %v9257_v0 }
  0xa1   :  { %381 = vmatpush1.bf16.msra.mxu0 %v7879_v21  ;;  %455 = vmatpush1.bf16.msra.mxu1 %v7879_v21  ;;  %v6097_v21 = vcombine.high %v594_v16, %v602_v18  ;;  %v607_v18 = vld [vmem:[#allocation7 + $0x70] sm:$0xff] }
  0xa2   :  { %382 = vmatprep.subr.bf16.mxu0 %v9257_v0  ;;  %456 = vmatprep.subr.bf16.mxu1 %v9257_v0 }
  0xa5   :  { %383 = vmatpush1.bf16.msra.mxu0 %v7885_v22  ;;  %457 = vmatpush1.bf16.msra.mxu1 %v7885_v22  ;;  %v609_v22 = vld [vmem:[#allocation7 + $0x80] sm:$0xff] }
  0xa6   :  { %384 = vmatprep.subr.bf16.mxu0 %v9257_v0  ;;  %458 = vmatprep.subr.bf16.mxu1 %v9257_v0 }
  0xa9   :  { %385 = vmatpush1.bf16.msra.mxu0 %v7891_v23  ;;  %459 = vmatpush1.bf16.msra.mxu1 %v7891_v23  ;;  %v617_v23 = vld [vmem:[#allocation7 + $0xc0] sm:$0xff] }
  0xaa   :  { %386 = vmatprep.subr.bf16.mxu0 %v9257_v0  ;;  %460 = vmatprep.subr.bf16.mxu1 %v9257_v0  ;;  %v6111_v25 = vcombine.high %v609_v22, %v617_v23 }
  0xad   :  { %387 = vmatpush1.bf16.msra.mxu0 %v7897_v24  ;;  %461 = vmatpush1.bf16.msra.mxu1 %v7897_v24  ;;  %v610_v24 = vld [vmem:[#allocation7 + $0x88] sm:$0xff] }
  0xae   :  { %388 = vmatprep.subr.bf16.mxu0 %v9257_v0  ;;  %462 = vmatprep.subr.bf16.mxu1 %v9257_v0  ;;  %v6112_v28 = vcombine.low %v610_v24, %v618_v26  ;;  %v6113_v29 = vcombine.high %v610_v24, %v618_v26  ;;  %v623_v26 = vld [vmem:[#allocation7 + $0xf0] sm:$0xff] }
  0xb1   :  { %389 = vmatpush1.bf16.msra.mxu0 %v7907_v27  ;;  %463 = vmatpush1.bf16.msra.mxu1 %v7907_v27  ;;  %v6110_v27 = vcombine.low %v609_v22, %v617_v23 }
  0xb2   :  { %7184 = vmatprep.subr.bf16.mxu0 %v9250_v38  ;;  %877 = vmatprep.subr.bf16.mxu1 %v6095_v17  ;;  %v599_v17 = vld [vmem:[#allocation7 + $0x30] sm:$0xff] }
  0xb3   :  { %v6107_v23 = vcombine.high %v599_v17, %v607_v18 }
  0xb4   :  { %397 = vmatmul.mubr.bf16.vlgmr.msra.gmra.mrb[4].mxu0 %v352_v34  ;;  %471 = vmatmul.mubr.bf16.vlgmr.msra.gmra.mrb[4].mxu1 %v426_v35  ;;  %v604_v34 = vld [vmem:[#allocation7 + $0x58] sm:$0xff]  ;;  %v6098_v35 = vcombine.low %v595_v30, %v603_v31 }
  0xb5   :  { %909 = vmatprep.mubr.bf16.mxu1 %v9257_v0  ;;  %7186 = vmatpush3.bf16.msra.mxu0 %v7984_v39  ;;  %v6100_v36 = vcombine.low %v596_v32, %v604_v34  ;;  %v6101_v37 = vcombine.high %v596_v32, %v604_v34 }
  0xb6   :  { %7187 = vmatprep.subr.bf16.mxu0 %v9250_v38  ;;  %7148 = vmatprep.mubr.msk.f32.mxu0 %vm7739_vm1, %v9254_v51 }
  0xb7   :  { %878 = vmatpush1.bf16.msra.mxu1 %v6094_v19  ;;  %v600_v19 = vld [vmem:[#allocation7 + $0x38] sm:$0xff] }
  0xb8   :  { %879 = vmatprep.subr.bf16.mxu1 %v6111_v25  ;;  %v615_v25 = vld [vmem:[#allocation7 + $0xb0] sm:$0xff] }
  0xb9   :  { %7189 = vmatpush3.bf16.msra.mxu0 %v7989_v50  ;;  %v6123_v31 = vcombine.high %v615_v25, %v623_v26 }
  0xba   :  { %918 = vmatprep.subr.bf16.mxu0 %v6097_v21 }
  0xbb   :  { %880 = vmatpush1.bf16.msra.mxu1 %v6110_v27  ;;  %v616_v27 = vld [vmem:[#allocation7 + $0xb8] sm:$0xff] }
  0xbc   :  { %959 = vmatprep.subr.bf16.mxu1 %v6099_v33  ;;  %v6122_v33 = vcombine.low %v615_v25, %v623_v26 }
 0x153   :  { %v250_v40 = vpop.f32.mrb[0].mxu0  ;;  %v324_v41 = vpop.f32.mrb[0].mxu1 }
 0x154   :  { %331 = vrot.lane.b32.xlu0 %v324_v41, %s7738_s3  ;;  %v252_v42 = vpop.f32.mrb[1].mxu0  ;;  %v326_v43 = vpop.f32.mrb[1].mxu1  ;;  %v260_v62 = vadd.f32 %v6083_v60, %v250_v40 }
 0x155   :  { %v253_v44 = vpop.f32.mrb[2].mxu0  ;;  %v327_v45 = vpop.f32.mrb[2].mxu1 }
 0x156   :  { %v254_v46 = vpop.f32.mrb[3].mxu0  ;;  %v328_v47 = vpop.f32.mrb[3].mxu1 }
 0x187   :  { %v398_v52 = vpop.f32.mrb[4].mxu0  ;;  %v472_v53 = vpop.f32.mrb[4].mxu1 }
 0x188   :  { %v474_v54 = vpop.f32.mrb[5].mxu1  ;;  %405 = vrot.lane.b32.xlu0 %v398_v52, %s7725_s25  ;;  %v400_v55 = vpop.f32.mrb[5].mxu0  ;;  %479 = vrot.lane.b32.xlu1 %v472_v53, %s7728_s1  ;;  %v6093_v53 = vld [vmem:[#allocation8 + $0x44] ss:$0 sm:$0xff] }
 0x189   :  { %v401_v56 = vpop.f32.mrb[6].mxu0  ;;  %v475_v57 = vpop.f32.mrb[6].mxu1  ;;  %v611_v55 = vld [vmem:[#allocation7 + $0x90] sm:$0xff] }
 0x18a   :  { %v402_v58 = vpop.f32.mrb[7].mxu0  ;;  %v476_v59 = vpop.f32.mrb[7].mxu1  ;;  %v619_v56 = vld [vmem:[#allocation7 + $0xd0] sm:$0xff]  ;;  %v612_v57 = vld [vmem:[#allocation7 + $0x98] sm:$0xff] }
 0x18b   :  { %v620_v58 = vld [vmem:[#allocation7 + $0xd8] sm:$0xff] }
 0x1c6   :  { %v332_v61 = vpop.permute.xlu0 %331 }
 0x1c7   :  { %v334_v63 = vadd.f32 %v332_v61, %v260_v62  ;;  %v6115_v61 = vcombine.high %v611_v55, %v619_v56  ;;  %v6117_v62 = vcombine.high %v612_v57, %v620_v58 }
 0x1fa   :  { %v406_v1 = vpop.permute.xlu0 %405  ;;  %v480_v2 = vpop.permute.xlu1 %479 }
 0x1fb   :  { %v408_v3 = vadd.f32 %v406_v1, %v334_v63  ;;  %v597_v63 = vld [vmem:[#allocation7 + $0x20] sm:$0xff] }
 0x1fc   :  { %v605_v1 = vld [vmem:[#allocation7 + $0x60] sm:$0xff] }
 0x1fd   :  { %v482_v4 = vadd.f32 %v480_v2, %v408_v3  ;;  %v598_v2 = vld [vmem:[#allocation7 + $0x28] sm:$0xff] }
 0x1fe   :  { %v606_v3 = vld [vmem:[#allocation7 + $0x68] sm:$0xff] }
 0x1ff   :  { %7149 = vmatmul.mubr.msk.f32.vlgmr.msra.gmra.mrb[8].mxu0 %vm483_vm2, %v482_v4  ;;  %v6104_v14 = vcombine.low %v598_v2, %v606_v3 }
 0x200   :  { %950 = vmatprep.mubr.bf16.mxu0 %v9257_v0  ;;  %919 = vmatpush1.bf16.msra.mxu0 %v6096_v20  ;;  %v608_v20 = vld [vmem:[#allocation7 + $0x78] sm:$0xff] }
 0x201   :  { %920 = vmatprep.subr.bf16.mxu0 %v6113_v29  ;;  %v6109_v24 = vcombine.high %v600_v19, %v608_v20  ;;  %v6106_v29 = vcombine.low %v599_v17, %v607_v18  ;;  %v6108_v30 = vcombine.low %v600_v19, %v608_v20 }
 0x204   :  { %921 = vmatpush1.bf16.msra.mxu0 %v6112_v28  ;;  %v624_v28 = vld [vmem:[#allocation7 + $0xf8] sm:$0xff] }
 0x205   :  { %1000 = vmatprep.subr.bf16.mxu0 %v6101_v37  ;;  %v6125_v32 = vcombine.high %v616_v27, %v624_v28  ;;  %v6124_v34 = vcombine.low %v616_v27, %v624_v28  ;;  %v7241_v37 = vld [vmem:[#allocation5 + $0x68] sm:$0xff]  }
 0x2d2   :  { %v553_v6 = vpop.f32.mrb[8].mxu0 }
 0x2d3   :  { %v562_v7 = vadd.f32 %v6091_v5, %v553_v6  ;;  %v7150_v9 = vpop.f32.mrb[9].mxu0  ;;  %v6116_v5 = vcombine.low %v612_v57, %v620_v58  ;;  %v6103_v6 = vcombine.high %v597_v63, %v605_v1  ;;  %v7257_v57 = vld [vmem:[#allocation5 + $0x88] sm:$0xff]  }
 0x2d4   :  { %v613_v9 = vld [vmem:[#allocation7 + $0xa0] sm:$0xff] }
 0x2d5   :  { %v563_v10 = vadd.f32 %v562_v7, %v482_v4  ;;  %v6114_v4 = vcombine.low %v611_v55, %v619_v56  ;;  %v6105_v7 = vcombine.high %v598_v2, %v606_v3  ;;  %v7255_v55 = vld [vmem:[#allocation5 + $0xc8] sm:$0xff]   ;;  %v7264_v2 = vld [vmem:[#allocation5 + $0x158] sm:$0xff]  }
 0x2d6   :  { %v7256_v56 = vld [vmem:[#allocation5 + $0x148] sm:$0xff]   ;;  %v7265_v3 = vld [vmem:[#allocation5 + $0x98] sm:$0xff]  }
 0x2d7   :  { %v567_v11 = vsel %vm566_vm3, %v563_v10, 0.0  ;;  %v572_v12 = vmul.f32 %v563_v10, %v563_v10  ;;  %v7258_v58 = vld [vmem:[#allocation5 + $0x108] sm:$0xff]  }
 0x2d8   :  { %568 = vadd.xlane.f32.xlu1 %v567_v11  ;;  %v614_v11 = vld [vmem:[#allocation7 + $0xa8] sm:$0xff] }
 0x2d9   :  { %v573_v13 = vsel %vm566_vm3, %v572_v12, 0.0  ;;  %v622_v12 = vld [vmem:[#allocation7 + $0xe8] sm:$0xff] }
 0x2da   :  { %574 = vadd.xlane.f32.xlu0 %v573_v13  ;;  %v6102_v13 = vcombine.low %v597_v63, %v605_v1  ;;  %v6121_v16 = vcombine.high %v614_v11, %v622_v12  ;;  %v6120_v22 = vcombine.low %v614_v11, %v622_v12  ;;  %v7262_v63 = vld [vmem:[#allocation5 + $0x110] sm:$0xff]   ;;  %v7263_v1 = vld [vmem:[#allocation5 + $0xd8] sm:$0xff]   ;;  %v7272_v11 = vld [vmem:[#allocation5 + $0x228] sm:$0xff]  }
 0x2db   :  { %v8028_v12 = vld [vmem:[#allocation7 + $0x400] sm:$0x11] }
 0x2dc   :  { %v9243_v17 = vunpack.c.h.bf16 %v8028_v12 }
 0x365   :  { %v569_v40 = vpop.xlane.xlu1 %568 }
 0x366   :  { %v571_v41 = vmul.f32 0.03125, %v569_v40  ;;  %v7242_v40 = vld [vmem:[#allocation5 + $0xe8] sm:$0xff]  }
 0x367   :  { %v575_v42 = vpop.xlane.xlu0 %574 }
 0x368   :  { %v577_v43 = vmul.f32 %v571_v41, %v571_v41  ;;  %v576_v44 = vmul.f32 0.03125, %v575_v42  ;;  %v579_v47 = vsub.f32 %v563_v10, %v571_v41  ;;  %v621_v10 = vld [vmem:[#allocation7 + $0xe0] sm:$0xff]  ;;  %v7243_v41 = vld [vmem:[#allocation5 + $0xb0] sm:$0xff]  }
 0x369   :  { %v6119_v15 = vcombine.high %v613_v9, %v621_v10  ;;  %v6118_v21 = vcombine.low %v613_v9, %v621_v10  ;;  %v7244_v42 = vld [vmem:[#allocation5 + $0x130] sm:$0xff]   ;;  %v7270_v9 = vld [vmem:[#allocation5 + $0x120] sm:$0xff]   ;;  %v7271_v10 = vld [vmem:[#allocation5 + $0x1a8] sm:$0xff]  }
 0x36a   :  { %v578_v45 = vsub.f32 %v576_v44, %v577_v43  ;;  %v7245_v43 = vld [vmem:[#allocation5 + $0x70] sm:$0xff]  }
 0x36b   :  { %v7246_v44 = vld [vmem:[#allocation5 + $0xf0] sm:$0xff]  }
 0x36c   :  { %v580_v46 = vadd.f32 1e-05, %v578_v45  ;;  %v7247_v45 = vld [vmem:[#allocation5 + $0xb8] sm:$0xff]  }
 0x36e   :  { %7367 = vrsqrt.f32 %v580_v46  ;;  %v7248_v46 = vld [vmem:[#allocation5 + $0x138] sm:$0xff]  }
 0x378   :  { %v7368_v48 = vpop.eup %7367 }
 0x379   :  { %v582_v52 = vmul.f32 %v7368_v48, %v579_v47  ;;  %v7249_v47 = vld [vmem:[#allocation5 + $0x78] sm:$0xff]  }
 0x37a   :  { %v7250_v48 = vld [vmem:[#allocation5 + $0xf8] sm:$0xff]  }
 0x37b   :  { %v587_v54 = vmul.f32 %v6092_v49, %v582_v52  ;;  %v7251_v49 = vld [vmem:[#allocation5 + $0xc0] sm:$0xff]  }
 0x37c   :  { %v7252_v52 = vld [vmem:[#allocation5 + $0x140] sm:$0xff]  }
 0x37d   :  { %v8000_v59 = vadd.f32 %v6093_v53, %v587_v54  ;;  %v7253_v53 = vld [vmem:[#allocation5 + $0x80] sm:$0xff]  }
 0x37e   :  { %v7254_v54 = vld [vmem:[#allocation5 + $0x100] sm:$0xff]  }
 0x37f   :  { %v8004_v60 = vpack.c.bf16 %v8000_v59, %v8000_v59 }
 0x381   :  { %6126 = vmatmul.mubr.msk.bf16.vlgmr.msra.gmra.mrb[8].mxu1 %vm483_vm2, %v8004_v60  ;;  %6127 = vmatmul.mubr.msk.bf16.vlgmr.msra.gmra.mrb[12].mxu0 %vm483_vm2, %v8004_v60 }
 0x382   :  { %960 = vmatpush1.bf16.msra.mxu1 %v6098_v35  ;;  %1001 = vmatpush1.bf16.msra.mxu0 %v6100_v36  ;;  %v7239_v35 = vld [vmem:[#allocation5 + $0xa8] sm:$0xff]  }
 0x383   :  { %961 = vmatprep.subr.bf16.mxu1 %v6115_v61  ;;  %1002 = vmatprep.subr.bf16.mxu0 %v6117_v62  ;;  %v7240_v36 = vld [vmem:[#allocation5 + $0x128] sm:$0xff]   ;;  %v7260_v61 = vld [vmem:[#allocation5 + $0x150] sm:$0xff]  }
 0x384   :  { %991 = vmatprep.mubr.bf16.mxu1 %v9257_v0  ;;  %1032 = vmatprep.mubr.bf16.mxu0 %v9257_v0  ;;  %v7261_v62 = vld [vmem:[#allocation5 + $0x90] sm:$0xff]  }
 0x386   :  { %962 = vmatpush1.bf16.msra.mxu1 %v6114_v4  ;;  %1003 = vmatpush1.bf16.msra.mxu0 %v6116_v5  ;;  %v7266_v4 = vld [vmem:[#allocation5 + $0x118] sm:$0xff]   ;;  %v7267_v5 = vld [vmem:[#allocation5 + $0xe0] sm:$0xff]  }
 0x387   :  { %1041 = vmatprep.subr.bf16.mxu1 %v6103_v6  ;;  %1082 = vmatprep.subr.bf16.mxu0 %v6105_v7  ;;  %v7268_v6 = vld [vmem:[#allocation5 + $0x160] sm:$0xff]  }
 0x388   :  { %v7269_v7 = vld [vmem:[#allocation5 + $0xa0] sm:$0xff]  }
 0x389   :  { %6128 = vmatmul.mubr.msk.bf16.vlgmr.msra.gmra.mrb[12].mxu1 %vm483_vm2, %v8004_v60  ;;  %6129 = vmatmul.mubr.msk.bf16.vlgmr.msra.gmra.mrb[16].mxu0 %vm483_vm2, %v8004_v60 }
 0x38a   :  { %1042 = vmatpush1.bf16.msra.mxu1 %v6102_v13  ;;  %1083 = vmatpush1.bf16.msra.mxu0 %v6104_v14  ;;  %v8030_v13 = vld [vmem:[#allocation7 + $0x408] sm:$0x11]  ;;  %v8033_v14 = vsub.s32 0, %v7836_v8 }
 0x38b   :  { %1043 = vmatprep.subr.bf16.mxu1 %v6119_v15  ;;  %1084 = vmatprep.subr.bf16.mxu0 %v6121_v16  ;;  %v9245_v15 = vunpack.c.l.bf16 %v8028_v12  ;;  %v9244_v16 = vunpack.c.l.bf16 %v8030_v13  ;;  %v9242_v18 = vunpack.c.h.bf16 %v8030_v13 }
 0x38c   :  { %1073 = vmatprep.mubr.bf16.mxu1 %v9257_v0  ;;  %1114 = vmatprep.mubr.bf16.mxu0 %v9257_v0 }
 0x38d   :  { %v653_v19 = vrot.slane %v9245_v15, %v8033_v14  ;;  %v661_v20 = vrot.slane %v9244_v16, %v8033_v14 }
 0x38e   :  { %1044 = vmatpush1.bf16.msra.mxu1 %v6118_v21  ;;  %1085 = vmatpush1.bf16.msra.mxu0 %v6120_v22  ;;  %v657_v21 = vrot.slane %v9243_v17, %v8033_v14  ;;  %v665_v22 = vrot.slane %v9242_v18, %v8033_v14  ;;  %v8249_v18 = vld [vmem:[#allocation5 + $0x3a0] sm:$0xff]  }
 0x38f   :  { %1123 = vmatprep.subr.bf16.mxu1 %v6107_v23  ;;  %1164 = vmatprep.subr.bf16.mxu0 %v6109_v24  ;;  %v8051_v23 = vld [vmem:[#allocation7 + $0x410] sm:$0x11]  ;;  %v8053_v24 = vld [vmem:[#allocation7 + $0x418] sm:$0x11]  ;;  %9396 = vst [vmem:[#allocation28_spill] sm:$0xff] %v8249_v18 }
 0x391   :  { %6130 = vmatmul.mubr.msk.bf16.vlgmr.msra.gmra.mrb[16].mxu1 %vm483_vm2, %v8004_v60  ;;  %6131 = vmatmul.mubr.msk.bf16.vlgmr.msra.gmra.mrb[20].mxu0 %vm483_vm2, %v8004_v60 }
 0x392   :  { %1124 = vmatpush1.bf16.msra.mxu1 %v6106_v29  ;;  %1165 = vmatpush1.bf16.msra.mxu0 %v6108_v30 }
 0x393   :  { %1125 = vmatprep.subr.bf16.mxu1 %v6123_v31  ;;  %1166 = vmatprep.subr.bf16.mxu0 %v6125_v32 }
 0x394   :  { %1155 = vmatprep.mubr.bf16.mxu1 %v9257_v0  ;;  %1196 = vmatprep.mubr.bf16.mxu0 %v9257_v0 }
 0x396   :  { %1126 = vmatpush1.bf16.msra.mxu1 %v6122_v33  ;;  %1167 = vmatpush1.bf16.msra.mxu0 %v6124_v34 }
 0x397   :  { %6421 = vmatprep.subr.bf16.mxu1 %v7239_v35  ;;  %6443 = vmatprep.subr.bf16.mxu0 %v7240_v36  ;;  %v9240_v35 = vunpack.c.h.bf16 %v8051_v23  ;;  %v9239_v36 = vunpack.c.h.bf16 %v8053_v24 }
 0x399   :  { %6132 = vmatmul.mubr.msk.bf16.vlgmr.msra.gmra.mrb[20].mxu1 %vm483_vm2, %v8004_v60  ;;  %6133 = vmatmul.mubr.msk.bf16.vlgmr.msra.gmra.mrb[24].mxu0 %vm483_vm2, %v8004_v60  ;;  %v7259_v60 = vld [vmem:[#allocation5 + $0xd0] sm:$0xff]  }
 0x39a   :  { %6422 = vmatpush3.bf16.msra.mxu1 %v7241_v37  ;;  %6444 = vmatpush3.bf16.msra.mxu0 %v7242_v40 }
 0x39b   :  { %6423 = vmatprep.subr.bf16.mxu1 %v7243_v41  ;;  %6445 = vmatprep.subr.bf16.mxu0 %v7244_v42 }
 0x39e   :  { %6424 = vmatpush3.bf16.msra.mxu1 %v7245_v43  ;;  %6446 = vmatpush3.bf16.msra.mxu0 %v7246_v44 }
 0x39f   :  { %6425 = vmatprep.subr.bf16.mxu1 %v7247_v45  ;;  %6447 = vmatprep.subr.bf16.mxu0 %v7248_v46 }
 0x3a2   :  { %6426 = vmatpush3.bf16.msra.mxu1 %v7249_v47  ;;  %6448 = vmatpush3.bf16.msra.mxu0 %v7250_v48  ;;  %v673_v47 = vrot.slane %v9240_v35, %v8033_v14  ;;  %v681_v48 = vrot.slane %v9239_v36, %v8033_v14  ;;  %v8240_v36 = vld [vmem:[#allocation5 + $0x418] sm:$0xff]   ;;  %v8242_v35 = vld [vmem:[#allocation5 + $0x3e0] sm:$0xff]  }
 0x3a3   :  { %6427 = vmatprep.subr.bf16.mxu1 %v7251_v49  ;;  %6449 = vmatprep.subr.bf16.mxu0 %v7252_v52  ;;  %v7273_v49 = vld [vmem:[#allocation5 + $0x168] sm:$0xff]   ;;  %9393 = vst [vmem:[#allocation25_spill] sm:$0xff] %v8240_v36  ;;  %9394 = vst [vmem:[#allocation26_spill] sm:$0xff] %v8242_v35 }
 0x3a4   :  { %v7274_v52 = vld [vmem:[#allocation5 + $0x1e8] sm:$0xff]  }
 0x3a6   :  { %6428 = vmatpush3.bf16.msra.mxu1 %v7253_v53  ;;  %6450 = vmatpush3.bf16.msra.mxu0 %v7254_v54 }
 0x3a7   :  { %6429 = vmatprep.subr.bf16.mxu1 %v7255_v55  ;;  %6451 = vmatprep.subr.bf16.mxu0 %v7256_v56  ;;  %v7275_v55 = vld [vmem:[#allocation5 + $0x1b0] sm:$0xff]  }
 0x3a8   :  { %v7276_v56 = vld [vmem:[#allocation5 + $0x230] sm:$0xff]  }
 0x3aa   :  { %6430 = vmatpush3.bf16.msra.mxu1 %v7257_v57  ;;  %6452 = vmatpush3.bf16.msra.mxu0 %v7258_v58 }
 0x3ab   :  { %6431 = vmatprep.subr.bf16.mxu1 %v7259_v60  ;;  %6453 = vmatprep.subr.bf16.mxu0 %v7260_v61 }
 0x3ae   :  { %6432 = vmatpush3.bf16.msra.mxu1 %v7261_v62  ;;  %6454 = vmatpush3.bf16.msra.mxu0 %v7262_v63 }
 0x3af   :  { %6433 = vmatprep.subr.bf16.mxu1 %v7263_v1  ;;  %6455 = vmatprep.subr.bf16.mxu0 %v7264_v2 }
 0x3b2   :  { %6434 = vmatpush3.bf16.msra.mxu1 %v7265_v3  ;;  %6456 = vmatpush3.bf16.msra.mxu0 %v7266_v4  ;;  %v7277_v3 = vld [vmem:[#allocation5 + $0x170] sm:$0xff]  }
 0x3b3   :  { %6435 = vmatprep.subr.bf16.mxu1 %v7267_v5  ;;  %6457 = vmatprep.subr.bf16.mxu0 %v7268_v6  ;;  %v7278_v4 = vld [vmem:[#allocation5 + $0x1f0] sm:$0xff]  }
 0x3b6   :  { %6436 = vmatpush3.bf16.msra.mxu1 %v7269_v7  ;;  %6458 = vmatpush3.bf16.msra.mxu0 %v7270_v9  ;;  %v7279_v7 = vld [vmem:[#allocation5 + $0x1b8] sm:$0xff]  }
 0x3b7   :  { %6465 = vmatprep.subr.bf16.mxu1 %v7271_v10  ;;  %6487 = vmatprep.subr.bf16.mxu0 %v7272_v11  ;;  %v7280_v9 = vld [vmem:[#allocation5 + $0x238] sm:$0xff]  }
 0x454   :  { %v911_v25 = vpop.f32.mrb[8].mxu1  ;;  %v952_v26 = vpop.f32.mrb[12].mxu0 }
 0x455   :  { %v912_v27 = vadd.f32 %v911_v25, %v653_v19  ;;  %v953_v28 = vadd.f32 %v952_v26, %v661_v20  ;;  %v913_v29 = vpop.f32.mrb[9].mxu1  ;;  %v954_v30 = vpop.f32.mrb[13].mxu0  ;;  %v7283_v25 = vld [vmem:[#allocation5 + $0x1c0] sm:$0xff]  }
 0x456   :  { %v914_v31 = vadd.f32 %v913_v29, %v657_v21  ;;  %v955_v32 = vadd.f32 %v954_v30, %v665_v22  ;;  %v915_v33 = vpop.f32.mrb[10].mxu1  ;;  %v956_v34 = vpop.f32.mrb[14].mxu0  ;;  %v7281_v21 = vld [vmem:[#allocation5 + $0x178] sm:$0xff]   ;;  %v7284_v26 = vld [vmem:[#allocation5 + $0x240] sm:$0xff]  }
 0x457   :  { %v1205_v37 = vmax.f32 %v912_v27, 0.0  ;;  %v1207_v40 = vmax.f32 %v953_v28, 0.0  ;;  %v916_v41 = vpop.f32.mrb[11].mxu1  ;;  %v957_v42 = vpop.f32.mrb[15].mxu0  ;;  %v7282_v22 = vld [vmem:[#allocation5 + $0x1f8] sm:$0xff]   ;;  %v7285_v33 = vld [vmem:[#allocation5 + $0x180] sm:$0xff]  }
 0x458   :  { %v1206_v43 = vmax.f32 %v914_v31, 0.0  ;;  %v1208_v44 = vmax.f32 %v955_v32, 0.0  ;;  %v7286_v34 = vld [vmem:[#allocation5 + $0x200] sm:$0xff]   ;;  %v7287_v41 = vld [vmem:[#allocation5 + $0x1c8] sm:$0xff]  }
 0x459   :  { %v1477_v53 = vpack.c.bf16 %v1205_v37, %v1205_v37  ;;  %v1479_v54 = vpack.c.bf16 %v1207_v40, %v1207_v40  ;;  %v7288_v42 = vld [vmem:[#allocation5 + $0x248] sm:$0xff]  }
 0x45a   :  { %v1478_v45 = vpack.c.bf16 %v1206_v43, %v1206_v43  ;;  %v1480_v46 = vpack.c.bf16 %v1208_v44, %v1208_v44  ;;  %v8071_v43 = vld [vmem:[#allocation7 + $0x420] sm:$0x11]  ;;  %v8073_v44 = vld [vmem:[#allocation7 + $0x428] sm:$0x11] }
 0x45c   :  { %v8063_v57 = vpop.f32.mrb[12].mxu1  ;;  %v8065_v58 = vpop.f32.mrb[16].mxu0  ;;  %2293 = vmatprep.mubr.bf16.mxu1 %v1478_v45  ;;  %2333 = vmatprep.mubr.bf16.mxu0 %v1480_v46  ;;  %v7289_v45 = vld [vmem:[#allocation5 + $0x188] sm:$0xff]  }
 0x45d   :  { %v995_v60 = vpop.f32.mrb[13].mxu1  ;;  %v1036_v61 = vpop.f32.mrb[17].mxu0  ;;  %2294 = vmatmul.mubr.bf16.vlgmr.msra.gmra.mrb[24].mxu1 %v1477_v53  ;;  %2334 = vmatmul.mubr.bf16.vlgmr.msra.gmra.mrb[28].mxu0 %v1479_v54  ;;  %v7290_v46 = vld [vmem:[#allocation5 + $0x208] sm:$0xff]   ;;  %v9235_v53 = vunpack.c.h.bf16 %v8071_v43 }
 0x45e   :  { %v996_v62 = vadd.f32 %v995_v60, %v673_v47  ;;  %v1037_v63 = vadd.f32 %v1036_v61, %v681_v48  ;;  %6466 = vmatpush3.bf16.msra.mxu1 %v7273_v49  ;;  %6488 = vmatpush3.bf16.msra.mxu0 %v7274_v52  ;;  %v997_v1 = vpop.f32.mrb[14].mxu1  ;;  %v1038_v2 = vpop.f32.mrb[18].mxu0  ;;  %v9237_v47 = vunpack.c.l.bf16 %v8051_v23  ;;  %v9236_v48 = vunpack.c.l.bf16 %v8053_v24  ;;  %v7291_v49 = vld [vmem:[#allocation5 + $0x1d0] sm:$0xff]  }
 0x45f   :  { %v998_v5 = vpop.f32.mrb[15].mxu1  ;;  %v1039_v6 = vpop.f32.mrb[19].mxu0  ;;  %6467 = vmatprep.subr.bf16.mxu1 %v7275_v55  ;;  %6489 = vmatprep.subr.bf16.mxu0 %v7276_v56  ;;  %v7292_v52 = vld [vmem:[#allocation5 + $0x250] sm:$0xff]   ;;  %v9234_v56 = vunpack.c.h.bf16 %v8073_v44 }
 0x460   :  { %v1210_v10 = vmax.f32 %v996_v62, 0.0  ;;  %v1212_v11 = vmax.f32 %v1037_v63, 0.0  ;;  %v7293_v1 = vld [vmem:[#allocation5 + $0x190] sm:$0xff]  }
 0x461   :  { %v7294_v2 = vld [vmem:[#allocation5 + $0x210] sm:$0xff]  }
 0x462   :  { %v1482_v19 = vpack.c.bf16 %v1210_v10, %v1210_v10  ;;  %v1484_v20 = vpack.c.bf16 %v1212_v11, %v1212_v11  ;;  %6468 = vmatpush3.bf16.msra.mxu1 %v7277_v3  ;;  %6490 = vmatpush3.bf16.msra.mxu0 %v7278_v4  ;;  %v669_v3 = vrot.slane %v9237_v47, %v8033_v14  ;;  %v8235_v47 = vld [vmem:[#allocation5 + $0x398] sm:$0xff]  }
 0x463   :  { %6469 = vmatprep.subr.bf16.mxu1 %v7279_v7  ;;  %6491 = vmatprep.subr.bf16.mxu0 %v7280_v9  ;;  %v677_v4 = vrot.slane %v9236_v48, %v8033_v14  ;;  %v7295_v7 = vld [vmem:[#allocation5 + $0x1d8] sm:$0xff]   ;;  %v689_v10 = vrot.slane %v9235_v53, %v8033_v14  ;;  %v697_v11 = vrot.slane %v9234_v56, %v8033_v14 }
 0x464   :  { %v8067_v27 = vpop.f32.mrb[16].mxu1  ;;  %v8069_v28 = vpop.f32.mrb[20].mxu0  ;;  %2373 = vmatprep.mubr.bf16.mxu1 %v1482_v19  ;;  %2413 = vmatprep.mubr.bf16.mxu0 %v1484_v20  ;;  %v7296_v9 = vld [vmem:[#allocation5 + $0x258] sm:$0xff]   ;;  %9392 = vst [vmem:[#allocation24_spill] sm:$0xff] %v8235_v47 }
 0x465   :  { %v1077_v29 = vpop.f32.mrb[17].mxu1  ;;  %v1118_v30 = vpop.f32.mrb[21].mxu0  ;;  %v7297_v19 = vld [vmem:[#allocation5 + $0x198] sm:$0xff]  }
 0x466   :  { %6470 = vmatpush3.bf16.msra.mxu1 %v7281_v21  ;;  %6492 = vmatpush3.bf16.msra.mxu0 %v7282_v22  ;;  %v1079_v31 = vpop.f32.mrb[18].mxu1  ;;  %v1120_v32 = vpop.f32.mrb[22].mxu0  ;;  %v7298_v20 = vld [vmem:[#allocation5 + $0x218] sm:$0xff]   ;;  %v994_v21 = vadd.f32 %v8063_v57, %v669_v3  ;;  %v1035_v22 = vadd.f32 %v8065_v58, %v677_v4  ;;  %v7305_v58 = vld [vmem:[#allocation5 + $0x268] sm:$0xff]  }
 0x467   :  { %v1080_v37 = vpop.f32.mrb[19].mxu1  ;;  %v1121_v40 = vpop.f32.mrb[23].mxu0  ;;  %6471 = vmatprep.subr.bf16.mxu1 %v7283_v25  ;;  %6493 = vmatprep.subr.bf16.mxu0 %v7284_v26  ;;  %v7299_v25 = vld [vmem:[#allocation5 + $0x1e0] sm:$0xff]   ;;  %v1078_v31 = vadd.f32 %v1077_v29, %v689_v10  ;;  %v1119_v32 = vadd.f32 %v1118_v30, %v697_v11  ;;  %v7306_v29 = vld [vmem:[#allocation5 + $0x2e8] sm:$0xff]   ;;  %v7311_v3 = vld [vmem:[#allocation5 + $0x2b8] sm:$0xff]  }
 0x468   :  { %v7300_v26 = vld [vmem:[#allocation5 + $0x260] sm:$0xff]   ;;  %v1209_v37 = vmax.f32 %v994_v21, 0.0  ;;  %v1211_v40 = vmax.f32 %v1035_v22, 0.0  ;;  %v7312_v4 = vld [vmem:[#allocation5 + $0x338] sm:$0xff]   ;;  %v7321_v22 = vld [vmem:[#allocation5 + $0x288] sm:$0xff]  }
 0x469   :  { %v1216_v57 = vmax.f32 %v1119_v32, 0.0  ;;  %v7317_v10 = vld [vmem:[#allocation5 + $0x280] sm:$0xff]   ;;  %v8101_v21 = vld [vmem:[#allocation7 + $0x430] sm:$0x11]  ;;  %v7323_v32 = vld [vmem:[#allocation5 + $0x2d0] sm:$0xff]  }
 0x46a   :  { %6472 = vmatpush3.bf16.msra.mxu1 %v7285_v33  ;;  %6494 = vmatpush3.bf16.msra.mxu0 %v7286_v34  ;;  %v7301_v33 = vld [vmem:[#allocation5 + $0x1a0] sm:$0xff]   ;;  %v8226_v56 = vld [vmem:[#allocation5 + $0x3d8] sm:$0xff]  }
 0x46b   :  { %6473 = vmatprep.subr.bf16.mxu1 %v7287_v41  ;;  %6495 = vmatprep.subr.bf16.mxu0 %v7288_v42  ;;  %v7302_v34 = vld [vmem:[#allocation5 + $0x220] sm:$0xff]   ;;  %v7303_v41 = vld [vmem:[#allocation5 + $0x2a8] sm:$0xff]   ;;  %9390 = vst [vmem:[#allocation22_spill] sm:$0xff] %v8226_v56  ;;  %v8232_v48 = vld [vmem:[#allocation5 + $0x458] sm:$0xff]  }
 0x46c   :  { %v8078_v54 = vpop.f32.mrb[20].mxu1  ;;  %v8080_v55 = vpop.f32.mrb[24].mxu0  ;;  %v7304_v42 = vld [vmem:[#allocation5 + $0x328] sm:$0xff]   ;;  %v7318_v11 = vld [vmem:[#allocation5 + $0x300] sm:$0xff]   ;;  %9391 = vst [vmem:[#allocation23_spill] sm:$0xff] %v8232_v48 }
 0x46d   :  { %v8083_v60 = vpop.f32.mrb[21].mxu1  ;;  %v8085_v61 = vpop.f32.mrb[25].mxu0 }
 0x46e   :  { %6474 = vmatpush3.bf16.msra.mxu1 %v7289_v45  ;;  %6496 = vmatpush3.bf16.msra.mxu0 %v7290_v46  ;;  %v1161_v62 = vpop.f32.mrb[22].mxu1  ;;  %v1202_v63 = vpop.f32.mrb[26].mxu0  ;;  %v1214_v45 = vmax.f32 %v1078_v31, 0.0  ;;  %v1481_v46 = vpack.c.bf16 %v1209_v37, %v1209_v37  ;;  %v7322_v31 = vld [vmem:[#allocation5 + $0x308] sm:$0xff]   ;;  %v9231_v37 = vunpack.c.h.bf16 %v8101_v21 }
 0x46f   :  { %v1162_v5 = vpop.f32.mrb[23].mxu1  ;;  %v1203_v6 = vpop.f32.mrb[27].mxu0  ;;  %6475 = vmatprep.subr.bf16.mxu1 %v7291_v49  ;;  %6497 = vmatprep.subr.bf16.mxu0 %v7292_v52  ;;  %v1483_v49 = vpack.c.bf16 %v1211_v40, %v1211_v40  ;;  %v7307_v52 = vld [vmem:[#allocation5 + $0x2b0] sm:$0xff]   ;;  %v1488_v63 = vpack.c.bf16 %v1216_v57, %v1216_v57  ;;  %v8114_v57 = vld [vmem:[#allocation5 + $0x2d8] sm:$0xff]  }
 0x470   :  { %v1486_v30 = vpack.c.bf16 %v1214_v45, %v1214_v45  ;;  %v7308_v62 = vld [vmem:[#allocation5 + $0x330] sm:$0xff]   ;;  %v7313_v5 = vld [vmem:[#allocation5 + $0x278] sm:$0xff]  }
 0x471   :  { %v7314_v6 = vld [vmem:[#allocation5 + $0x2f8] sm:$0xff]   ;;  %v8112_v45 = vld [vmem:[#allocation5 + $0x310] sm:$0xff]  }
 0x472   :  { %6476 = vmatpush3.bf16.msra.mxu1 %v7293_v1  ;;  %6498 = vmatpush3.bf16.msra.mxu0 %v7294_v2  ;;  %v7309_v1 = vld [vmem:[#allocation5 + $0x270] sm:$0xff]  }
 0x473   :  { %6477 = vmatprep.subr.bf16.mxu1 %v7295_v7  ;;  %6499 = vmatprep.subr.bf16.mxu0 %v7296_v9  ;;  %v7310_v2 = vld [vmem:[#allocation5 + $0x2f0] sm:$0xff]   ;;  %v7315_v7 = vld [vmem:[#allocation5 + $0x2c0] sm:$0xff]  }
 0x474   :  { %v7316_v9 = vld [vmem:[#allocation5 + $0x340] sm:$0xff]  }
 0x476   :  { %6478 = vmatpush3.bf16.msra.mxu1 %v7297_v19  ;;  %6500 = vmatpush3.bf16.msra.mxu0 %v7298_v20  ;;  %v7319_v19 = vld [vmem:[#allocation5 + $0x2c8] sm:$0xff]  }
 0x477   :  { %6479 = vmatprep.subr.bf16.mxu1 %v7299_v25  ;;  %6501 = vmatprep.subr.bf16.mxu0 %v7300_v26  ;;  %v7320_v20 = vld [vmem:[#allocation5 + $0x348] sm:$0xff]   ;;  %v9233_v25 = vunpack.c.l.bf16 %v8071_v43  ;;  %v8104_v26 = vld [vmem:[#allocation7 + $0x438] sm:$0x11] }
 0x478   :  { %v9230_v40 = vunpack.c.h.bf16 %v8104_v26 }
 0x47a   :  { %6480 = vmatpush3.bf16.msra.mxu1 %v7301_v33  ;;  %6502 = vmatpush3.bf16.msra.mxu0 %v7302_v34  ;;  %v9232_v33 = vunpack.c.l.bf16 %v8073_v44  ;;  %v7324_v34 = vld [vmem:[#allocation5 + $0x350] sm:$0xff]  }
 0x47b   :  { %6509 = vmatprep.subr.bf16.mxu1 %v7303_v41  ;;  %6531 = vmatprep.subr.bf16.mxu0 %v7304_v42  ;;  %v7325_v41 = vld [vmem:[#allocation5 + $0x290] sm:$0xff]   ;;  %v685_v42 = vrot.slane %v9233_v25, %v8033_v14 }
 0x47c   :  { %v8224_v25 = vld [vmem:[#allocation5 + $0x410] sm:$0xff]  }
 0x47d   :  { %2374 = vmatmul.mubr.bf16.vlgmr.msra.gmra.mrb[28].mxu1 %v1481_v46  ;;  %2414 = vmatmul.mubr.bf16.vlgmr.msra.gmra.mrb[32].mxu0 %v1483_v49  ;;  %v8119_v46 = vld [vmem:[#allocation5 + $0x358] sm:$0xff]   ;;  %v705_v49 = vrot.slane %v9231_v37, %v8033_v14  ;;  %v8217_v37 = vld [vmem:[#allocation5 + $0x390] sm:$0xff]   ;;  %9389 = vst [vmem:[#allocation21_spill] sm:$0xff] %v8224_v25 }
 0x47e   :  { %6510 = vmatpush3.bf16.msra.mxu1 %v7305_v58  ;;  %2453 = vmatprep.mubr.bf16.mxu1 %v1486_v30  ;;  %v693_v58 = vrot.slane %v9232_v33, %v8033_v14  ;;  %v8127_v30 = vld [vmem:[#allocation5 + $0x298] sm:$0xff]   ;;  %9388 = vst [vmem:[#allocation20_spill] sm:$0xff] %v8217_v37 }
 0x47f   :  { %6532 = vmatpush3.bf16.msra.mxu0 %v7306_v29  ;;  %2493 = vmatprep.mubr.bf16.mxu0 %v1488_v63  ;;  %v713_v29 = vrot.slane %v9230_v40, %v8033_v14  ;;  %v8134_v63 = vld [vmem:[#allocation5 + $0x2e0] sm:$0xff]   ;;  %v8214_v40 = vld [vmem:[#allocation5 + $0x450] sm:$0xff]  }
 0x480   :  { %6511 = vmatprep.subr.bf16.mxu1 %v7307_v52  ;;  %6533 = vmatprep.subr.bf16.mxu0 %v7308_v62  ;;  %v1076_v52 = vadd.f32 %v8067_v27, %v685_v42  ;;  %v8132_v62 = vld [vmem:[#allocation5 + $0x318] sm:$0xff]   ;;  %v8143_v27 = vld [vmem:[#allocation5 + $0x2a0] sm:$0xff]   ;;  %v8170_v42 = vld [vmem:[#allocation5 + $0x3f0] sm:$0xff]   ;;  %9387 = vst [vmem:[#allocation19_spill] sm:$0xff] %v8214_v40 }
 0x482   :  { %6512 = vmatpush3.bf16.msra.mxu1 %v7309_v1  ;;  %v1117_v1 = vadd.f32 %v8069_v28, %v693_v58  ;;  %v8149_v28 = vld [vmem:[#allocation5 + $0x3a8] sm:$0xff]   ;;  %v8172_v58 = vld [vmem:[#allocation5 + $0x3b8] sm:$0xff]  }
 0x483   :  { %6534 = vmatpush3.bf16.msra.mxu0 %v7310_v2  ;;  %6513 = vmatprep.subr.bf16.mxu1 %v7311_v3  ;;  %v8138_v2 = vld [vmem:[#allocation5 + $0x360] sm:$0xff]   ;;  %v1160_v3 = vadd.f32 %v8083_v60, %v705_v49  ;;  %v8175_v49 = vld [vmem:[#allocation5 + $0x438] sm:$0xff]  }
 0x484   :  { %6535 = vmatprep.subr.bf16.mxu0 %v7312_v4  ;;  %v1201_v4 = vadd.f32 %v8085_v61, %v713_v29  ;;  %v8179_v29 = vld [vmem:[#allocation5 + $0x378] sm:$0xff]  }
 0x485   :  { %v1218_v60 = vmax.f32 %v1160_v3, 0.0  ;;  %v8188_v3 = vld [vmem:[#allocation5 + $0x440] sm:$0xff]  }
 0x486   :  { %6514 = vmatpush3.bf16.msra.mxu1 %v7313_v5  ;;  %v1213_v5 = vmax.f32 %v1076_v52, 0.0  ;;  %v1220_v61 = vmax.f32 %v1201_v4, 0.0  ;;  %v8183_v52 = vld [vmem:[#allocation5 + $0x3f8] sm:$0xff]   ;;  %v8191_v4 = vld [vmem:[#allocation5 + $0x380] sm:$0xff]  }
 0x487   :  { %6536 = vmatpush3.bf16.msra.mxu0 %v7314_v6  ;;  %6515 = vmatprep.subr.bf16.mxu1 %v7315_v7  ;;  %v8147_v6 = vld [vmem:[#allocation5 + $0x320] sm:$0xff]   ;;  %v1215_v7 = vmax.f32 %v1117_v1, 0.0 }
 0x488   :  { %6537 = vmatprep.subr.bf16.mxu0 %v7316_v9  ;;  %v8152_v9 = vld [vmem:[#allocation5 + $0x428] sm:$0xff]   ;;  %v8185_v1 = vld [vmem:[#allocation5 + $0x3c0] sm:$0xff]  }
 0x48a   :  { %6516 = vmatpush3.bf16.msra.mxu1 %v7317_v10  ;;  %v8155_v10 = vld [vmem:[#allocation5 + $0x368] sm:$0xff]  }
 0x48b   :  { %6538 = vmatpush3.bf16.msra.mxu0 %v7318_v11  ;;  %6517 = vmatprep.subr.bf16.mxu1 %v7319_v19  ;;  %v1485_v11 = vpack.c.bf16 %v1213_v5, %v1213_v5  ;;  %v8159_v19 = vld [vmem:[#allocation5 + $0x3e8] sm:$0xff]   ;;  %v8195_v5 = vld [vmem:[#allocation5 + $0x400] sm:$0xff]  }
 0x48c   :  { %6539 = vmatprep.subr.bf16.mxu0 %v7320_v20  ;;  %v1487_v20 = vpack.c.bf16 %v1215_v7, %v1215_v7  ;;  %v8197_v7 = vld [vmem:[#allocation5 + $0x3c8] sm:$0xff]  }
 0x48e   :  { %6518 = vmatpush3.bf16.msra.mxu1 %v7321_v22  ;;  %v8162_v22 = vld [vmem:[#allocation5 + $0x3b0] sm:$0xff]  }
 0x48f   :  { %6540 = vmatpush3.bf16.msra.mxu0 %v7322_v31  ;;  %6519 = vmatprep.subr.bf16.mxu1 %v7323_v32  ;;  %v1490_v31 = vpack.c.bf16 %v1218_v60, %v1218_v60  ;;  %v8164_v32 = vld [vmem:[#allocation5 + $0x430] sm:$0xff]   ;;  %v8200_v60 = vld [vmem:[#allocation5 + $0x448] sm:$0xff]  }
 0x490   :  { %6541 = vmatprep.subr.bf16.mxu0 %v7324_v34  ;;  %v1492_v34 = vpack.c.bf16 %v1220_v61, %v1220_v61  ;;  %v8203_v61 = vld [vmem:[#allocation5 + $0x388] sm:$0xff]  }
 0x492   :  { %6520 = vmatpush3.bf16.msra.mxu1 %v7325_v41  ;;  %v8167_v41 = vld [vmem:[#allocation5 + $0x370] sm:$0xff]  }
 0x493   :  { %6542 = vmatpush3.bf16.msra.mxu0 %v8112_v45  ;;  %6521 = vmatprep.subr.bf16.mxu1 %v8114_v57 }
 0x494   :  { %6543 = vmatprep.subr.bf16.mxu0 %v8119_v46 }
 0x496   :  { %6522 = vmatpush3.bf16.msra.mxu1 %v8127_v30 }
 0x497   :  { %6544 = vmatpush3.bf16.msra.mxu0 %v8132_v62  ;;  %6523 = vmatprep.subr.bf16.mxu1 %v8134_v63 }
 0x498   :  { %6545 = vmatprep.subr.bf16.mxu0 %v8138_v2 }
 0x49a   :  { %6524 = vmatpush3.bf16.msra.mxu1 %v8143_v27 }
 0x49b   :  { %6546 = vmatpush3.bf16.msra.mxu0 %v8147_v6  ;;  %6553 = vmatprep.subr.bf16.mxu1 %v8149_v28 }
 0x49c   :  { %6575 = vmatprep.subr.bf16.mxu0 %v8152_v9 }
 0x49d   :  { %2454 = vmatmul.mubr.bf16.vlgmr.msra.gmra.mrb[32].mxu1 %v1485_v11  ;;  %v9238_v11 = vunpack.c.l.bf16 %v8101_v21 }
 0x49e   :  { %2494 = vmatmul.mubr.bf16.vlgmr.msra.gmra.mrb[36].mxu0 %v1487_v20  ;;  %6554 = vmatpush3.bf16.msra.mxu1 %v8155_v10  ;;  %v8208_v20 = vld [vmem:[#allocation5 + $0x408] sm:$0xff]  }
 0x49f   :  { %2533 = vmatprep.mubr.bf16.mxu1 %v1490_v31  ;;  %6576 = vmatpush3.bf16.msra.mxu0 %v8159_v19  ;;  %v8210_v31 = vld [vmem:[#allocation5 + $0x3d0] sm:$0xff]   ;;  %v701_v33 = vrot.slane %v9238_v11, %v8033_v14 }
 0x4a0   :  { %2573 = vmatprep.mubr.bf16.mxu0 %v1492_v34  ;;  %6555 = vmatprep.subr.bf16.mxu1 %v8162_v22  ;;  %9386 = vst [vmem:[#allocation18_spill] sm:$0xff] %v8210_v31  ;;  %v9241_v34 = vunpack.c.l.bf16 %v8104_v26 }
 0x4a1   :  { %6577 = vmatprep.subr.bf16.mxu0 %v8164_v32  ;;  %v1158_v11 = vadd.f32 %v8078_v54, %v701_v33  ;;  %v8253_v54 = vld [vmem:[#allocation5 + $0x420] sm:$0xff]  }
 0x4a2   :  { %6556 = vmatpush3.bf16.msra.mxu1 %v8167_v41  ;;  %v709_v53 = vrot.slane %v9241_v34, %v8033_v14  ;;  %v8246_v34 = vld [vmem:[#allocation5 + $0x460] sm:$0xff]   ;;  %9397 = vst [vmem:[#allocation29_spill] sm:$0xff] %v8253_v54 }
 0x4a3   :  { %6578 = vmatpush3.bf16.msra.mxu0 %v8170_v42  ;;  %6557 = vmatprep.subr.bf16.mxu1 %v8172_v58  ;;  %9395 = vst [vmem:[#allocation27_spill] sm:$0xff] %v8246_v34  ;;  %v1217_v17 = vmax.f32 %v1158_v11, 0.0 }
 0x4a4   :  { %6579 = vmatprep.subr.bf16.mxu0 %v8175_v49  ;;  %v1199_v14 = vadd.f32 %v8080_v55, %v709_v53 }
 0x4a5   :  { %v1489_v53 = vpack.c.bf16 %v1217_v17, %v1217_v17 }
 0x4a6   :  { %6558 = vmatpush3.bf16.msra.mxu1 %v8179_v29  ;;  %v1219_v33 = vmax.f32 %v1199_v14, 0.0 }
 0x4a7   :  { %6580 = vmatpush3.bf16.msra.mxu0 %v8183_v52  ;;  %6559 = vmatprep.subr.bf16.mxu1 %v8185_v1 }
 0x4a8   :  { %6581 = vmatprep.subr.bf16.mxu0 %v8188_v3  ;;  %v1491_v55 = vpack.c.bf16 %v1219_v33, %v1219_v33 }
 0x4aa   :  { %6560 = vmatpush3.bf16.msra.mxu1 %v8191_v4 }
 0x4ab   :  { %6582 = vmatpush3.bf16.msra.mxu0 %v8195_v5  ;;  %6561 = vmatprep.subr.bf16.mxu1 %v8197_v7 }
 0x4ac   :  { %6583 = vmatprep.subr.bf16.mxu0 %v8200_v60 }
 0x4ae   :  { %6562 = vmatpush3.bf16.msra.mxu1 %v8203_v61 }
 0x4af   :  { %6584 = vmatpush3.bf16.msra.mxu0 %v8208_v20  ;;  %6563 = vmatprep.subr.bf16.mxu1 %v8210_v31 }
 0x4b0   :  { %6585 = vmatprep.subr.bf16.mxu0 %v8214_v40 }
 0x4b2   :  { %6564 = vmatpush3.bf16.msra.mxu1 %v8217_v37 }
 0x4b3   :  { %6586 = vmatpush3.bf16.msra.mxu0 %v8224_v25  ;;  %6565 = vmatprep.subr.bf16.mxu1 %v8226_v56 }
 0x4b4   :  { %6587 = vmatprep.subr.bf16.mxu0 %v8232_v48 }
 0x4b6   :  { %6566 = vmatpush3.bf16.msra.mxu1 %v8235_v47 }
 0x4b7   :  { %6588 = vmatpush3.bf16.msra.mxu0 %v8240_v36  ;;  %6567 = vmatprep.subr.bf16.mxu1 %v8242_v35 }
 0x4b8   :  { %6589 = vmatprep.subr.bf16.mxu0 %v8246_v34 }
 0x4ba   :  { %6568 = vmatpush3.bf16.msra.mxu1 %v8249_v18 }
 0x4bb   :  { %6590 = vmatpush3.bf16.msra.mxu0 %v8253_v54  ;;  %7190 = vmatprep.subr.bf16.mxu1 %v9250_v38 }
 0x4bd   :  { %2534 = vmatmul.mubr.bf16.vlgmr.msra.gmra.mrb[36].mxu1 %v1489_v53 }
 0x4be   :  { %2574 = vmatmul.mubr.bf16.vlgmr.msra.gmra.mrb[40].mxu0 %v1491_v55  ;;  %7192 = vmatpush3.bf16.msra.mxu1 %v7984_v39 }
 0x4bf   :  { %7193 = vmatprep.subr.bf16.mxu1 %v9250_v38  ;;  %7159 = vmatprep.mubr.msk.f32.mxu1 %vm7739_vm1, %v9254_v51 }
 0x4c0   :  { %3022 = vmatprep.mubr.bf16.mxu0 %v9257_v0 }
 0x4c2   :  { %7195 = vmatpush3.bf16.msra.mxu1 %v7989_v50 }
 0x530   :  { %v6437_v11 = vpop.f32.mrb[24].mxu1  ;;  %v6459_v17 = vpop.f32.mrb[28].mxu0 }
 0x531   :  { %v6438_v14 = vpop.f32.mrb[25].mxu1  ;;  %v6460_v16 = vpop.f32.mrb[29].mxu0 }
 0x532   :  { %v6439_v15 = vadd.f32 %v6438_v14, %v6437_v11  ;;  %v6461_v54 = vadd.f32 %v6460_v16, %v6459_v17  ;;  %v6440_v33 = vpop.f32.mrb[26].mxu1  ;;  %v6462_v53 = vpop.f32.mrb[30].mxu0 }
 0x533   :  { %v6441_v55 = vpop.f32.mrb[27].mxu1  ;;  %v6463_v18 = vpop.f32.mrb[31].mxu0 }
 0x534   :  { %v2336_v39 = vadd.f32 %v6461_v54, %v6439_v15 }
 0x550   :  { %v6481_v34 = vpop.f32.mrb[28].mxu1  ;;  %v6503_v38 = vpop.f32.mrb[32].mxu0 }
 0x551   :  { %v6482_v35 = vpop.f32.mrb[29].mxu1  ;;  %v6504_v36 = vpop.f32.mrb[33].mxu0 }
 0x552   :  { %v6483_v51 = vadd.f32 %v6482_v35, %v6481_v34  ;;  %v6505_v47 = vadd.f32 %v6504_v36, %v6503_v38  ;;  %v6484_v0 = vpop.f32.mrb[30].mxu1  ;;  %v6506_v48 = vpop.f32.mrb[34].mxu0 }
 0x553   :  { %v6485_v50 = vpop.f32.mrb[31].mxu1  ;;  %v6507_v56 = vpop.f32.mrb[35].mxu0 }
 0x554   :  { %v2376_v25 = vadd.f32 %v6483_v51, %v2336_v39 }
 0x556   :  { %v2416_v37 = vadd.f32 %v6505_v47, %v2376_v25 }
 0x570   :  { %v6525_v40 = vpop.f32.mrb[32].mxu1 }
 0x571   :  { %v6547_v11 = vpop.f32.mrb[36].mxu0  ;;  %v6526_v16 = vpop.f32.mrb[33].mxu1 }
 0x572   :  { %v6527_v17 = vadd.f32 %v6526_v16, %v6525_v40  ;;  %v6548_v14 = vpop.f32.mrb[37].mxu0  ;;  %v6528_v33 = vpop.f32.mrb[34].mxu1  ;;  %v6262_v40 = vld [vmem:[#allocation8 + $0x47] ss:$0 sm:$0xff] }
 0x573   :  { %v6549_v18 = vadd.f32 %v6548_v14, %v6547_v11  ;;  %v6550_v15 = vpop.f32.mrb[38].mxu0  ;;  %v6529_v54 = vpop.f32.mrb[35].mxu1  ;;  %v6266_v33 = vld [vmem:[#allocation8 + $0x48] ss:$0 sm:$0xff] }
 0x574   :  { %v2456_v53 = vadd.f32 %v6527_v17, %v2416_v37  ;;  %v6551_v55 = vpop.f32.mrb[39].mxu0 }
 0x576   :  { %v2496_v31 = vadd.f32 %v6549_v18, %v2456_v53 }
 0x590   :  { %v6569_v35 = vpop.f32.mrb[36].mxu1 }
 0x591   :  { %v6591_v38 = vpop.f32.mrb[40].mxu0  ;;  %v6570_v0 = vpop.f32.mrb[37].mxu1 }
 0x592   :  { %v6571_v36 = vadd.f32 %v6570_v0, %v6569_v35  ;;  %v6592_v50 = vpop.f32.mrb[41].mxu0  ;;  %v6572_v48 = vpop.f32.mrb[38].mxu1  ;;  %v6263_v0 = vld [vmem:[#allocation8 + $0x45] ss:$0 sm:$0xff] }
 0x593   :  { %v6593_v39 = vadd.f32 %v6592_v50, %v6591_v38  ;;  %v6594_v51 = vpop.f32.mrb[42].mxu0  ;;  %v6573_v47 = vpop.f32.mrb[39].mxu1  ;;  %v6264_v50 = vld [vmem:[#allocation8 + $0x46] ss:$0 sm:$0xff] }
 0x594   :  { %v2536_v56 = vadd.f32 %v6571_v36, %v2496_v31  ;;  %v6595_v25 = vpop.f32.mrb[43].mxu0  ;;  %v9398_v51 = vmov 0  }
 0x596   :  { %v2576_v34 = vadd.f32 %v6593_v39, %v2536_v56 }
 0x598   :  { %v2586_v16 = vadd.f32 %v6262_v40, %v2576_v34 }
 0x59a   :  { %v2587_v11 = vadd.f32 %v2586_v16, %v8000_v59 }
 0x59c   :  { %v2590_v37 = vsel %vm566_vm3, %v2587_v11, 0.0  ;;  %v2594_v17 = vmul.f32 %v2587_v11, %v2587_v11 }
 0x59d   :  { %2591 = vadd.xlane.f32.xlu0 %v2590_v37 }
 0x59e   :  { %v2595_v14 = vsel %vm566_vm3, %v2594_v17, 0.0 }
 0x59f   :  { %2596 = vadd.xlane.f32.xlu1 %v2595_v14  ;;  %v2730_v14 = vld [vmem:[#allocation7 + $0x100] sm:$0xff] }
 0x5b3   :  { %2694 = vrot.lane.b32.xlu0 %v6266_v33, %s7728_s1  ;;  %v2738_v33 = vld [vmem:[#allocation7 + $0x140] sm:$0xff] }
 0x62a   :  { %v2592_v18 = vpop.xlane.xlu0 %2591 }
 0x62b   :  { %v2593_v15 = vmul.f32 0.03125, %v2592_v18  ;;  %v2731_v18 = vld [vmem:[#allocation7 + $0x108] sm:$0xff] }
 0x62c   :  { %v2597_v54 = vpop.xlane.xlu1 %2596 }
 0x62d   :  { %v2599_v31 = vmul.f32 %v2593_v15, %v2593_v15  ;;  %v2598_v53 = vmul.f32 0.03125, %v2597_v54  ;;  %v2601_v38 = vsub.f32 %v2587_v11, %v2593_v15  ;;  %v6270_v15 = vcombine.high %v2730_v14, %v2738_v33  ;;  %v2739_v54 = vld [vmem:[#allocation7 + $0x148] sm:$0xff] }
 0x62e   :  { %v2695_v47 = vpop.permute.xlu0 %2694 }
 0x62f   :  { %v2600_v55 = vsub.f32 %v2598_v53, %v2599_v31  ;;  %v6269_v31 = vcombine.low %v2730_v14, %v2738_v33  ;;  %v6271_v53 = vcombine.low %v2731_v18, %v2739_v54  ;;  %2990 = vmatprep.subr.bf16.mxu0 %v6270_v15 }
 0x631   :  { %v2602_v35 = vadd.f32 1e-05, %v2600_v55  ;;  %v6272_v55 = vcombine.high %v2731_v18, %v2739_v54  ;;  %2991 = vmatpush1.bf16.msra.mxu0 %v6269_v31 }
 0x633   :  { %7369 = vrsqrt.f32 %v2602_v35  ;;  %3031 = vmatprep.subr.bf16.mxu1 %v6272_v55  ;;  %v2746_v35 = vld [vmem:[#allocation7 + $0x180] sm:$0xff] }
 0x63d   :  { %v7370_v59 = vpop.eup %7369 }
 0x63e   :  { %v2604_v36 = vmul.f32 %v7370_v59, %v2601_v38  ;;  %v2754_v38 = vld [vmem:[#allocation7 + $0x1c0] sm:$0xff]  ;;  %v2747_v59 = vld [vmem:[#allocation7 + $0x188] sm:$0xff] }
 0x640   :  { %v2609_v48 = vmul.f32 %v6263_v0, %v2604_v36  ;;  %v6286_v0 = vcombine.high %v2746_v35, %v2754_v38  ;;  %v2755_v36 = vld [vmem:[#allocation7 + $0x1c8] sm:$0xff] }
 0x642   :  { %v2614_v39 = vadd.f32 %v6264_v50, %v2609_v48  ;;  %v6285_v50 = vcombine.low %v2746_v35, %v2754_v38  ;;  %v6287_v48 = vcombine.low %v2747_v59, %v2755_v36  ;;  %2992 = vmatprep.subr.bf16.mxu0 %v6286_v0  ;;  %v6267_v38 = vld [vmem:[#allocation8 + $0x49] ss:$0 sm:$0xff]  ;;  %v6268_v0 = vld [vmem:[#allocation8 + $0x4a] ss:$0 sm:$0xff] }
 0x644   :  { %7160 = vmatmul.mubr.msk.f32.vlgmr.msra.gmra.mrb[40].mxu1 %vm483_vm2, %v2614_v39  ;;  %2993 = vmatpush1.bf16.msra.mxu0 %v6285_v50  ;;  %v2748_v50 = vld [vmem:[#allocation7 + $0x190] sm:$0xff] }
 0x645   :  { %3063 = vmatprep.mubr.bf16.mxu1 %v9398_v51  ;;  %3032 = vmatpush1.bf16.msra.mxu1 %v6271_v53 }
 0x717   :  { %v2684_v56 = vpop.f32.mrb[40].mxu1 }
 0x718   :  { %v2697_v25 = vadd.f32 %v2695_v47, %v2684_v56  ;;  %v7161_v40 = vpop.f32.mrb[41].mxu1  ;;  %v2732_v47 = vld [vmem:[#allocation7 + $0x110] sm:$0xff] }
 0x719   :  { %v2740_v56 = vld [vmem:[#allocation7 + $0x150] sm:$0xff] }
 0x71a   :  { %2699 = vrot.lane.b32.xlu1 %v2697_v25, %s7738_s3  ;;  %v2733_v25 = vld [vmem:[#allocation7 + $0x118] sm:$0xff]  ;;  %v6273_v40 = vcombine.low %v2732_v47, %v2740_v56 }
 0x78c   :  { %v2700_v34 = vpop.permute.xlu1 %2699 }
 0x78d   :  { %v2702_v16 = vadd.f32 %v2700_v34, %v2614_v39  ;;  %v6288_v39 = vcombine.high %v2747_v59, %v2755_v36  ;;  %v6274_v34 = vcombine.high %v2732_v47, %v2740_v56  ;;  %v2757_v47 = vld [vmem:[#allocation7 + $0x1d8] sm:$0xff] }
 0x78f   :  { %v2705_v11 = vsel %vm566_vm3, %v2702_v16, 0.0  ;;  %v2709_v37 = vmul.f32 %v2702_v16, %v2702_v16  ;;  %3033 = vmatprep.subr.bf16.mxu1 %v6288_v39  ;;  %3072 = vmatprep.subr.bf16.mxu0 %v6274_v34  ;;  %v2749_v39 = vld [vmem:[#allocation7 + $0x198] sm:$0xff] }
 0x790   :  { %2706 = vadd.xlane.f32.xlu1 %v2705_v11  ;;  %3034 = vmatpush1.bf16.msra.mxu1 %v6287_v48  ;;  %v2741_v11 = vld [vmem:[#allocation7 + $0x158] sm:$0xff]  ;;  %v2756_v48 = vld [vmem:[#allocation7 + $0x1d0] sm:$0xff] }
 0x791   :  { %v2710_v17 = vsel %vm566_vm3, %v2709_v37, 0.0  ;;  %v6275_v37 = vcombine.low %v2733_v25, %v2741_v11  ;;  %v6290_v34 = vcombine.high %v2748_v50, %v2756_v48 }
 0x792   :  { %2711 = vadd.xlane.f32.xlu0 %v2710_v17  ;;  %v6276_v17 = vcombine.high %v2733_v25, %v2741_v11  ;;  %v6292_v11 = vcombine.high %v2749_v39, %v2757_v47 }
 0x794   :  { %3113 = vmatprep.subr.bf16.mxu1 %v6276_v17  ;;  %v2734_v17 = vld [vmem:[#allocation7 + $0x120] sm:$0xff] }
 0x81d   :  { %v2707_v14 = vpop.xlane.xlu1 %2706 }
 0x81e   :  { %v2708_v33 = vmul.f32 0.03125, %v2707_v14  ;;  %v2742_v14 = vld [vmem:[#allocation7 + $0x160] sm:$0xff] }
 0x81f   :  { %v2712_v18 = vpop.xlane.xlu0 %2711 }
 0x820   :  { %v2714_v15 = vmul.f32 %v2708_v33, %v2708_v33  ;;  %v2713_v54 = vmul.f32 0.03125, %v2712_v18  ;;  %v2716_v55 = vsub.f32 %v2702_v16, %v2708_v33  ;;  %v2735_v16 = vld [vmem:[#allocation7 + $0x128] sm:$0xff]  ;;  %v6289_v18 = vcombine.low %v2748_v50, %v2756_v48  ;;  %v2744_v50 = vld [vmem:[#allocation7 + $0x170] sm:$0xff]  ;;  %v2737_v48 = vld [vmem:[#allocation7 + $0x138] sm:$0xff] }
 0x821   :  { %v2743_v33 = vld [vmem:[#allocation7 + $0x168] sm:$0xff] }
 0x822   :  { %v2715_v31 = vsub.f32 %v2713_v54, %v2714_v15  ;;  %v6291_v15 = vcombine.low %v2749_v39, %v2757_v47  ;;  %v6278_v54 = vcombine.high %v2734_v17, %v2742_v14  ;;  %v2745_v39 = vld [vmem:[#allocation7 + $0x178] sm:$0xff] }
 0x824   :  { %v2717_v53 = vadd.f32 1e-05, %v2715_v31  ;;  %v6280_v31 = vcombine.high %v2735_v16, %v2743_v33 }
 0x826   :  { %7371 = vrsqrt.f32 %v2717_v53  ;;  %v2750_v53 = vld [vmem:[#allocation7 + $0x1a0] sm:$0xff] }
 0x830   :  { %v7372_v35 = vpop.eup %7371 }
 0x831   :  { %v2719_v59 = vmul.f32 %v7372_v35, %v2716_v55  ;;  %v2758_v55 = vld [vmem:[#allocation7 + $0x1e0] sm:$0xff]  ;;  %v2751_v35 = vld [vmem:[#allocation7 + $0x1a8] sm:$0xff] }
 0x832   :  { %v6293_v47 = vcombine.low %v2750_v53, %v2758_v55 }
 0x833   :  { %v2724_v36 = vmul.f32 %v6267_v38, %v2719_v59  ;;  %v2759_v38 = vld [vmem:[#allocation7 + $0x1e8] sm:$0xff]  ;;  %v6277_v59 = vcombine.low %v2734_v17, %v2742_v14  ;;  %v6284_v17 = vcombine.high %v2737_v48, %v2745_v39  ;;  %v2752_v14 = vld [vmem:[#allocation7 + $0x1b0] sm:$0xff] }
 0x835   :  { %v8274_v56 = vadd.f32 %v6268_v0, %v2724_v36  ;;  %v6279_v0 = vcombine.low %v2735_v16, %v2743_v33  ;;  %v2736_v36 = vld [vmem:[#allocation7 + $0x130] sm:$0xff]  ;;  %v2753_v33 = vld [vmem:[#allocation7 + $0x1b8] sm:$0xff] }
 0x836   :  { %v2760_v16 = vld [vmem:[#allocation7 + $0x1f0] sm:$0xff] }
 0x837   :  { %v8278_v25 = vpack.c.bf16 %v8274_v56, %v8274_v56 }
 0x839   :  { %6301 = vmatmul.mubr.msk.bf16.vlgmr.msra.gmra.mrb[44].mxu0 %vm483_vm2, %v8278_v25  ;;  %6302 = vmatmul.mubr.msk.bf16.vlgmr.msra.gmra.mrb[44].mxu1 %vm483_vm2, %v8278_v25 }
 0x83a   :  { %3073 = vmatpush1.bf16.msra.mxu0 %v6273_v40  ;;  %3114 = vmatpush1.bf16.msra.mxu1 %v6275_v37  ;;  %v6294_v40 = vcombine.high %v2750_v53, %v2758_v55  ;;  %v6296_v37 = vcombine.high %v2751_v35, %v2759_v38  ;;  %v6297_v55 = vcombine.low %v2752_v14, %v2760_v16 }
 0x83b   :  { %3074 = vmatprep.subr.bf16.mxu0 %v6290_v34  ;;  %3115 = vmatprep.subr.bf16.mxu1 %v6292_v11  ;;  %v6295_v34 = vcombine.low %v2751_v35, %v2759_v38  ;;  %v6282_v11 = vcombine.high %v2736_v36, %v2744_v50  ;;  %v8298_v38 = vld [vmem:[#allocation5 + $0xa8] sm:$0xff]  }
 0x83c   :  { %3104 = vmatprep.mubr.bf16.mxu0 %v9398_v51  ;;  %3145 = vmatprep.mubr.bf16.mxu1 %v9398_v51 }
 0x83e   :  { %3075 = vmatpush1.bf16.msra.mxu0 %v6289_v18  ;;  %3116 = vmatpush1.bf16.msra.mxu1 %v6291_v15  ;;  %v2761_v18 = vld [vmem:[#allocation7 + $0x1f8] sm:$0xff]  ;;  %v6281_v15 = vcombine.low %v2736_v36, %v2744_v50  ;;  %v8317_v36 = vld [vmem:[#allocation5 + $0x130] sm:$0xff]  }
 0x83f   :  { %3154 = vmatprep.subr.bf16.mxu0 %v6278_v54  ;;  %3195 = vmatprep.subr.bf16.mxu1 %v6280_v31  ;;  %v6283_v54 = vcombine.low %v2737_v48, %v2745_v39  ;;  %v6298_v31 = vcombine.high %v2752_v14, %v2760_v16  ;;  %v6300_v53 = vcombine.high %v2753_v33, %v2761_v18  ;;  %v8320_v50 = vld [vmem:[#allocation5 + $0x70] sm:$0xff]   ;;  %v8326_v48 = vld [vmem:[#allocation5 + $0xb8] sm:$0xff]   ;;  %v8344_v14 = vld [vmem:[#allocation5 + $0x80] sm:$0xff]  }
 0x840   :  { %v6299_v35 = vcombine.low %v2753_v33, %v2761_v18  ;;  %9403 = vst [vmem:[#allocation34_spill] sm:$0xff] %v8317_v36  ;;  %9404 = vst [vmem:[#allocation35_spill] sm:$0xff] %v8320_v50  ;;  %v8329_v39 = vld [vmem:[#allocation5 + $0x138] sm:$0xff]   ;;  %v8347_v16 = vld [vmem:[#allocation5 + $0x100] sm:$0xff]  }
 0x841   :  { %6303 = vmatmul.mubr.msk.bf16.vlgmr.msra.gmra.mrb[48].mxu0 %vm483_vm2, %v8278_v25  ;;  %6304 = vmatmul.mubr.msk.bf16.vlgmr.msra.gmra.mrb[48].mxu1 %vm483_vm2, %v8278_v25  ;;  %9406 = vst [vmem:[#allocation37_spill] sm:$0xff] %v8326_v48  ;;  %9407 = vst [vmem:[#allocation38_spill] sm:$0xff] %v8329_v39  ;;  %v8350_v33 = vld [vmem:[#allocation5 + $0xc8] sm:$0xff]  }
 0x842   :  { %3155 = vmatpush1.bf16.msra.mxu0 %v6277_v59  ;;  %3196 = vmatpush1.bf16.msra.mxu1 %v6279_v0  ;;  %v8301_v59 = vld [vmem:[#allocation5 + $0x128] sm:$0xff]   ;;  %9412 = vst [vmem:[#allocation43_spill] sm:$0xff] %v8344_v14  ;;  %9413 = vst [vmem:[#allocation44_spill] sm:$0xff] %v8347_v16 }
 0x843   :  { %3156 = vmatprep.subr.bf16.mxu0 %v6294_v40  ;;  %3197 = vmatprep.subr.bf16.mxu1 %v6296_v37  ;;  %9399 = vst [vmem:[#allocation30_spill] sm:$0xff] %v8301_v59  ;;  %v8308_v0 = vld [vmem:[#allocation5 + $0x68] sm:$0xff]   ;;  %v8314_v37 = vld [vmem:[#allocation5 + $0xb0] sm:$0xff]   ;;  %9414 = vst [vmem:[#allocation45_spill] sm:$0xff] %v8350_v33 }
 0x844   :  { %3186 = vmatprep.mubr.bf16.mxu0 %v9398_v51  ;;  %3227 = vmatprep.mubr.bf16.mxu1 %v9398_v51  ;;  %9400 = vst [vmem:[#allocation31_spill] sm:$0xff] %v8308_v0  ;;  %v8311_v40 = vld [vmem:[#allocation5 + $0xe8] sm:$0xff]   ;;  %9402 = vst [vmem:[#allocation33_spill] sm:$0xff] %v8314_v37 }
 0x845   :  { %9401 = vst [vmem:[#allocation32_spill] sm:$0xff] %v8311_v40  ;;  %v8353_v18 = vld [vmem:[#allocation5 + $0x148] sm:$0xff]  }
 0x846   :  { %3157 = vmatpush1.bf16.msra.mxu0 %v6293_v47  ;;  %3198 = vmatpush1.bf16.msra.mxu1 %v6295_v34  ;;  %v8332_v47 = vld [vmem:[#allocation5 + $0x78] sm:$0xff]   ;;  %9415 = vst [vmem:[#allocation46_spill] sm:$0xff] %v8353_v18 }
 0x847   :  { %3236 = vmatprep.subr.bf16.mxu0 %v6282_v11  ;;  %3277 = vmatprep.subr.bf16.mxu1 %v6284_v17  ;;  %9408 = vst [vmem:[#allocation39_spill] sm:$0xff] %v8332_v47  ;;  %v8335_v34 = vld [vmem:[#allocation5 + $0xf8] sm:$0xff]   ;;  %v8338_v11 = vld [vmem:[#allocation5 + $0xc0] sm:$0xff]  }
 0x848   :  { %9409 = vst [vmem:[#allocation40_spill] sm:$0xff] %v8335_v34  ;;  %9410 = vst [vmem:[#allocation41_spill] sm:$0xff] %v8338_v11  ;;  %v8341_v17 = vld [vmem:[#allocation5 + $0x140] sm:$0xff]  }
 0x849   :  { %6305 = vmatmul.mubr.msk.bf16.vlgmr.msra.gmra.mrb[52].mxu0 %vm483_vm2, %v8278_v25  ;;  %6306 = vmatmul.mubr.msk.bf16.vlgmr.msra.gmra.mrb[52].mxu1 %vm483_vm2, %v8278_v25  ;;  %9411 = vst [vmem:[#allocation42_spill] sm:$0xff] %v8341_v17 }
 0x84a   :  { %3237 = vmatpush1.bf16.msra.mxu0 %v6281_v15  ;;  %3278 = vmatpush1.bf16.msra.mxu1 %v6283_v54  ;;  %v8356_v15 = vld [vmem:[#allocation5 + $0x88] sm:$0xff]  }
 0x84b   :  { %3238 = vmatprep.subr.bf16.mxu0 %v6298_v31  ;;  %3279 = vmatprep.subr.bf16.mxu1 %v6300_v53  ;;  %9416 = vst [vmem:[#allocation47_spill] sm:$0xff] %v8356_v15  ;;  %v8359_v54 = vld [vmem:[#allocation5 + $0x108] sm:$0xff]   ;;  %v8362_v31 = vld [vmem:[#allocation5 + $0xd0] sm:$0xff]  }
 0x84c   :  { %3268 = vmatprep.mubr.bf16.mxu0 %v9398_v51  ;;  %3309 = vmatprep.mubr.bf16.mxu1 %v9398_v51  ;;  %9417 = vst [vmem:[#allocation48_spill] sm:$0xff] %v8359_v54  ;;  %9418 = vst [vmem:[#allocation49_spill] sm:$0xff] %v8362_v31  ;;  %v8365_v53 = vld [vmem:[#allocation5 + $0x150] sm:$0xff]  }
 0x84d   :  { %9419 = vst [vmem:[#allocation50_spill] sm:$0xff] %v8365_v53 }
 0x84e   :  { %3239 = vmatpush1.bf16.msra.mxu0 %v6297_v55  ;;  %3280 = vmatpush1.bf16.msra.mxu1 %v6299_v35  ;;  %v8368_v55 = vld [vmem:[#allocation5 + $0x90] sm:$0xff]  }
 0x84f   :  { %6602 = vmatprep.subr.bf16.mxu0 %v8298_v38  ;;  %6624 = vmatprep.subr.bf16.mxu1 %v8301_v59  ;;  %9420 = vst [vmem:[#allocation51_spill] sm:$0xff] %v8368_v55  ;;  %v8371_v35 = vld [vmem:[#allocation5 + $0x110] sm:$0xff]   ;;  %v7451_v59 = vld [vmem:[#allocation5 + $0x1e0] sm:$0xff]  }
 0x850   :  { %9421 = vst [vmem:[#allocation52_spill] sm:$0xff] %v8371_v35 }
 0x851   :  { %6307 = vmatmul.mubr.msk.bf16.vlgmr.msra.gmra.mrb[56].mxu0 %vm483_vm2, %v8278_v25  ;;  %6308 = vmatmul.mubr.msk.bf16.vlgmr.msra.gmra.mrb[56].mxu1 %vm483_vm2, %v8278_v25  ;;  %v8323_v25 = vld [vmem:[#allocation5 + $0xf0] sm:$0xff]  }
 0x852   :  { %6603 = vmatpush3.bf16.msra.mxu0 %v8308_v0  ;;  %6625 = vmatpush3.bf16.msra.mxu1 %v8311_v40  ;;  %9405 = vst [vmem:[#allocation36_spill] sm:$0xff] %v8323_v25 }
 0x853   :  { %6604 = vmatprep.subr.bf16.mxu0 %v8314_v37  ;;  %6626 = vmatprep.subr.bf16.mxu1 %v8317_v36 }
 0x856   :  { %6605 = vmatpush3.bf16.msra.mxu0 %v8320_v50  ;;  %6627 = vmatpush3.bf16.msra.mxu1 %v8323_v25 }
 0x857   :  { %6606 = vmatprep.subr.bf16.mxu0 %v8326_v48  ;;  %6628 = vmatprep.subr.bf16.mxu1 %v8329_v39 }
 0x85a   :  { %6607 = vmatpush3.bf16.msra.mxu0 %v8332_v47  ;;  %6629 = vmatpush3.bf16.msra.mxu1 %v8335_v34 }
 0x85b   :  { %6608 = vmatprep.subr.bf16.mxu0 %v8338_v11  ;;  %6630 = vmatprep.subr.bf16.mxu1 %v8341_v17 }
 0x85e   :  { %6609 = vmatpush3.bf16.msra.mxu0 %v8344_v14  ;;  %6631 = vmatpush3.bf16.msra.mxu1 %v8347_v16 }
 0x85f   :  { %6610 = vmatprep.subr.bf16.mxu0 %v8350_v33  ;;  %6632 = vmatprep.subr.bf16.mxu1 %v8353_v18 }
 0x862   :  { %6611 = vmatpush3.bf16.msra.mxu0 %v8356_v15  ;;  %6633 = vmatpush3.bf16.msra.mxu1 %v8359_v54  ;;  %v8374_v15 = vld [vmem:[#allocation5 + $0xd8] sm:$0xff]  }
 0x863   :  { %6612 = vmatprep.subr.bf16.mxu0 %v8362_v31  ;;  %6634 = vmatprep.subr.bf16.mxu1 %v8365_v53  ;;  %9422 = vst [vmem:[#allocation53_spill] sm:$0xff] %v8374_v15  ;;  %v8377_v54 = vld [vmem:[#allocation5 + $0x158] sm:$0xff]  }
 0x864   :  { %9423 = vst [vmem:[#allocation54_spill] sm:$0xff] %v8377_v54  ;;  %v8380_v31 = vld [vmem:[#allocation5 + $0x98] sm:$0xff]  }
 0x865   :  { %9424 = vst [vmem:[#allocation55_spill] sm:$0xff] %v8380_v31  ;;  %v8383_v53 = vld [vmem:[#allocation5 + $0x118] sm:$0xff]  }
 0x866   :  { %6613 = vmatpush3.bf16.msra.mxu0 %v8368_v55  ;;  %6635 = vmatpush3.bf16.msra.mxu1 %v8371_v35  ;;  %9425 = vst [vmem:[#allocation56_spill] sm:$0xff] %v8383_v53  ;;  %v8386_v55 = vld [vmem:[#allocation5 + $0xe0] sm:$0xff]  }
 0x867   :  { %6614 = vmatprep.subr.bf16.mxu0 %v8374_v15  ;;  %6636 = vmatprep.subr.bf16.mxu1 %v8377_v54  ;;  %9426 = vst [vmem:[#allocation57_spill] sm:$0xff] %v8386_v55  ;;  %v8389_v35 = vld [vmem:[#allocation5 + $0x160] sm:$0xff]  }
 0x868   :  { %9427 = vst [vmem:[#allocation58_spill] sm:$0xff] %v8389_v35  ;;  %v8392_v15 = vld [vmem:[#allocation5 + $0xa0] sm:$0xff]  }
 0x869   :  { %9428 = vst [vmem:[#allocation59_spill] sm:$0xff] %v8392_v15  ;;  %v8395_v54 = vld [vmem:[#allocation5 + $0x120] sm:$0xff]  }
 0x86a   :  { %6615 = vmatpush3.bf16.msra.mxu0 %v8380_v31  ;;  %6637 = vmatpush3.bf16.msra.mxu1 %v8383_v53  ;;  %9429 = vst [vmem:[#allocation60_spill] sm:$0xff] %v8395_v54  ;;  %v8398_v31 = vld [vmem:[#allocation5 + $0x1a8] sm:$0xff]  }
 0x86b   :  { %6616 = vmatprep.subr.bf16.mxu0 %v8386_v55  ;;  %6638 = vmatprep.subr.bf16.mxu1 %v8389_v35  ;;  %9430 = vst [vmem:[#allocation61_spill] sm:$0xff] %v8398_v31  ;;  %v8401_v53 = vld [vmem:[#allocation5 + $0x228] sm:$0xff]   ;;  %v6309_v55 = vld [vmem:[#allocation8 + $0x4d] ss:$0 sm:$0xff]  ;;  %v8406_v35 = vsub.s32 1, %v7836_v8 }
 0x86c   :  { %9431 = vst [vmem:[#allocation62_spill] sm:$0xff] %v8401_v53  ;;  %3676 = vrot.lane.b32.xlu0 %v6309_v55, %s7728_s1 }
 0x86e   :  { %6617 = vmatpush3.bf16.msra.mxu0 %v8392_v15  ;;  %6639 = vmatpush3.bf16.msra.mxu1 %v8395_v54  ;;  %v9432_v15 = vunpack.c.l.bf16 %v8028_v12  ;;  %v9433_v54 = vunpack.c.l.bf16 %v8030_v13 }
 0x86f   :  { %6646 = vmatprep.subr.bf16.mxu0 %v8398_v31  ;;  %6668 = vmatprep.subr.bf16.mxu1 %v8401_v53  ;;  %v9434_v31 = vunpack.c.h.bf16 %v8028_v12  ;;  %v9435_v53 = vunpack.c.h.bf16 %v8030_v13  ;;  %v9436_v13 = vunpack.c.h.bf16 %v8051_v23 }
 0x870   :  { %v2766_v18 = vrot.slane %v9432_v15, %v8406_v35  ;;  %v2774_v33 = vrot.slane %v9433_v54, %v8406_v35 }
 0x871   :  { %v2770_v16 = vrot.slane %v9434_v31, %v8406_v35  ;;  %v2778_v14 = vrot.slane %v9435_v53, %v8406_v35  ;;  %v2786_v53 = vrot.slane %v9436_v13, %v8406_v35  ;;  %v7429_v13 = vld [vmem:[#allocation5 + $0x170] sm:$0xff]  }
 0x90c   :  { %v3024_v55 = vpop.f32.mrb[44].mxu0  ;;  %v3065_v17 = vpop.f32.mrb[44].mxu1 }
 0x90d   :  { %v3025_v8 = vadd.f32 %v3024_v55, %v2766_v18  ;;  %v3066_v11 = vadd.f32 %v3065_v17, %v2774_v33  ;;  %v3026_v34 = vpop.f32.mrb[45].mxu0  ;;  %v3067_v47 = vpop.f32.mrb[45].mxu1  ;;  %v9437_v17 = vunpack.c.h.bf16 %v8053_v24 }
 0x90e   :  { %v3027_v39 = vadd.f32 %v3026_v34, %v2770_v16  ;;  %v3068_v15 = vadd.f32 %v3067_v47, %v2778_v14  ;;  %v3028_v48 = vpop.f32.mrb[46].mxu0  ;;  %v3069_v25 = vpop.f32.mrb[46].mxu1  ;;  %v7426_v14 = vld [vmem:[#allocation5 + $0x1e8] sm:$0xff]  }
 0x90f   :  { %v3318_v50 = vmax.f32 %v3025_v8, 0.0  ;;  %v3320_v54 = vmax.f32 %v3066_v11, 0.0  ;;  %v3029_v36 = vpop.f32.mrb[47].mxu0  ;;  %v3070_v37 = vpop.f32.mrb[47].mxu1  ;;  %v2794_v33 = vrot.slane %v9437_v17, %v8406_v35  ;;  %v7425_v11 = vld [vmem:[#allocation5 + $0x168] sm:$0xff]   ;;  %v7431_v17 = vld [vmem:[#allocation5 + $0x1b8] sm:$0xff]  }
 0x910   :  { %v3319_v12 = vmax.f32 %v3027_v39, 0.0  ;;  %v3321_v31 = vmax.f32 %v3068_v15, 0.0  ;;  %v7427_v15 = vld [vmem:[#allocation5 + $0x1b0] sm:$0xff]  }
 0x911   :  { %v3334_v34 = vpack.c.bf16 %v3318_v50, %v3318_v50  ;;  %v3336_v47 = vpack.c.bf16 %v3320_v54, %v3320_v54  ;;  %v7428_v54 = vld [vmem:[#allocation5 + $0x230] sm:$0xff]  }
 0x912   :  { %v3335_v40 = vpack.c.bf16 %v3319_v12, %v3319_v12  ;;  %v3337_v0 = vpack.c.bf16 %v3321_v31, %v3321_v31 }
 0x914   :  { %v8426_v48 = vpop.f32.mrb[48].mxu0  ;;  %v8428_v8 = vpop.f32.mrb[48].mxu1  ;;  %3382 = vmatprep.mubr.bf16.mxu0 %v3335_v40  ;;  %3422 = vmatprep.mubr.bf16.mxu1 %v3337_v0 }
 0x915   :  { %v3108_v37 = vpop.f32.mrb[49].mxu0  ;;  %v3149_v36 = vpop.f32.mrb[49].mxu1  ;;  %3383 = vmatmul.mubr.bf16.vlgmr.msra.gmra.mrb[60].mxu0 %v3334_v34  ;;  %3423 = vmatmul.mubr.bf16.vlgmr.msra.gmra.mrb[60].mxu1 %v3336_v47 }
 0x916   :  { %v3109_v25 = vadd.f32 %v3108_v37, %v2786_v53  ;;  %v3150_v39 = vadd.f32 %v3149_v36, %v2794_v33  ;;  %6647 = vmatpush3.bf16.msra.mxu0 %v7425_v11  ;;  %6669 = vmatpush3.bf16.msra.mxu1 %v7426_v14  ;;  %v3110_v16 = vpop.f32.mrb[50].mxu0  ;;  %v3151_v18 = vpop.f32.mrb[50].mxu1  ;;  %v7430_v53 = vld [vmem:[#allocation5 + $0x1f0] sm:$0xff]   ;;  %v7432_v33 = vld [vmem:[#allocation5 + $0x238] sm:$0xff]  }
 0x917   :  { %v3111_v50 = vpop.f32.mrb[51].mxu0  ;;  %v3152_v55 = vpop.f32.mrb[51].mxu1  ;;  %6648 = vmatprep.subr.bf16.mxu0 %v7427_v15  ;;  %6670 = vmatprep.subr.bf16.mxu1 %v7428_v54  ;;  %v7437_v15 = vld [vmem:[#allocation5 + $0x180] sm:$0xff]  }
 0x918   :  { %v3323_v40 = vmax.f32 %v3109_v25, 0.0  ;;  %v3325_v0 = vmax.f32 %v3150_v39, 0.0  ;;  %v7433_v25 = vld [vmem:[#allocation5 + $0x178] sm:$0xff]   ;;  %v7435_v50 = vld [vmem:[#allocation5 + $0x1c0] sm:$0xff]  }
 0x919   :  { %v7434_v39 = vld [vmem:[#allocation5 + $0x1f8] sm:$0xff]   ;;  %v7436_v55 = vld [vmem:[#allocation5 + $0x240] sm:$0xff]  }
 0x91a   :  { %v3339_v12 = vpack.c.bf16 %v3323_v40, %v3323_v40  ;;  %v3341_v31 = vpack.c.bf16 %v3325_v0, %v3325_v0  ;;  %6649 = vmatpush3.bf16.msra.mxu0 %v7429_v13  ;;  %6671 = vmatpush3.bf16.msra.mxu1 %v7430_v53  ;;  %v7438_v54 = vld [vmem:[#allocation5 + $0x200] sm:$0xff]   ;;  %v7439_v40 = vld [vmem:[#allocation5 + $0x1c8] sm:$0xff]  }
 0x91b   :  { %6650 = vmatprep.subr.bf16.mxu0 %v7431_v17  ;;  %6672 = vmatprep.subr.bf16.mxu1 %v7432_v33  ;;  %v7440_v0 = vld [vmem:[#allocation5 + $0x248] sm:$0xff]  }
 0x91c   :  { %v8430_v34 = vpop.f32.mrb[52].mxu0  ;;  %v8432_v47 = vpop.f32.mrb[52].mxu1  ;;  %3462 = vmatprep.mubr.bf16.mxu0 %v3339_v12  ;;  %3502 = vmatprep.mubr.bf16.mxu1 %v3341_v31  ;;  %v7441_v17 = vld [vmem:[#allocation5 + $0x188] sm:$0xff]  }
 0x91d   :  { %v3190_v37 = vpop.f32.mrb[53].mxu0  ;;  %v3231_v36 = vpop.f32.mrb[53].mxu1  ;;  %v7442_v33 = vld [vmem:[#allocation5 + $0x208] sm:$0xff]  }
 0x91e   :  { %6651 = vmatpush3.bf16.msra.mxu0 %v7433_v25  ;;  %6673 = vmatpush3.bf16.msra.mxu1 %v7434_v39  ;;  %v3192_v11 = vpop.f32.mrb[54].mxu0  ;;  %v3233_v14 = vpop.f32.mrb[54].mxu1 }
 0x91f   :  { %v3193_v16 = vpop.f32.mrb[55].mxu0  ;;  %v3234_v18 = vpop.f32.mrb[55].mxu1  ;;  %6652 = vmatprep.subr.bf16.mxu0 %v7435_v50  ;;  %6674 = vmatprep.subr.bf16.mxu1 %v7436_v55  ;;  %v9438_v11 = vunpack.c.l.bf16 %v8051_v23  ;;  %v7445_v23 = vld [vmem:[#allocation5 + $0x190] sm:$0xff]  }
 0x920   :  { %v9439_v16 = vunpack.c.l.bf16 %v8053_v24 }
 0x921   :  { %v2782_v14 = vrot.slane %v9438_v11, %v8406_v35  ;;  %v7447_v11 = vld [vmem:[#allocation5 + $0x1d8] sm:$0xff]  }
 0x922   :  { %6653 = vmatpush3.bf16.msra.mxu0 %v7437_v15  ;;  %6675 = vmatpush3.bf16.msra.mxu1 %v7438_v54  ;;  %v2790_v18 = vrot.slane %v9439_v16, %v8406_v35  ;;  %v7443_v15 = vld [vmem:[#allocation5 + $0x1d0] sm:$0xff]   ;;  %v7448_v16 = vld [vmem:[#allocation5 + $0x258] sm:$0xff]  }
 0x923   :  { %6654 = vmatprep.subr.bf16.mxu0 %v7439_v40  ;;  %6676 = vmatprep.subr.bf16.mxu1 %v7440_v0  ;;  %v7444_v54 = vld [vmem:[#allocation5 + $0x250] sm:$0xff]   ;;  %v9440_v40 = vunpack.c.h.bf16 %v8071_v43  ;;  %v3107_v24 = vadd.f32 %v8426_v48, %v2782_v14  ;;  %v7453_v14 = vld [vmem:[#allocation5 + $0x1a0] sm:$0xff]  }
 0x924   :  { %v8434_v12 = vpop.f32.mrb[56].mxu0  ;;  %v8436_v31 = vpop.f32.mrb[56].mxu1 }
 0x925   :  { %v8438_v13 = vpop.f32.mrb[57].mxu0  ;;  %v8440_v53 = vpop.f32.mrb[57].mxu1  ;;  %v2802_v0 = vrot.slane %v9440_v40, %v8406_v35  ;;  %v3322_v40 = vmax.f32 %v3107_v24, 0.0  ;;  %v7457_v24 = vld [vmem:[#allocation5 + $0x268] sm:$0xff]  }
 0x926   :  { %6655 = vmatpush3.bf16.msra.mxu0 %v7441_v17  ;;  %6677 = vmatpush3.bf16.msra.mxu1 %v7442_v33  ;;  %v3274_v25 = vpop.f32.mrb[58].mxu0  ;;  %v3315_v39 = vpop.f32.mrb[58].mxu1  ;;  %v9441_v17 = vunpack.c.h.bf16 %v8073_v44 }
 0x927   :  { %v3275_v50 = vpop.f32.mrb[59].mxu0  ;;  %v3316_v55 = vpop.f32.mrb[59].mxu1  ;;  %6656 = vmatprep.subr.bf16.mxu0 %v7443_v15  ;;  %6678 = vmatprep.subr.bf16.mxu1 %v7444_v54  ;;  %v7446_v25 = vld [vmem:[#allocation5 + $0x210] sm:$0xff]   ;;  %v3148_v39 = vadd.f32 %v8428_v8, %v2790_v18  ;;  %v7449_v15 = vld [vmem:[#allocation5 + $0x198] sm:$0xff]   ;;  %v7454_v8 = vld [vmem:[#allocation5 + $0x220] sm:$0xff]   ;;  %v3338_v18 = vpack.c.bf16 %v3322_v40, %v3322_v40 }
 0x928   :  { %v2810_v33 = vrot.slane %v9441_v17, %v8406_v35  ;;  %v3191_v50 = vadd.f32 %v3190_v37, %v2802_v0  ;;  %v7450_v54 = vld [vmem:[#allocation5 + $0x218] sm:$0xff]   ;;  %v7455_v37 = vld [vmem:[#allocation5 + $0x2a8] sm:$0xff]  }
 0x929   :  { %v3324_v17 = vmax.f32 %v3148_v39, 0.0  ;;  %v7459_v39 = vld [vmem:[#allocation5 + $0x2b0] sm:$0xff]   ;;  %v7465_v40 = vld [vmem:[#allocation5 + $0x278] sm:$0xff]  }
 0x92a   :  { %6657 = vmatpush3.bf16.msra.mxu0 %v7445_v23  ;;  %6679 = vmatpush3.bf16.msra.mxu1 %v7446_v25  ;;  %v3232_v55 = vadd.f32 %v3231_v36, %v2810_v33  ;;  %v7452_v23 = vld [vmem:[#allocation5 + $0x260] sm:$0xff]   ;;  %v3327_v25 = vmax.f32 %v3191_v50, 0.0  ;;  %v7456_v36 = vld [vmem:[#allocation5 + $0x328] sm:$0xff]   ;;  %v7461_v50 = vld [vmem:[#allocation5 + $0x270] sm:$0xff]  }
 0x92b   :  { %6658 = vmatprep.subr.bf16.mxu0 %v7447_v11  ;;  %6680 = vmatprep.subr.bf16.mxu1 %v7448_v16  ;;  %v3340_v11 = vpack.c.bf16 %v3324_v17, %v3324_v17  ;;  %v7460_v16 = vld [vmem:[#allocation5 + $0x330] sm:$0xff]   ;;  %v7466_v17 = vld [vmem:[#allocation5 + $0x2f8] sm:$0xff]  }
 0x92c   :  { %v3329_v48 = vmax.f32 %v3232_v55, 0.0  ;;  %v3343_v0 = vpack.c.bf16 %v3327_v25, %v3327_v25  ;;  %v7462_v55 = vld [vmem:[#allocation5 + $0x2f0] sm:$0xff]   ;;  %v7468_v25 = vld [vmem:[#allocation5 + $0x340] sm:$0xff]  }
 0x92e   :  { %6659 = vmatpush3.bf16.msra.mxu0 %v7449_v15  ;;  %6681 = vmatpush3.bf16.msra.mxu1 %v7450_v54  ;;  %v3345_v33 = vpack.c.bf16 %v3329_v48, %v3329_v48  ;;  %v7463_v15 = vld [vmem:[#allocation5 + $0x2b8] sm:$0xff]   ;;  %v7469_v48 = vld [vmem:[#allocation5 + $0x280] sm:$0xff]  }
 0x92f   :  { %6660 = vmatprep.subr.bf16.mxu0 %v7451_v59  ;;  %6682 = vmatprep.subr.bf16.mxu1 %v7452_v23  ;;  %v7458_v59 = vld [vmem:[#allocation5 + $0x2e8] sm:$0xff]   ;;  %v7464_v54 = vld [vmem:[#allocation5 + $0x338] sm:$0xff]   ;;  %v7467_v23 = vld [vmem:[#allocation5 + $0x2c0] sm:$0xff]  }
 0x932   :  { %6661 = vmatpush3.bf16.msra.mxu0 %v7453_v14  ;;  %6683 = vmatpush3.bf16.msra.mxu1 %v7454_v8  ;;  %v7470_v14 = vld [vmem:[#allocation5 + $0x300] sm:$0xff]   ;;  %v7471_v8 = vld [vmem:[#allocation5 + $0x2c8] sm:$0xff]  }
 0x933   :  { %6690 = vmatprep.subr.bf16.mxu0 %v7455_v37  ;;  %6712 = vmatprep.subr.bf16.mxu1 %v7456_v36  ;;  %v9442_v37 = vunpack.c.l.bf16 %v8071_v43  ;;  %v7477_v43 = vld [vmem:[#allocation5 + $0x290] sm:$0xff]  }
 0x935   :  { %3463 = vmatmul.mubr.bf16.vlgmr.msra.gmra.mrb[64].mxu0 %v3338_v18  ;;  %3503 = vmatmul.mubr.bf16.vlgmr.msra.gmra.mrb[64].mxu1 %v3340_v11  ;;  %v7472_v18 = vld [vmem:[#allocation5 + $0x348] sm:$0xff]   ;;  %v2798_v36 = vrot.slane %v9442_v37, %v8406_v35 }
 0x936   :  { %6691 = vmatpush3.bf16.msra.mxu0 %v7457_v24  ;;  %3542 = vmatprep.mubr.bf16.mxu0 %v3343_v0  ;;  %v7473_v11 = vld [vmem:[#allocation5 + $0x288] sm:$0xff]   ;;  %v9443_v24 = vunpack.c.l.bf16 %v8073_v44 }
 0x937   :  { %6713 = vmatpush3.bf16.msra.mxu1 %v7458_v59  ;;  %3582 = vmatprep.mubr.bf16.mxu1 %v3345_v33  ;;  %v7474_v0 = vld [vmem:[#allocation5 + $0x308] sm:$0xff]   ;;  %v7475_v33 = vld [vmem:[#allocation5 + $0x2d0] sm:$0xff]  }
 0x938   :  { %6692 = vmatprep.subr.bf16.mxu0 %v7459_v39  ;;  %6714 = vmatprep.subr.bf16.mxu1 %v7460_v16  ;;  %v2806_v59 = vrot.slane %v9443_v24, %v8406_v35  ;;  %v7476_v39 = vld [vmem:[#allocation5 + $0x350] sm:$0xff]   ;;  %v9444_v16 = vunpack.c.h.bf16 %v8101_v21 }
 0x93a   :  { %6693 = vmatpush3.bf16.msra.mxu0 %v7461_v50  ;;  %v2818_v50 = vrot.slane %v9444_v16, %v8406_v35  ;;  %v3230_v44 = vadd.f32 %v8432_v47, %v2806_v59 }
 0x93b   :  { %6715 = vmatpush3.bf16.msra.mxu1 %v7462_v55  ;;  %6694 = vmatprep.subr.bf16.mxu0 %v7463_v15  ;;  %v9445_v55 = vunpack.c.h.bf16 %v8104_v26 }
 0x93c   :  { %6716 = vmatprep.subr.bf16.mxu1 %v7464_v54  ;;  %v3189_v54 = vadd.f32 %v8430_v34, %v2798_v36  ;;  %v3328_v34 = vmax.f32 %v3230_v44, 0.0 }
 0x93d   :  { %v2826_v15 = vrot.slane %v9445_v55, %v8406_v35 }
 0x93e   :  { %6695 = vmatpush3.bf16.msra.mxu0 %v7465_v40  ;;  %v3273_v40 = vadd.f32 %v8438_v13, %v2818_v50 }
 0x93f   :  { %6717 = vmatpush3.bf16.msra.mxu1 %v7466_v17  ;;  %6696 = vmatprep.subr.bf16.mxu0 %v7467_v23  ;;  %v3314_v17 = vadd.f32 %v8440_v53, %v2826_v15  ;;  %v3326_v23 = vmax.f32 %v3189_v54, 0.0 }
 0x940   :  { %6718 = vmatprep.subr.bf16.mxu1 %v7468_v25 }
 0x941   :  { %v3342_v47 = vpack.c.bf16 %v3326_v23, %v3326_v23 }
 0x942   :  { %6697 = vmatpush3.bf16.msra.mxu0 %v7469_v48 }
 0x943   :  { %6719 = vmatpush3.bf16.msra.mxu1 %v7470_v14  ;;  %6698 = vmatprep.subr.bf16.mxu0 %v7471_v8 }
 0x944   :  { %6720 = vmatprep.subr.bf16.mxu1 %v7472_v18 }
 0x946   :  { %6699 = vmatpush3.bf16.msra.mxu0 %v7473_v11 }
 0x947   :  { %6721 = vmatpush3.bf16.msra.mxu1 %v7474_v0  ;;  %6700 = vmatprep.subr.bf16.mxu0 %v7475_v33 }
 0x948   :  { %6722 = vmatprep.subr.bf16.mxu1 %v7476_v39 }
 0x94a   :  { %6701 = vmatpush3.bf16.msra.mxu0 %v7477_v43 }
 0x94b   :  { %6723 = vmatpush3.bf16.msra.mxu1 %v8112_v45  ;;  %6702 = vmatprep.subr.bf16.mxu0 %v8114_v57  ;;  %v3331_v45 = vmax.f32 %v3273_v40, 0.0  ;;  %v3333_v57 = vmax.f32 %v3314_v17, 0.0 }
 0x94c   :  { %6724 = vmatprep.subr.bf16.mxu1 %v8119_v46  ;;  %v3344_v46 = vpack.c.bf16 %v3328_v34, %v3328_v34 }
 0x94e   :  { %6703 = vmatpush3.bf16.msra.mxu0 %v8127_v30  ;;  %v3347_v30 = vpack.c.bf16 %v3331_v45, %v3331_v45 }
 0x94f   :  { %6725 = vmatpush3.bf16.msra.mxu1 %v8132_v62  ;;  %6704 = vmatprep.subr.bf16.mxu0 %v8134_v63  ;;  %v3349_v62 = vpack.c.bf16 %v3333_v57, %v3333_v57  ;;  %v9446_v63 = vunpack.c.l.bf16 %v8101_v21 }
 0x950   :  { %6726 = vmatprep.subr.bf16.mxu1 %v8138_v2 }
 0x951   :  { %v2814_v2 = vrot.slane %v9446_v63, %v8406_v35 }
 0x952   :  { %6705 = vmatpush3.bf16.msra.mxu0 %v8143_v27  ;;  %v9447_v27 = vld [vmem:[#allocation18_spill] sm:$0xff] }
 0x953   :  { %6727 = vmatpush3.bf16.msra.mxu1 %v8147_v6  ;;  %6734 = vmatprep.subr.bf16.mxu0 %v8149_v28  ;;  %v9448_v6 = vunpack.c.l.bf16 %v8104_v26  ;;  %v9456_v26 = vld [vmem:[#allocation26_spill] sm:$0xff] }
 0x954   :  { %6756 = vmatprep.subr.bf16.mxu1 %v8152_v9  ;;  %v9449_v9 = vld [vmem:[#allocation19_spill] sm:$0xff] }
 0x955   :  { %3543 = vmatmul.mubr.bf16.vlgmr.msra.gmra.mrb[68].mxu0 %v3342_v47  ;;  %v2822_v28 = vrot.slane %v9448_v6, %v8406_v35 }
 0x956   :  { %3583 = vmatmul.mubr.bf16.vlgmr.msra.gmra.mrb[68].mxu1 %v3344_v46  ;;  %6735 = vmatpush3.bf16.msra.mxu0 %v8155_v10  ;;  %v9450_v10 = vld [vmem:[#allocation20_spill] sm:$0xff] }
 0x957   :  { %3622 = vmatprep.mubr.bf16.mxu0 %v3347_v30  ;;  %6757 = vmatpush3.bf16.msra.mxu1 %v8159_v19  ;;  %v3271_v19 = vadd.f32 %v8434_v12, %v2814_v2  ;;  %v3312_v21 = vadd.f32 %v8436_v31, %v2822_v28 }
 0x958   :  { %3662 = vmatprep.mubr.bf16.mxu1 %v3349_v62  ;;  %6736 = vmatprep.subr.bf16.mxu0 %v8162_v22  ;;  %v9451_v22 = vld [vmem:[#allocation21_spill] sm:$0xff] }
 0x959   :  { %6758 = vmatprep.subr.bf16.mxu1 %v8164_v32  ;;  %v9452_v32 = vld [vmem:[#allocation22_spill] sm:$0xff] }
 0x95a   :  { %6737 = vmatpush3.bf16.msra.mxu0 %v8167_v41  ;;  %v9453_v41 = vld [vmem:[#allocation23_spill] sm:$0xff] }
 0x95b   :  { %6759 = vmatpush3.bf16.msra.mxu1 %v8170_v42  ;;  %6738 = vmatprep.subr.bf16.mxu0 %v8172_v58  ;;  %v9454_v42 = vld [vmem:[#allocation24_spill] sm:$0xff]  ;;  %v3330_v58 = vmax.f32 %v3271_v19, 0.0 }
 0x95c   :  { %6760 = vmatprep.subr.bf16.mxu1 %v8175_v49  ;;  %v9455_v49 = vld [vmem:[#allocation25_spill] sm:$0xff] }
 0x95e   :  { %6739 = vmatpush3.bf16.msra.mxu0 %v8179_v29  ;;  %v3332_v29 = vmax.f32 %v3312_v21, 0.0 }
 0x95f   :  { %6761 = vmatpush3.bf16.msra.mxu1 %v8183_v52  ;;  %6740 = vmatprep.subr.bf16.mxu0 %v8185_v1  ;;  %v9457_v52 = vld [vmem:[#allocation27_spill] sm:$0xff]  ;;  %v9458_v1 = vld [vmem:[#allocation28_spill] sm:$0xff] }
 0x960   :  { %6762 = vmatprep.subr.bf16.mxu1 %v8188_v3  ;;  %v3346_v3 = vpack.c.bf16 %v3330_v58, %v3330_v58 }
 0x962   :  { %6741 = vmatpush3.bf16.msra.mxu0 %v8191_v4  ;;  %v9459_v4 = vld [vmem:[#allocation29_spill] sm:$0xff] }
 0x963   :  { %6763 = vmatpush3.bf16.msra.mxu1 %v8195_v5  ;;  %6742 = vmatprep.subr.bf16.mxu0 %v8197_v7  ;;  %v9460_v5 = vmov 0.0|0.0   ;;  %v3348_v7 = vpack.c.bf16 %v3332_v29, %v3332_v29 }
 0x964   :  { %6764 = vmatprep.subr.bf16.mxu1 %v8200_v60  ;;  %v9461_v60 = vld [vmem:[#allocation16_spill] sm:$0xff] }
 0x966   :  { %6743 = vmatpush3.bf16.msra.mxu0 %v8203_v61  ;;  %v9462_v61 = vmov 0.0  }
 0x967   :  { %6765 = vmatpush3.bf16.msra.mxu1 %v8208_v20  ;;  %6744 = vmatprep.subr.bf16.mxu0 %v9447_v27  ;;  %v9463_v20 = vld [vmem:[#allocation17_spill] sm:$0xff] }
 0x968   :  { %6766 = vmatprep.subr.bf16.mxu1 %v9449_v9 }
 0x96a   :  { %6745 = vmatpush3.bf16.msra.mxu0 %v9450_v10 }
 0x96b   :  { %6767 = vmatpush3.bf16.msra.mxu1 %v9451_v22  ;;  %6746 = vmatprep.subr.bf16.mxu0 %v9452_v32 }
 0x96c   :  { %6768 = vmatprep.subr.bf16.mxu1 %v9453_v41  ;;  %v3677_v41 = vpop.permute.xlu0 %3676 }
 0x96e   :  { %6747 = vmatpush3.bf16.msra.mxu0 %v9454_v42 }
 0x96f   :  { %6769 = vmatpush3.bf16.msra.mxu1 %v9455_v49  ;;  %6748 = vmatprep.subr.bf16.mxu0 %v9456_v26 }
 0x970   :  { %6770 = vmatprep.subr.bf16.mxu1 %v9457_v52 }
 0x972   :  { %6749 = vmatpush3.bf16.msra.mxu0 %v9458_v1 }
 0x973   :  { %6771 = vmatpush3.bf16.msra.mxu1 %v9459_v4  ;;  %7196 = vmatprep.subr.bf16.mxu0 %v9460_v5 }
 0x975   :  { %3623 = vmatmul.mubr.bf16.vlgmr.msra.gmra.mrb[72].mxu0 %v3346_v3 }
 0x976   :  { %3663 = vmatmul.mubr.bf16.vlgmr.msra.gmra.mrb[72].mxu1 %v3348_v7  ;;  %7198 = vmatpush3.bf16.msra.mxu0 %v9461_v60 }
 0x977   :  { %7199 = vmatprep.subr.bf16.mxu0 %v9460_v5  ;;  %7170 = vmatprep.mubr.msk.f32.mxu0 %vm7739_vm1, %v9462_v61  ;;  %v8815_v61 = vld [vmem:[#allocation5 + $0x280] sm:$0xff]  }
 0x978   :  { %4203 = vmatprep.mubr.bf16.mxu1 %v9398_v51 }
 0x97a   :  { %7201 = vmatpush3.bf16.msra.mxu0 %v9463_v20 }
 0x9e8   :  { %v6618_v35 = vpop.f32.mrb[60].mxu0  ;;  %v6640_v12 = vpop.f32.mrb[60].mxu1 }
 0x9e9   :  { %v6619_v31 = vpop.f32.mrb[61].mxu0  ;;  %v6641_v13 = vpop.f32.mrb[61].mxu1 }
 0x9ea   :  { %v6620_v53 = vadd.f32 %v6619_v31, %v6618_v35  ;;  %v6642_v25 = vadd.f32 %v6641_v13, %v6640_v12  ;;  %v6621_v48 = vpop.f32.mrb[62].mxu0  ;;  %v6643_v14 = vpop.f32.mrb[62].mxu1 }
 0x9eb   :  { %v6622_v8 = vpop.f32.mrb[63].mxu0  ;;  %v6644_v18 = vpop.f32.mrb[63].mxu1 }
 0x9ec   :  { %v3425_v11 = vadd.f32 %v6642_v25, %v6620_v53  ;;  %v6310_v53 = vld [vmem:[#allocation8 + $0x4b] ss:$0 sm:$0xff] }
 0xa08   :  { %v6662_v37 = vpop.f32.mrb[64].mxu0  ;;  %v6684_v36 = vpop.f32.mrb[64].mxu1 }
 0xa09   :  { %v6663_v0 = vpop.f32.mrb[65].mxu0  ;;  %v6685_v33 = vpop.f32.mrb[65].mxu1 }
 0xa0a   :  { %v6664_v24 = vadd.f32 %v6663_v0, %v6662_v37  ;;  %v6686_v59 = vadd.f32 %v6685_v33, %v6684_v36  ;;  %v6665_v39 = vpop.f32.mrb[66].mxu0  ;;  %v6687_v16 = vpop.f32.mrb[66].mxu1  ;;  %v6318_v37 = vld [vmem:[#allocation8 + $0x50] ss:$0 sm:$0xff]  ;;  %v6314_v36 = vld [vmem:[#allocation8 + $0x41] ss:$0 sm:$0xff] }
 0xa0b   :  { %v6666_v50 = vpop.f32.mrb[67].mxu0  ;;  %v6688_v55 = vpop.f32.mrb[67].mxu1  ;;  %v3744_v0 = vadd.f32 %v6314_v36, %v6314_v36  ;;  %v3890_v36 = vld [vmem:[#allocation7 + $0x218] sm:$0xff] }
 0xa0c   :  { %v3465_v15 = vadd.f32 %v6664_v24, %v3425_v11 }
 0xa0d   :  { %v3747_v33 = vsel %vm483_vm2, %v3744_v0, 0.0  ;;  %v3751_v24 = vmul.f32 %v3744_v0, %v3744_v0 }
 0xa0e   :  { %v3505_v43 = vadd.f32 %v6686_v59, %v3465_v15 }
 0xa0f   :  { %v3752_v59 = vsel %vm483_vm2, %v3751_v24, 0.0  ;;  %v3898_v24 = vld [vmem:[#allocation7 + $0x258] sm:$0xff] }
 0xa28   :  { %v6706_v54 = vpop.f32.mrb[68].mxu0 }
 0xa29   :  { %v6728_v44 = vpop.f32.mrb[68].mxu1  ;;  %v6707_v40 = vpop.f32.mrb[69].mxu0 }
 0xa2a   :  { %v6708_v17 = vadd.f32 %v6707_v40, %v6706_v54  ;;  %v6729_v23 = vpop.f32.mrb[69].mxu1  ;;  %v6709_v34 = vpop.f32.mrb[70].mxu0 }
 0xa2b   :  { %v6730_v45 = vadd.f32 %v6729_v23, %v6728_v44  ;;  %v6731_v57 = vpop.f32.mrb[70].mxu1  ;;  %v6710_v47 = vpop.f32.mrb[71].mxu0  ;;  %v6313_v34 = vld [vmem:[#allocation8 + $0x4f] ss:$0 sm:$0xff] }
 0xa2c   :  { %v3545_v46 = vadd.f32 %v6708_v17, %v3505_v43  ;;  %v6732_v30 = vpop.f32.mrb[71].mxu1  ;;  %v6312_v17 = vld [vmem:[#allocation8 + $0x4e] ss:$0 sm:$0xff] }
 0xa2e   :  { %v3585_v62 = vadd.f32 %v6730_v45, %v3545_v46 }
 0xa48   :  { %v6750_v63 = vpop.f32.mrb[72].mxu0 }
 0xa49   :  { %v6772_v2 = vpop.f32.mrb[72].mxu1  ;;  %v6751_v27 = vpop.f32.mrb[73].mxu0 }
 0xa4a   :  { %v6752_v6 = vadd.f32 %v6751_v27, %v6750_v63  ;;  %v6773_v28 = vpop.f32.mrb[73].mxu1  ;;  %v6753_v9 = vpop.f32.mrb[74].mxu0 }
 0xa4b   :  { %v6774_v10 = vadd.f32 %v6773_v28, %v6772_v2  ;;  %v6775_v19 = vpop.f32.mrb[74].mxu1  ;;  %v6754_v22 = vpop.f32.mrb[75].mxu0 }
 0xa4c   :  { %v3625_v32 = vadd.f32 %v6752_v6, %v3585_v62  ;;  %v6776_v21 = vpop.f32.mrb[75].mxu1 }
 0xa4d   :  { %v6315_v21 = vld [vmem:[#allocation8 + $0x51] ss:$0 sm:$0xff] }
 0xa4e   :  { %v3665_v42 = vadd.f32 %v6774_v10, %v3625_v32 }
 0xa50   :  { %v3679_v58 = vadd.f32 %v3677_v41, %v3665_v42  ;;  %v6316_v42 = vld [vmem:[#allocation8 + $0x52] ss:$0 sm:$0xff] }
 0xa52   :  { %3681 = vrot.lane.b32.xlu1 %v3679_v58, %s7738_s3 }
 0xac4   :  { %v3682_v49 = vpop.permute.xlu1 %3681 }
 0xac5   :  { %v3684_v26 = vadd.f32 %v3682_v49, %v8274_v56  ;;  %v6311_v56 = vld [vmem:[#allocation8 + $0x4c] ss:$0 sm:$0xff] }
 0xac7   :  { %v3687_v29 = vsel %vm566_vm3, %v3684_v26, 0.0  ;;  %v3691_v52 = vmul.f32 %v3684_v26, %v3684_v26 }
 0xac8   :  { %3688 = vadd.xlane.f32.xlu1 %v3687_v29 }
 0xac9   :  { %v3692_v1 = vsel %vm566_vm3, %v3691_v52, 0.0 }
 0xaca   :  { %3693 = vadd.xlane.f32.xlu0 %v3692_v1 }
 0xb55   :  { %v3689_v3 = vpop.xlane.xlu1 %3688 }
 0xb56   :  { %v3690_v4 = vmul.f32 0.03125, %v3689_v3  ;;  %v3887_v3 = vld [vmem:[#allocation7 + $0x200] sm:$0xff] }
 0xb57   :  { %v3694_v7 = vpop.xlane.xlu0 %3693 }
 0xb58   :  { %v3696_v60 = vmul.f32 %v3690_v4, %v3690_v4  ;;  %v3695_v20 = vmul.f32 0.03125, %v3694_v7  ;;  %v3698_v31 = vsub.f32 %v3684_v26, %v3690_v4  ;;  %v3895_v4 = vld [vmem:[#allocation7 + $0x240] sm:$0xff]  ;;  %v3888_v7 = vld [vmem:[#allocation7 + $0x208] sm:$0xff] }
 0xb5a   :  { %v3697_v35 = vsub.f32 %v3695_v20, %v3696_v60  ;;  %v6322_v60 = vcombine.high %v3887_v3, %v3895_v4  ;;  %v3896_v20 = vld [vmem:[#allocation7 + $0x248] sm:$0xff] }
 0xb5c   :  { %v3699_v12 = vadd.f32 1e-05, %v3697_v35  ;;  %v6321_v35 = vcombine.low %v3887_v3, %v3895_v4  ;;  %4171 = vmatprep.subr.bf16.mxu1 %v6322_v60  ;;  %v3901_v60 = vld [vmem:[#allocation7 + $0x270] sm:$0xff] }
 0xb5e   :  { %7373 = vrsqrt.f32 %v3699_v12  ;;  %v6323_v12 = vcombine.low %v3888_v7, %v3896_v20  ;;  %4172 = vmatpush1.bf16.msra.mxu1 %v6321_v35  ;;  %v3902_v35 = vld [vmem:[#allocation7 + $0x278] sm:$0xff] }
 0xb68   :  { %v7374_v13 = vpop.eup %7373 }
 0xb69   :  { %v3701_v25 = vmul.f32 %v7374_v13, %v3698_v31  ;;  %v6324_v31 = vcombine.high %v3888_v7, %v3896_v20  ;;  %v3903_v13 = vld [vmem:[#allocation7 + $0x280] sm:$0xff]  ;;  %v3893_v7 = vld [vmem:[#allocation7 + $0x230] sm:$0xff]  ;;  %v3894_v20 = vld [vmem:[#allocation7 + $0x238] sm:$0xff] }
 0xb6b   :  { %v3706_v48 = vmul.f32 %v6310_v53, %v3701_v25  ;;  %4212 = vmatprep.subr.bf16.mxu0 %v6324_v31  ;;  %v3911_v53 = vld [vmem:[#allocation7 + $0x2c0] sm:$0xff]  ;;  %v3904_v25 = vld [vmem:[#allocation7 + $0x288] sm:$0xff] }
 0xb6d   :  { %v3711_v14 = vadd.f32 %v6311_v56, %v3706_v48  ;;  %v6338_v56 = vcombine.high %v3903_v13, %v3911_v53  ;;  %v3912_v48 = vld [vmem:[#allocation7 + $0x2c8] sm:$0xff] }
 0xb6f   :  { %v3714_v8 = vsel %vm566_vm3, %v3711_v14, 0.0  ;;  %v3718_v18 = vmul.f32 %v3711_v14, %v3711_v14  ;;  %4173 = vmatprep.subr.bf16.mxu1 %v6338_v56  ;;  %v3917_v56 = vld [vmem:[#allocation7 + $0x2f0] sm:$0xff] }
 0xb70   :  { %3715 = vadd.xlane.f32.xlu0 %v3714_v8  ;;  %v6339_v8 = vcombine.low %v3904_v25, %v3912_v48 }
 0xb71   :  { %v3719_v11 = vsel %vm566_vm3, %v3718_v18, 0.0  ;;  %v6340_v18 = vcombine.high %v3904_v25, %v3912_v48  ;;  %v3909_v25 = vld [vmem:[#allocation7 + $0x2b0] sm:$0xff]  ;;  %v3910_v48 = vld [vmem:[#allocation7 + $0x2b8] sm:$0xff] }
 0xb72   :  { %3720 = vadd.xlane.f32.xlu1 %v3719_v11  ;;  %v3889_v11 = vld [vmem:[#allocation7 + $0x210] sm:$0xff] }
 0xb76   :  { %3748 = vadd.xlane.f32.xlu1 %v3747_v33 }
 0xb7a   :  { %3753 = vadd.xlane.f32.xlu1 %v3752_v59  ;;  %v6327_v59 = vcombine.low %v3890_v36, %v3898_v24 }
 0xb86   :  { %3851 = vrot.lane.b32.xlu0 %v6318_v37, %s7725_s25  ;;  %v3897_v37 = vld [vmem:[#allocation7 + $0x250] sm:$0xff] }
 0xb87   :  { %v6326_v33 = vcombine.high %v3889_v11, %v3897_v37 }
 0xbfd   :  { %v3716_v39 = vpop.xlane.xlu0 %3715 }
 0xbfe   :  { %v3717_v16 = vmul.f32 0.03125, %v3716_v39  ;;  %v6328_v39 = vcombine.high %v3890_v36, %v3898_v24  ;;  %v6349_v36 = vcombine.low %v3909_v25, %v3917_v56  ;;  %v9465_v24 = vld [vmem:[#allocation31_spill] sm:$0xff] }
 0xbff   :  { %v3721_v50 = vpop.xlane.xlu1 %3720 }
 0xc00   :  { %v3723_v55 = vmul.f32 %v3717_v16, %v3717_v16  ;;  %v3722_v15 = vmul.f32 0.03125, %v3721_v50  ;;  %v3725_v44 = vsub.f32 %v3711_v14, %v3717_v16  ;;  %v6337_v14 = vcombine.low %v3903_v13, %v3911_v53 }
 0xc01   :  { %v3852_v47 = vpop.permute.xlu0 %3851  ;;  %v6334_v13 = vcombine.high %v3893_v7, %v3901_v60  ;;  %v6336_v53 = vcombine.high %v3894_v20, %v3902_v35 }
 0xc02   :  { %v3724_v43 = vsub.f32 %v3722_v15, %v3723_v55  ;;  %4174 = vmatpush1.bf16.msra.mxu1 %v6337_v14  ;;  %v3918_v14 = vld [vmem:[#allocation7 + $0x2f8] sm:$0xff] }
 0xc03   :  { %v3749_v63 = vpop.xlane.xlu1 %3748  ;;  %4253 = vmatprep.subr.bf16.mxu1 %v6326_v33  ;;  %v9464_v33 = vld [vmem:[#allocation30_spill] sm:$0xff] }
 0xc04   :  { %v3726_v54 = vadd.f32 1e-05, %v3724_v43  ;;  %v3750_v2 = vmul.f32 0.03125, %v3749_v63  ;;  %v3914_v63 = vld [vmem:[#allocation7 + $0x2d8] sm:$0xff] }
 0xc06   :  { %7375 = vrsqrt.f32 %v3726_v54  ;;  %v3756_v6 = vmul.f32 %v3750_v2, %v3750_v2  ;;  %v3758_v19 = vsub.f32 %v3744_v0, %v3750_v2  ;;  %v6325_v0 = vcombine.low %v3889_v11, %v3897_v37 }
 0xc07   :  { %v3754_v27 = vpop.xlane.xlu1 %3753  ;;  %v6350_v11 = vcombine.high %v3909_v25, %v3917_v56  ;;  %v6352_v37 = vcombine.high %v3910_v48, %v3918_v14 }
 0xc08   :  { %v3755_v28 = vmul.f32 0.03125, %v3754_v27 }
 0xc0a   :  { %v3757_v9 = vsub.f32 %v3755_v28, %v3756_v6 }
 0xc0c   :  { %v3759_v10 = vadd.f32 1e-05, %v3757_v9  ;;  %v3891_v9 = vld [vmem:[#allocation7 + $0x220] sm:$0xff] }
 0xc0e   :  { %7377 = vrsqrt.f32 %v3759_v10  ;;  %v3899_v10 = vld [vmem:[#allocation7 + $0x260] sm:$0xff] }
 0xc10   :  { %v7376_v40 = vpop.eup %7375 }
 0xc11   :  { %v3728_v23 = vmul.f32 %v7376_v40, %v3725_v44 }
 0xc13   :  { %v3733_v45 = vmul.f32 %v6312_v17, %v3728_v23  ;;  %v6319_v23 = vld [vmem:[#allocation8 + $0x53] ss:$0 sm:$0xff] }
 0xc15   :  { %v3738_v57 = vadd.f32 %v6313_v34, %v3733_v45  ;;  %v6320_v45 = vld [vmem:[#allocation8 + $0x54] ss:$0 sm:$0xff] }
 0xc17   :  { %7171 = vmatmul.mubr.msk.f32.vlgmr.msra.gmra.mrb[10].mxu0 %vm483_vm2, %v3738_v57 }
 0xc18   :  { %4244 = vmatprep.mubr.bf16.mxu0 %v9398_v51  ;;  %v7378_v22 = vpop.eup %7377  ;;  %4213 = vmatpush1.bf16.msra.mxu0 %v6323_v12 }
 0xc19   :  { %v3761_v32 = vmul.f32 %v7378_v22, %v3758_v19  ;;  %4214 = vmatprep.subr.bf16.mxu0 %v6340_v18  ;;  %v3892_v19 = vld [vmem:[#allocation7 + $0x228] sm:$0xff]  ;;  %v6335_v18 = vcombine.low %v3894_v20, %v3902_v35 }
 0xc1a   :  { %v3900_v22 = vld [vmem:[#allocation7 + $0x268] sm:$0xff] }
 0xc1b   :  { %v3766_v41 = vmul.f32 %v6315_v21, %v3761_v32 }
 0xc1c   :  { %4215 = vmatpush1.bf16.msra.mxu0 %v6339_v8  ;;  %v6333_v8 = vcombine.low %v3893_v7, %v3901_v60 }
 0xc1d   :  { %v3771_v58 = vadd.f32 %v6316_v42, %v3766_v41  ;;  %4294 = vmatprep.subr.bf16.mxu0 %v6328_v39  ;;  %v6330_v41 = vcombine.high %v3891_v9, %v3899_v10  ;;  %v6332_v42 = vcombine.high %v3892_v19, %v3900_v22  ;;  %v9467_v39 = vld [vmem:[#allocation33_spill] sm:$0xff] }
 0xcea   :  { %v8539_v46 = vpop.f32.mrb[10].mxu0 }
 0xceb   :  { %v3854_v30 = vadd.f32 %v3852_v47, %v8539_v46  ;;  %v7172_v62 = vpop.f32.mrb[11].mxu0  ;;  %v3905_v47 = vld [vmem:[#allocation7 + $0x290] sm:$0xff] }
 0xcec   :  { %v3906_v62 = vld [vmem:[#allocation7 + $0x298] sm:$0xff] }
 0xced   :  { %3856 = vrot.lane.b32.xlu1 %v3854_v30, %s7725_s25  ;;  %v3913_v30 = vld [vmem:[#allocation7 + $0x2d0] sm:$0xff]  ;;  %v6344_v28 = vcombine.high %v3906_v62, %v3914_v63  ;;  %v6343_v21 = vcombine.low %v3906_v62, %v3914_v63  ;;  %v9484_v62 = vld [vmem:[#allocation50_spill] sm:$0xff] }
 0xcee   :  { %v6342_v6 = vcombine.high %v3905_v47, %v3913_v30  ;;  %v6341_v32 = vcombine.low %v3905_v47, %v3913_v30  ;;  %v9482_v47 = vld [vmem:[#allocation48_spill] sm:$0xff]  ;;  %v9483_v30 = vld [vmem:[#allocation49_spill] sm:$0xff]  ;;  %v9485_v63 = vld [vmem:[#allocation51_spill] sm:$0xff] }
 0xd5f   :  { %v3857_v49 = vpop.permute.xlu1 %3856 }
 0xd60   :  { %v3859_v26 = vadd.f32 %v3857_v49, %v3771_v58  ;;  %v3907_v58 = vld [vmem:[#allocation7 + $0x2a0] sm:$0xff] }
 0xd61   :  { %v3915_v49 = vld [vmem:[#allocation7 + $0x2e0] sm:$0xff] }
 0xd62   :  { %v3862_v29 = vsel %vm566_vm3, %v3859_v26, 0.0  ;;  %v3866_v52 = vmul.f32 %v3859_v26, %v3859_v26  ;;  %v6346_v3 = vcombine.high %v3907_v58, %v3915_v49  ;;  %v6345_v12 = vcombine.low %v3907_v58, %v3915_v49  ;;  %v6361_v58 = vld [vmem:[#allocation8 + $0x57] ss:$0 sm:$0xff]  ;;  %v8608_v49 = vld [vmem:[#allocation7 + $0x400] sm:$0x22] }
 0xd63   :  { %3863 = vadd.xlane.f32.xlu0 %v3862_v29  ;;  %v3916_v29 = vld [vmem:[#allocation7 + $0x2e8] sm:$0xff] }
 0xd64   :  { %v3867_v1 = vsel %vm566_vm3, %v3866_v52, 0.0  ;;  %v6329_v52 = vcombine.low %v3891_v9, %v3899_v10  ;;  %v9489_v9 = vld [vmem:[#allocation55_spill] sm:$0xff]  ;;  %v9490_v10 = vld [vmem:[#allocation56_spill] sm:$0xff] }
 0xd65   :  { %3868 = vadd.xlane.f32.xlu1 %v3867_v1  ;;  %v6331_v1 = vcombine.low %v3892_v19, %v3900_v22  ;;  %v9491_v19 = vld [vmem:[#allocation57_spill] sm:$0xff]  ;;  %v9492_v22 = vld [vmem:[#allocation58_spill] sm:$0xff] }
 0xd79   :  { %4857 = vrot.lane.b32.xlu0 %v6361_v58, %s7725_s25  ;;  %v8665_v58 = vld [vmem:[#allocation5 + $0x1b8] sm:$0xff]  }
 0xdf0   :  { %v3864_v16 = vpop.xlane.xlu0 %3863 }
 0xdf1   :  { %v3865_v50 = vmul.f32 0.03125, %v3864_v16  ;;  %v9468_v16 = vld [vmem:[#allocation34_spill] sm:$0xff] }
 0xdf2   :  { %v3869_v55 = vpop.xlane.xlu1 %3868 }
 0xdf3   :  { %v3871_v15 = vmul.f32 %v3865_v50, %v3865_v50  ;;  %v3870_v43 = vmul.f32 0.03125, %v3869_v55  ;;  %v3873_v40 = vsub.f32 %v3859_v26, %v3865_v50  ;;  %v3908_v26 = vld [vmem:[#allocation7 + $0x2a8] sm:$0xff]  ;;  %v9470_v55 = vld [vmem:[#allocation36_spill] sm:$0xff] }
 0xdf4   :  { %v6348_v4 = vcombine.high %v3908_v26, %v3916_v29  ;;  %v6347_v31 = vcombine.low %v3908_v26, %v3916_v29  ;;  %v9469_v50 = vld [vmem:[#allocation35_spill] sm:$0xff] }
 0xdf5   :  { %v3872_v54 = vsub.f32 %v3870_v43, %v3871_v15  ;;  %v9472_v15 = vld [vmem:[#allocation38_spill] sm:$0xff]  ;;  %v9473_v43 = vld [vmem:[#allocation39_spill] sm:$0xff] }
 0xdf6   :  { %v8610_v26 = vld [vmem:[#allocation7 + $0x408] sm:$0x22] }
 0xdf7   :  { %v3874_v44 = vadd.f32 1e-05, %v3872_v54  ;;  %v9474_v54 = vld [vmem:[#allocation40_spill] sm:$0xff]  ;;  %v9497_v29 = vld [vmem:[#allocation15_spill] sm:$0xff]  ;;  %v9307_v7 = vunpack.c.h.bf16 %v8610_v26 }
 0xdf9   :  { %7379 = vrsqrt.f32 %v3874_v44  ;;  %v9475_v44 = vld [vmem:[#allocation41_spill] sm:$0xff] }
 0xe03   :  { %v7380_v17 = vpop.eup %7379 }
 0xe04   :  { %v3876_v34 = vmul.f32 %v7380_v17, %v3873_v40  ;;  %v9476_v40 = vld [vmem:[#allocation42_spill] sm:$0xff]  ;;  %v9477_v17 = vld [vmem:[#allocation43_spill] sm:$0xff] }
 0xe06   :  { %v3881_v57 = vmul.f32 %v6319_v23, %v3876_v34  ;;  %v9478_v23 = vld [vmem:[#allocation44_spill] sm:$0xff]  ;;  %v9479_v34 = vld [vmem:[#allocation45_spill] sm:$0xff] }
 0xe08   :  { %v8545_v2 = vadd.f32 %v6320_v45, %v3881_v57  ;;  %v9480_v45 = vld [vmem:[#allocation46_spill] sm:$0xff]  ;;  %v9481_v57 = vld [vmem:[#allocation47_spill] sm:$0xff] }
 0xe0a   :  { %v8549_v27 = vpack.c.bf16 %v8545_v2, %v8545_v2 }
 0xe0c   :  { %6353 = vmatmul.mubr.msk.bf16.vlgmr.msra.gmra.mrb[76].mxu1 %vm483_vm2, %v8549_v27  ;;  %6354 = vmatmul.mubr.msk.bf16.vlgmr.msra.gmra.mrb[76].mxu0 %vm483_vm2, %v8549_v27 }
 0xe0d   :  { %4254 = vmatpush1.bf16.msra.mxu1 %v6325_v0  ;;  %4295 = vmatpush1.bf16.msra.mxu0 %v6327_v59  ;;  %v6351_v0 = vcombine.low %v3910_v48, %v3918_v14  ;;  %v9466_v59 = vld [vmem:[#allocation32_spill] sm:$0xff] }
 0xe0e   :  { %4255 = vmatprep.subr.bf16.mxu1 %v6342_v6  ;;  %4296 = vmatprep.subr.bf16.mxu0 %v6344_v28  ;;  %v9487_v6 = vld [vmem:[#allocation53_spill] sm:$0xff]  ;;  %v9488_v28 = vld [vmem:[#allocation54_spill] sm:$0xff]  ;;  %9514 = vst [vmem:[#allocation32_spill] sm:$0xff] %v8815_v61 }
 0xe0f   :  { %4285 = vmatprep.mubr.bf16.mxu1 %v9398_v51  ;;  %4326 = vmatprep.mubr.bf16.mxu0 %v9398_v51 }
 0xe11   :  { %4256 = vmatpush1.bf16.msra.mxu1 %v6341_v32  ;;  %4297 = vmatpush1.bf16.msra.mxu0 %v6343_v21  ;;  %v9493_v32 = vld [vmem:[#allocation59_spill] sm:$0xff]  ;;  %v9494_v21 = vld [vmem:[#allocation60_spill] sm:$0xff] }
 0xe12   :  { %4335 = vmatprep.subr.bf16.mxu1 %v6330_v41  ;;  %4376 = vmatprep.subr.bf16.mxu0 %v6332_v42  ;;  %v9495_v41 = vld [vmem:[#allocation61_spill] sm:$0xff]  ;;  %v9496_v42 = vld [vmem:[#allocation62_spill] sm:$0xff] }
 0xe14   :  { %6355 = vmatmul.mubr.msk.bf16.vlgmr.msra.gmra.mrb[80].mxu1 %vm483_vm2, %v8549_v27  ;;  %6356 = vmatmul.mubr.msk.bf16.vlgmr.msra.gmra.mrb[80].mxu0 %vm483_vm2, %v8549_v27 }
 0xe15   :  { %4336 = vmatpush1.bf16.msra.mxu1 %v6329_v52  ;;  %4377 = vmatpush1.bf16.msra.mxu0 %v6331_v1  ;;  %v8613_v52 = vsub.s32 2, %v9497_v29  ;;  %v9310_v1 = vunpack.c.l.bf16 %v8608_v49 }
 0xe16   :  { %4337 = vmatprep.subr.bf16.mxu1 %v6346_v3  ;;  %4378 = vmatprep.subr.bf16.mxu0 %v6348_v4  ;;  %v9309_v3 = vunpack.c.l.bf16 %v8610_v26  ;;  %v9308_v4 = vunpack.c.h.bf16 %v8608_v49 }
 0xe17   :  { %4367 = vmatprep.mubr.bf16.mxu1 %v9398_v51  ;;  %4408 = vmatprep.mubr.bf16.mxu0 %v9398_v51  ;;  %v3947_v60 = vrot.slane %v9310_v1, %v8613_v52  ;;  %v8813_v1 = vld [vmem:[#allocation7 + $0x430] sm:$0x22] }
 0xe18   :  { %v3955_v20 = vrot.slane %v9309_v3, %v8613_v52  ;;  %v3951_v35 = vrot.slane %v9308_v4, %v8613_v52  ;;  %v8807_v4 = vld [vmem:[#allocation5 + $0x2c0] sm:$0xff]   ;;  %9513 = vst [vmem:[#allocation31_spill] sm:$0xff] %v8813_v1 }
 0xe19   :  { %4338 = vmatpush1.bf16.msra.mxu1 %v6345_v12  ;;  %4379 = vmatpush1.bf16.msra.mxu0 %v6347_v31  ;;  %v3959_v12 = vrot.slane %v9307_v7, %v8613_v52  ;;  %v8631_v31 = vld [vmem:[#allocation7 + $0x410] sm:$0x22]  ;;  %v8780_v7 = vld [vmem:[#allocation5 + $0x2e8] sm:$0xff]   ;;  %9511 = vst [vmem:[#allocation17_spill] sm:$0xff] %v8807_v4  ;;  %v8810_v3 = vld [vmem:[#allocation5 + $0x340] sm:$0xff]  }
 0xe1a   :  { %4417 = vmatprep.subr.bf16.mxu1 %v6334_v13  ;;  %4458 = vmatprep.subr.bf16.mxu0 %v6336_v53  ;;  %v8633_v13 = vld [vmem:[#allocation7 + $0x418] sm:$0x22]  ;;  %9502 = vst [vmem:[#allocation22_spill] sm:$0xff] %v8780_v7  ;;  %9512 = vst [vmem:[#allocation30_spill] sm:$0xff] %v8810_v3 }
 0xe1c   :  { %6357 = vmatmul.mubr.msk.bf16.vlgmr.msra.gmra.mrb[84].mxu1 %vm483_vm2, %v8549_v27  ;;  %6358 = vmatmul.mubr.msk.bf16.vlgmr.msra.gmra.mrb[84].mxu0 %vm483_vm2, %v8549_v27 }
 0xe1d   :  { %4418 = vmatpush1.bf16.msra.mxu1 %v6333_v8  ;;  %4459 = vmatpush1.bf16.msra.mxu0 %v6335_v18 }
 0xe1e   :  { %4419 = vmatprep.subr.bf16.mxu1 %v6350_v11  ;;  %4460 = vmatprep.subr.bf16.mxu0 %v6352_v37 }
 0xe1f   :  { %4449 = vmatprep.mubr.bf16.mxu1 %v9398_v51  ;;  %4490 = vmatprep.mubr.bf16.mxu0 %v9398_v51 }
 0xe21   :  { %4420 = vmatpush1.bf16.msra.mxu1 %v6349_v36  ;;  %4461 = vmatpush1.bf16.msra.mxu0 %v6351_v0  ;;  %v9306_v0 = vunpack.c.h.bf16 %v8631_v31 }
 0xe22   :  { %6783 = vmatprep.subr.bf16.mxu1 %v8298_v38  ;;  %6805 = vmatprep.subr.bf16.mxu0 %v9464_v33  ;;  %v9471_v38 = vld [vmem:[#allocation37_spill] sm:$0xff]  ;;  %v9305_v33 = vunpack.c.h.bf16 %v8633_v13 }
 0xe24   :  { %6359 = vmatmul.mubr.msk.bf16.vlgmr.msra.gmra.mrb[88].mxu1 %vm483_vm2, %v8549_v27  ;;  %6360 = vmatmul.mubr.msk.bf16.vlgmr.msra.gmra.mrb[88].mxu0 %vm483_vm2, %v8549_v27  ;;  %v9486_v27 = vld [vmem:[#allocation52_spill] sm:$0xff] }
 0xe25   :  { %6784 = vmatpush3.bf16.msra.mxu1 %v9465_v24  ;;  %6806 = vmatpush3.bf16.msra.mxu0 %v9466_v59 }
 0xe26   :  { %6785 = vmatprep.subr.bf16.mxu1 %v9467_v39  ;;  %6807 = vmatprep.subr.bf16.mxu0 %v9468_v16 }
 0xe29   :  { %6786 = vmatpush3.bf16.msra.mxu1 %v9469_v50  ;;  %6808 = vmatpush3.bf16.msra.mxu0 %v9470_v55 }
 0xe2a   :  { %6787 = vmatprep.subr.bf16.mxu1 %v9471_v38  ;;  %6809 = vmatprep.subr.bf16.mxu0 %v9472_v15 }
 0xe2d   :  { %6788 = vmatpush3.bf16.msra.mxu1 %v9473_v43  ;;  %6810 = vmatpush3.bf16.msra.mxu0 %v9474_v54  ;;  %v3967_v43 = vrot.slane %v9306_v0, %v8613_v52  ;;  %v3975_v54 = vrot.slane %v9305_v33, %v8613_v52  ;;  %v8774_v33 = vld [vmem:[#allocation5 + $0x328] sm:$0xff]  }
 0xe2e   :  { %6789 = vmatprep.subr.bf16.mxu1 %v9475_v44  ;;  %6811 = vmatprep.subr.bf16.mxu0 %v9476_v40  ;;  %9500 = vst [vmem:[#allocation20_spill] sm:$0xff] %v8774_v33  ;;  %v8777_v0 = vld [vmem:[#allocation5 + $0x268] sm:$0xff]  }
 0xe2f   :  { %9501 = vst [vmem:[#allocation21_spill] sm:$0xff] %v8777_v0 }
 0xe31   :  { %6790 = vmatpush3.bf16.msra.mxu1 %v9477_v17  ;;  %6812 = vmatpush3.bf16.msra.mxu0 %v9478_v23 }
 0xe32   :  { %6791 = vmatprep.subr.bf16.mxu1 %v9479_v34  ;;  %6813 = vmatprep.subr.bf16.mxu0 %v9480_v45 }
 0xe35   :  { %6792 = vmatpush3.bf16.msra.mxu1 %v9481_v57  ;;  %6814 = vmatpush3.bf16.msra.mxu0 %v9482_v47 }
 0xe36   :  { %6793 = vmatprep.subr.bf16.mxu1 %v9483_v30  ;;  %6815 = vmatprep.subr.bf16.mxu0 %v9484_v62  ;;  %v8647_v30 = vld [vmem:[#allocation5 + $0x168] sm:$0xff]  }
 0xe37   :  { %v8650_v62 = vld [vmem:[#allocation5 + $0x1e8] sm:$0xff]  }
 0xe39   :  { %6794 = vmatpush3.bf16.msra.mxu1 %v9485_v63  ;;  %6816 = vmatpush3.bf16.msra.mxu0 %v9486_v27 }
 0xe3a   :  { %6795 = vmatprep.subr.bf16.mxu1 %v9487_v6  ;;  %6817 = vmatprep.subr.bf16.mxu0 %v9488_v28 }
 0xe3d   :  { %6796 = vmatpush3.bf16.msra.mxu1 %v9489_v9  ;;  %6818 = vmatpush3.bf16.msra.mxu0 %v9490_v10  ;;  %v8653_v9 = vld [vmem:[#allocation5 + $0x1b0] sm:$0xff]  }
 0xe3e   :  { %6797 = vmatprep.subr.bf16.mxu1 %v9491_v19  ;;  %6819 = vmatprep.subr.bf16.mxu0 %v9492_v22  ;;  %v8656_v10 = vld [vmem:[#allocation5 + $0x230] sm:$0xff]  }
 0xe41   :  { %6798 = vmatpush3.bf16.msra.mxu1 %v9493_v32  ;;  %6820 = vmatpush3.bf16.msra.mxu0 %v9494_v21 }
 0xe42   :  { %6827 = vmatprep.subr.bf16.mxu1 %v9495_v41  ;;  %6849 = vmatprep.subr.bf16.mxu0 %v9496_v42  ;;  %v8659_v41 = vld [vmem:[#allocation5 + $0x170] sm:$0xff]  }
 0xe43   :  { %v8662_v42 = vld [vmem:[#allocation5 + $0x1f0] sm:$0xff]  }
 0xedf   :  { %v4205_v53 = vpop.f32.mrb[76].mxu1  ;;  %v4246_v25 = vpop.f32.mrb[76].mxu0 }
 0xee0   :  { %v4206_v56 = vadd.f32 %v4205_v53, %v3947_v60  ;;  %v4247_v48 = vadd.f32 %v4246_v25, %v3955_v20  ;;  %v4207_v14 = vpop.f32.mrb[77].mxu1  ;;  %v4248_v8 = vpop.f32.mrb[77].mxu0  ;;  %v8668_v60 = vld [vmem:[#allocation5 + $0x238] sm:$0xff]  }
 0xee1   :  { %v4208_v18 = vadd.f32 %v4207_v14, %v3951_v35  ;;  %v4249_v11 = vadd.f32 %v4248_v8, %v3959_v12  ;;  %v4209_v37 = vpop.f32.mrb[78].mxu1  ;;  %v4250_v36 = vpop.f32.mrb[78].mxu0  ;;  %v8675_v25 = vld [vmem:[#allocation5 + $0x178] sm:$0xff]  }
 0xee2   :  { %v4499_v24 = vmax.f32 %v4206_v56, 0.0  ;;  %v4501_v59 = vmax.f32 %v4247_v48, 0.0  ;;  %v4210_v39 = vpop.f32.mrb[79].mxu1  ;;  %v4251_v16 = vpop.f32.mrb[79].mxu0  ;;  %v8678_v56 = vld [vmem:[#allocation5 + $0x1f8] sm:$0xff]   ;;  %v8684_v37 = vld [vmem:[#allocation5 + $0x240] sm:$0xff]  }
 0xee3   :  { %v4500_v50 = vmax.f32 %v4208_v18, 0.0  ;;  %v4502_v55 = vmax.f32 %v4249_v11, 0.0  ;;  %v8681_v11 = vld [vmem:[#allocation5 + $0x1c0] sm:$0xff]   ;;  %v8687_v36 = vld [vmem:[#allocation7 + $0x420] sm:$0x22]  ;;  %v9304_v16 = vunpack.c.l.bf16 %v8631_v31 }
 0xee4   :  { %v4515_v44 = vpack.c.bf16 %v4499_v24, %v4499_v24  ;;  %v4517_v40 = vpack.c.bf16 %v4501_v59, %v4501_v59  ;;  %v8689_v24 = vld [vmem:[#allocation7 + $0x428] sm:$0x22]  ;;  %v8691_v59 = vld [vmem:[#allocation5 + $0x180] sm:$0xff]  }
 0xee5   :  { %v4516_v38 = vpack.c.bf16 %v4500_v50, %v4500_v50  ;;  %v4518_v15 = vpack.c.bf16 %v4502_v55, %v4502_v55  ;;  %v8694_v39 = vld [vmem:[#allocation5 + $0x200] sm:$0xff]   ;;  %v9303_v50 = vunpack.c.l.bf16 %v8633_v13  ;;  %v8699_v55 = vld [vmem:[#allocation5 + $0x1c8] sm:$0xff]  }
 0xee7   :  { %v8643_v17 = vpop.f32.mrb[80].mxu1  ;;  %v8645_v23 = vpop.f32.mrb[80].mxu0  ;;  %4563 = vmatprep.mubr.bf16.mxu1 %v4516_v38  ;;  %4603 = vmatprep.mubr.bf16.mxu0 %v4518_v15  ;;  %v8702_v38 = vld [vmem:[#allocation5 + $0x248] sm:$0xff]   ;;  %v9302_v15 = vunpack.c.h.bf16 %v8687_v36 }
 0xee8   :  { %v4289_v34 = vpop.f32.mrb[81].mxu1  ;;  %v4330_v45 = vpop.f32.mrb[81].mxu0  ;;  %4564 = vmatmul.mubr.bf16.vlgmr.msra.gmra.mrb[92].mxu1 %v4515_v44  ;;  %4604 = vmatmul.mubr.bf16.vlgmr.msra.gmra.mrb[92].mxu0 %v4517_v40  ;;  %v9301_v44 = vunpack.c.h.bf16 %v8689_v24 }
 0xee9   :  { %v4290_v57 = vadd.f32 %v4289_v34, %v3967_v43  ;;  %v4331_v47 = vadd.f32 %v4330_v45, %v3975_v54  ;;  %6828 = vmatpush3.bf16.msra.mxu1 %v8647_v30  ;;  %6850 = vmatpush3.bf16.msra.mxu0 %v8650_v62  ;;  %v4291_v63 = vpop.f32.mrb[82].mxu1  ;;  %v4332_v27 = vpop.f32.mrb[82].mxu0  ;;  %v8715_v45 = vld [vmem:[#allocation5 + $0x188] sm:$0xff]  }
 0xeea   :  { %v4292_v6 = vpop.f32.mrb[83].mxu1  ;;  %v4333_v28 = vpop.f32.mrb[83].mxu0  ;;  %6829 = vmatprep.subr.bf16.mxu1 %v8653_v9  ;;  %6851 = vmatprep.subr.bf16.mxu0 %v8656_v10  ;;  %v3963_v27 = vrot.slane %v9304_v16, %v8613_v52  ;;  %v8771_v16 = vld [vmem:[#allocation5 + $0x2a8] sm:$0xff]  }
 0xeeb   :  { %v4504_v19 = vmax.f32 %v4290_v57, 0.0  ;;  %v4506_v22 = vmax.f32 %v4331_v47, 0.0  ;;  %v8718_v57 = vld [vmem:[#allocation5 + $0x208] sm:$0xff]   ;;  %v3971_v6 = vrot.slane %v9303_v50, %v8613_v52  ;;  %v8756_v50 = vld [vmem:[#allocation5 + $0x218] sm:$0xff]   ;;  %9499 = vst [vmem:[#allocation19_spill] sm:$0xff] %v8771_v16 }
 0xeed   :  { %v4520_v32 = vpack.c.bf16 %v4504_v19, %v4504_v19  ;;  %v4522_v21 = vpack.c.bf16 %v4506_v22, %v4506_v22  ;;  %6830 = vmatpush3.bf16.msra.mxu1 %v8659_v41  ;;  %6852 = vmatpush3.bf16.msra.mxu0 %v8662_v42  ;;  %v8727_v22 = vld [vmem:[#allocation5 + $0x1d0] sm:$0xff]  }
 0xeee   :  { %6831 = vmatprep.subr.bf16.mxu1 %v8665_v58  ;;  %6853 = vmatprep.subr.bf16.mxu0 %v8668_v60 }
 0xeef   :  { %v8671_v20 = vpop.f32.mrb[84].mxu1  ;;  %v8673_v35 = vpop.f32.mrb[84].mxu0  ;;  %4643 = vmatprep.mubr.bf16.mxu1 %v4520_v32  ;;  %4683 = vmatprep.mubr.bf16.mxu0 %v4522_v21  ;;  %v8730_v32 = vld [vmem:[#allocation5 + $0x250] sm:$0xff]   ;;  %v3983_v21 = vrot.slane %v9302_v15, %v8613_v52  ;;  %v8753_v15 = vld [vmem:[#allocation5 + $0x198] sm:$0xff]  }
 0xef0   :  { %v4371_v12 = vpop.f32.mrb[85].mxu1  ;;  %v4412_v53 = vpop.f32.mrb[85].mxu0 }
 0xef1   :  { %6832 = vmatpush3.bf16.msra.mxu1 %v8675_v25  ;;  %6854 = vmatpush3.bf16.msra.mxu0 %v8678_v56  ;;  %v4373_v48 = vpop.f32.mrb[86].mxu1  ;;  %v4414_v14 = vpop.f32.mrb[86].mxu0 }
 0xef2   :  { %v4374_v8 = vpop.f32.mrb[87].mxu1  ;;  %v4415_v18 = vpop.f32.mrb[87].mxu0  ;;  %6833 = vmatprep.subr.bf16.mxu1 %v8681_v11  ;;  %6855 = vmatprep.subr.bf16.mxu0 %v8684_v37  ;;  %v3991_v48 = vrot.slane %v9301_v44, %v8613_v52  ;;  %v8739_v14 = vld [vmem:[#allocation5 + $0x190] sm:$0xff]  }
 0xef3   :  { %v8742_v8 = vld [vmem:[#allocation5 + $0x210] sm:$0xff]   ;;  %v4288_v18 = vadd.f32 %v8643_v17, %v3963_v27  ;;  %v8759_v27 = vld [vmem:[#allocation5 + $0x1e0] sm:$0xff]  }
 0xef4   :  { %v4413_v44 = vadd.f32 %v4412_v53, %v3991_v48  ;;  %v8768_v48 = vld [vmem:[#allocation5 + $0x220] sm:$0xff]  }
 0xef5   :  { %6834 = vmatpush3.bf16.msra.mxu1 %v8691_v59  ;;  %6856 = vmatpush3.bf16.msra.mxu0 %v8694_v39  ;;  %v4503_v17 = vmax.f32 %v4288_v18, 0.0  ;;  %9498 = vst [vmem:[#allocation18_spill] sm:$0xff] %v8768_v48 }
 0xef6   :  { %6835 = vmatprep.subr.bf16.mxu1 %v8699_v55  ;;  %6857 = vmatprep.subr.bf16.mxu0 %v8702_v38  ;;  %v4510_v53 = vmax.f32 %v4413_v44, 0.0 }
 0xef7   :  { %v8706_v43 = vpop.f32.mrb[88].mxu1  ;;  %v8708_v54 = vpop.f32.mrb[88].mxu0  ;;  %v4519_v18 = vpack.c.bf16 %v4503_v17, %v4503_v17  ;;  %v8783_v17 = vld [vmem:[#allocation5 + $0x2b0] sm:$0xff]  }
 0xef8   :  { %v8711_v40 = vpop.f32.mrb[89].mxu1  ;;  %v8713_v34 = vpop.f32.mrb[89].mxu0  ;;  %v4526_v44 = vpack.c.bf16 %v4510_v53, %v4510_v53  ;;  %9503 = vst [vmem:[#allocation23_spill] sm:$0xff] %v8783_v17  ;;  %v8792_v53 = vld [vmem:[#allocation5 + $0x2f0] sm:$0xff]  }
 0xef9   :  { %6836 = vmatpush3.bf16.msra.mxu1 %v8715_v45  ;;  %6858 = vmatpush3.bf16.msra.mxu0 %v8718_v57  ;;  %v4455_v47 = vpop.f32.mrb[90].mxu1  ;;  %v4496_v63 = vpop.f32.mrb[90].mxu0  ;;  %9506 = vst [vmem:[#allocation26_spill] sm:$0xff] %v8792_v53 }
 0xefa   :  { %v4456_v28 = vpop.f32.mrb[91].mxu1  ;;  %v4497_v19 = vpop.f32.mrb[91].mxu0  ;;  %6837 = vmatprep.subr.bf16.mxu1 %v8727_v22  ;;  %6859 = vmatprep.subr.bf16.mxu0 %v8730_v32  ;;  %v4329_v47 = vadd.f32 %v8645_v23, %v3971_v6  ;;  %v8747_v63 = vld [vmem:[#allocation5 + $0x1d8] sm:$0xff]   ;;  %v8762_v6 = vld [vmem:[#allocation5 + $0x260] sm:$0xff]  }
 0xefb   :  { %v8750_v28 = vld [vmem:[#allocation5 + $0x258] sm:$0xff]   ;;  %v4372_v19 = vadd.f32 %v4371_v12, %v3983_v21  ;;  %v8765_v21 = vld [vmem:[#allocation5 + $0x1a0] sm:$0xff]  }
 0xefc   :  { %v4505_v23 = vmax.f32 %v4329_v47, 0.0 }
 0xefd   :  { %6838 = vmatpush3.bf16.msra.mxu1 %v8739_v14  ;;  %6860 = vmatpush3.bf16.msra.mxu0 %v8742_v8  ;;  %v4508_v12 = vmax.f32 %v4372_v19, 0.0 }
 0xefe   :  { %6839 = vmatprep.subr.bf16.mxu1 %v8747_v63  ;;  %6861 = vmatprep.subr.bf16.mxu0 %v8750_v28  ;;  %v4521_v47 = vpack.c.bf16 %v4505_v23, %v4505_v23  ;;  %v8786_v23 = vld [vmem:[#allocation5 + $0x330] sm:$0xff]  }
 0xeff   :  { %v4524_v19 = vpack.c.bf16 %v4508_v12, %v4508_v12  ;;  %9504 = vst [vmem:[#allocation24_spill] sm:$0xff] %v8786_v23  ;;  %v8789_v12 = vld [vmem:[#allocation5 + $0x270] sm:$0xff]  }
 0xf00   :  { %9505 = vst [vmem:[#allocation25_spill] sm:$0xff] %v8789_v12 }
 0xf01   :  { %6840 = vmatpush3.bf16.msra.mxu1 %v8753_v15  ;;  %6862 = vmatpush3.bf16.msra.mxu0 %v8756_v50 }
 0xf02   :  { %6841 = vmatprep.subr.bf16.mxu1 %v8759_v27  ;;  %6863 = vmatprep.subr.bf16.mxu0 %v8762_v6 }
 0xf05   :  { %6842 = vmatpush3.bf16.msra.mxu1 %v8765_v21  ;;  %6864 = vmatpush3.bf16.msra.mxu0 %v8768_v48 }
 0xf06   :  { %6871 = vmatprep.subr.bf16.mxu1 %v8771_v16  ;;  %6893 = vmatprep.subr.bf16.mxu0 %v8774_v33 }
 0xf08   :  { %4644 = vmatmul.mubr.bf16.vlgmr.msra.gmra.mrb[96].mxu1 %v4519_v18  ;;  %4684 = vmatmul.mubr.bf16.vlgmr.msra.gmra.mrb[96].mxu0 %v4521_v47  ;;  %v8795_v18 = vld [vmem:[#allocation5 + $0x2b8] sm:$0xff]  }
 0xf09   :  { %6872 = vmatpush3.bf16.msra.mxu1 %v8777_v0  ;;  %4723 = vmatprep.mubr.bf16.mxu1 %v4524_v19  ;;  %9507 = vst [vmem:[#allocation27_spill] sm:$0xff] %v8795_v18  ;;  %v8798_v47 = vld [vmem:[#allocation5 + $0x338] sm:$0xff]  }
 0xf0a   :  { %6894 = vmatpush3.bf16.msra.mxu0 %v8780_v7  ;;  %4763 = vmatprep.mubr.bf16.mxu0 %v4526_v44  ;;  %9508 = vst [vmem:[#allocation28_spill] sm:$0xff] %v8798_v47  ;;  %v8801_v19 = vld [vmem:[#allocation5 + $0x278] sm:$0xff]  }
 0xf0b   :  { %6873 = vmatprep.subr.bf16.mxu1 %v8783_v17  ;;  %6895 = vmatprep.subr.bf16.mxu0 %v8786_v23  ;;  %9509 = vst [vmem:[#allocation29_spill] sm:$0xff] %v8801_v19  ;;  %v8804_v44 = vld [vmem:[#allocation5 + $0x2f8] sm:$0xff]   ;;  %v8857_v23 = vld [vmem:[#allocation5 + $0x290] sm:$0xff]  }
 0xf0c   :  { %9510 = vst [vmem:[#allocation16_spill] sm:$0xff] %v8804_v44  ;;  %9527 = vst [vmem:[#allocation41_spill] sm:$0xff] %v8857_v23  ;;  %v8861_v17 = vld [vmem:[#allocation5 + $0x310] sm:$0xff]   ;;  %v8873_v7 = vld [vmem:[#allocation5 + $0x298] sm:$0xff]  }
 0xf0d   :  { %6874 = vmatpush3.bf16.msra.mxu1 %v8789_v12  ;;  %v8839_v12 = vld [vmem:[#allocation5 + $0x308] sm:$0xff]   ;;  %9528 = vst [vmem:[#allocation42_spill] sm:$0xff] %v8861_v17  ;;  %9531 = vst [vmem:[#allocation45_spill] sm:$0xff] %v8873_v7 }
 0xf0e   :  { %6896 = vmatpush3.bf16.msra.mxu0 %v8792_v53  ;;  %6875 = vmatprep.subr.bf16.mxu1 %v8795_v18  ;;  %v8833_v18 = vld [vmem:[#allocation5 + $0x288] sm:$0xff]   ;;  %9521 = vst [vmem:[#allocation38_spill] sm:$0xff] %v8839_v12 }
 0xf0f   :  { %6897 = vmatprep.subr.bf16.mxu0 %v8798_v47  ;;  %v8821_v47 = vld [vmem:[#allocation5 + $0x300] sm:$0xff]   ;;  %9519 = vst [vmem:[#allocation37_spill] sm:$0xff] %v8833_v18 }
 0xf10   :  { %9516 = vst [vmem:[#allocation34_spill] sm:$0xff] %v8821_v47 }
 0xf11   :  { %6876 = vmatpush3.bf16.msra.mxu1 %v8801_v19  ;;  %v8819_v19 = vld [vmem:[#allocation7 + $0x438] sm:$0x22] }
 0xf12   :  { %6898 = vmatpush3.bf16.msra.mxu0 %v8804_v44  ;;  %6877 = vmatprep.subr.bf16.mxu1 %v8807_v4  ;;  %9515 = vst [vmem:[#allocation33_spill] sm:$0xff] %v8819_v19  ;;  %v8824_v44 = vld [vmem:[#allocation5 + $0x2c8] sm:$0xff]  }
 0xf13   :  { %6899 = vmatprep.subr.bf16.mxu0 %v8810_v3  ;;  %9517 = vst [vmem:[#allocation35_spill] sm:$0xff] %v8824_v44  ;;  %v8828_v4 = vld [vmem:[#allocation5 + $0x348] sm:$0xff]   ;;  %v8842_v3 = vld [vmem:[#allocation5 + $0x2d0] sm:$0xff]  }
 0xf14   :  { %9518 = vst [vmem:[#allocation36_spill] sm:$0xff] %v8828_v4  ;;  %9522 = vst [vmem:[#allocation39_spill] sm:$0xff] %v8842_v3 }
 0xf15   :  { %6878 = vmatpush3.bf16.msra.mxu1 %v8815_v61  ;;  %v9523_v61 = vunpack.c.l.bf16 %v8689_v24 }
 0xf16   :  { %6900 = vmatpush3.bf16.msra.mxu0 %v8821_v47  ;;  %6879 = vmatprep.subr.bf16.mxu1 %v8824_v44  ;;  %v9520_v47 = vunpack.c.l.bf16 %v8687_v36  ;;  %v9526_v44 = vunpack.c.h.bf16 %v8819_v19 }
 0xf17   :  { %6901 = vmatprep.subr.bf16.mxu0 %v8828_v4  ;;  %v3987_v5 = vrot.slane %v9523_v61, %v8613_v52  ;;  %v8848_v4 = vld [vmem:[#allocation5 + $0x350] sm:$0xff]   ;;  %v8864_v61 = vld [vmem:[#allocation5 + $0x2d8] sm:$0xff]  }
 0xf18   :  { %v3979_v53 = vrot.slane %v9520_v47, %v8613_v52  ;;  %9524 = vst [vmem:[#allocation40_spill] sm:$0xff] %v8848_v4  ;;  %9529 = vst [vmem:[#allocation43_spill] sm:$0xff] %v8864_v61 }
 0xf19   :  { %6880 = vmatpush3.bf16.msra.mxu1 %v8833_v18  ;;  %v9525_v18 = vunpack.c.h.bf16 %v8813_v1 }
 0xf1a   :  { %6902 = vmatpush3.bf16.msra.mxu0 %v8839_v12  ;;  %6881 = vmatprep.subr.bf16.mxu1 %v8842_v3  ;;  %v4007_v12 = vrot.slane %v9526_v44, %v8613_v52  ;;  %v4370_v3 = vadd.f32 %v8671_v20, %v3979_v53  ;;  %v8876_v53 = vld [vmem:[#allocation5 + $0x318] sm:$0xff]  }
 0xf1b   :  { %6903 = vmatprep.subr.bf16.mxu0 %v8848_v4  ;;  %v3999_v47 = vrot.slane %v9525_v18, %v8613_v52  ;;  %v4411_v18 = vadd.f32 %v8673_v35, %v3987_v5  ;;  %v8868_v4 = vld [vmem:[#allocation5 + $0x358] sm:$0xff]   ;;  %9532 = vst [vmem:[#allocation46_spill] sm:$0xff] %v8876_v53  ;;  %v8882_v35 = vld [vmem:[#allocation5 + $0x360] sm:$0xff]  }
 0xf1c   :  { %9530 = vst [vmem:[#allocation44_spill] sm:$0xff] %v8868_v4  ;;  %v4507_v20 = vmax.f32 %v4370_v3, 0.0  ;;  %9534 = vst [vmem:[#allocation48_spill] sm:$0xff] %v8882_v35 }
 0xf1d   :  { %6882 = vmatpush3.bf16.msra.mxu1 %v8857_v23  ;;  %v4454_v44 = vadd.f32 %v8711_v40, %v3999_v47  ;;  %v4495_v23 = vadd.f32 %v8713_v34, %v4007_v12  ;;  %v4509_v5 = vmax.f32 %v4411_v18, 0.0  ;;  %v8885_v12 = vld [vmem:[#allocation5 + $0x2a0] sm:$0xff]  }
 0xf1e   :  { %6904 = vmatpush3.bf16.msra.mxu0 %v8861_v17  ;;  %6883 = vmatprep.subr.bf16.mxu1 %v8864_v61  ;;  %v8879_v61 = vld [vmem:[#allocation5 + $0x2e0] sm:$0xff]   ;;  %9535 = vst [vmem:[#allocation49_spill] sm:$0xff] %v8885_v12  ;;  %v4523_v3 = vpack.c.bf16 %v4507_v20, %v4507_v20  ;;  %v8900_v20 = vld [vmem:[#allocation5 + $0x3e8] sm:$0xff]  }
 0xf1f   :  { %6905 = vmatprep.subr.bf16.mxu0 %v8868_v4  ;;  %9533 = vst [vmem:[#allocation47_spill] sm:$0xff] %v8879_v61  ;;  %v4512_v40 = vmax.f32 %v4454_v44, 0.0  ;;  %v4514_v34 = vmax.f32 %v4495_v23, 0.0  ;;  %v8888_v47 = vld [vmem:[#allocation5 + $0x320] sm:$0xff]   ;;  %v4525_v18 = vpack.c.bf16 %v4509_v5, %v4509_v5  ;;  %9540 = vst [vmem:[#allocation54_spill] sm:$0xff] %v8900_v20  ;;  %v8906_v5 = vld [vmem:[#allocation5 + $0x430] sm:$0xff]  }
 0xf20   :  { %9536 = vst [vmem:[#allocation50_spill] sm:$0xff] %v8888_v47  ;;  %9542 = vst [vmem:[#allocation56_spill] sm:$0xff] %v8906_v5 }
 0xf21   :  { %6884 = vmatpush3.bf16.msra.mxu1 %v8873_v7  ;;  %v4528_v44 = vpack.c.bf16 %v4512_v40, %v4512_v40  ;;  %v4530_v23 = vpack.c.bf16 %v4514_v34, %v4514_v34  ;;  %v8909_v40 = vld [vmem:[#allocation5 + $0x370] sm:$0xff]  }
 0xf22   :  { %6906 = vmatpush3.bf16.msra.mxu0 %v8876_v53  ;;  %6885 = vmatprep.subr.bf16.mxu1 %v8879_v61  ;;  %v8891_v53 = vld [vmem:[#allocation5 + $0x3a8] sm:$0xff]   ;;  %9543 = vst [vmem:[#allocation57_spill] sm:$0xff] %v8909_v40  ;;  %v8912_v34 = vld [vmem:[#allocation5 + $0x3f0] sm:$0xff]  }
 0xf23   :  { %6907 = vmatprep.subr.bf16.mxu0 %v8882_v35  ;;  %9537 = vst [vmem:[#allocation51_spill] sm:$0xff] %v8891_v53  ;;  %v8894_v61 = vld [vmem:[#allocation5 + $0x428] sm:$0xff]   ;;  %9544 = vst [vmem:[#allocation58_spill] sm:$0xff] %v8912_v34 }
 0xf24   :  { %9538 = vst [vmem:[#allocation52_spill] sm:$0xff] %v8894_v61  ;;  %v8897_v35 = vld [vmem:[#allocation5 + $0x368] sm:$0xff]  }
 0xf25   :  { %6886 = vmatpush3.bf16.msra.mxu1 %v8885_v12  ;;  %9539 = vst [vmem:[#allocation53_spill] sm:$0xff] %v8897_v35 }
 0xf26   :  { %6908 = vmatpush3.bf16.msra.mxu0 %v8888_v47  ;;  %6915 = vmatprep.subr.bf16.mxu1 %v8891_v53  ;;  %v8903_v53 = vld [vmem:[#allocation5 + $0x3b0] sm:$0xff]  }
 0xf27   :  { %6937 = vmatprep.subr.bf16.mxu0 %v8894_v61  ;;  %9541 = vst [vmem:[#allocation55_spill] sm:$0xff] %v8903_v53 }
 0xf28   :  { %4724 = vmatmul.mubr.bf16.vlgmr.msra.gmra.mrb[100].mxu1 %v4523_v3  ;;  %v8915_v3 = vld [vmem:[#allocation5 + $0x3b8] sm:$0xff]  }
 0xf29   :  { %4764 = vmatmul.mubr.bf16.vlgmr.msra.gmra.mrb[100].mxu0 %v4525_v18  ;;  %6916 = vmatpush3.bf16.msra.mxu1 %v8897_v35  ;;  %9545 = vst [vmem:[#allocation59_spill] sm:$0xff] %v8915_v3  ;;  %v8918_v18 = vld [vmem:[#allocation5 + $0x438] sm:$0xff]  }
 0xf2a   :  { %4803 = vmatprep.mubr.bf16.mxu1 %v4528_v44  ;;  %6938 = vmatpush3.bf16.msra.mxu0 %v8900_v20  ;;  %9546 = vst [vmem:[#allocation60_spill] sm:$0xff] %v8918_v18  ;;  %v8921_v44 = vld [vmem:[#allocation5 + $0x378] sm:$0xff]   ;;  %v8969_v20 = vld [vmem:[#allocation5 + $0x410] sm:$0xff]  }
 0xf2b   :  { %4843 = vmatprep.mubr.bf16.mxu0 %v4530_v23  ;;  %6917 = vmatprep.subr.bf16.mxu1 %v8903_v53  ;;  %9547 = vst [vmem:[#allocation61_spill] sm:$0xff] %v8921_v44  ;;  %v8924_v23 = vld [vmem:[#allocation5 + $0x3f8] sm:$0xff]   ;;  %v8953_v53 = vld [vmem:[#allocation5 + $0x408] sm:$0xff]   ;;  %9560 = vst [vmem:[#allocation73_spill] sm:$0xff] %v8969_v20 }
 0xf2c   :  { %6939 = vmatprep.subr.bf16.mxu0 %v8906_v5  ;;  %9548 = vst [vmem:[#allocation62_spill] sm:$0xff] %v8924_v23  ;;  %v8937_v5 = vld [vmem:[#allocation5 + $0x400] sm:$0xff]   ;;  %9556 = vst [vmem:[#allocation69_spill] sm:$0xff] %v8953_v53 }
 0xf2d   :  { %6918 = vmatpush3.bf16.msra.mxu1 %v8909_v40  ;;  %v8927_v40 = vld [vmem:[#allocation5 + $0x3c0] sm:$0xff]   ;;  %9552 = vst [vmem:[#allocation65_spill] sm:$0xff] %v8937_v5 }
 0xf2e   :  { %6940 = vmatpush3.bf16.msra.mxu0 %v8912_v34  ;;  %6919 = vmatprep.subr.bf16.mxu1 %v8915_v3  ;;  %9549 = vst [vmem:[#allocation15_spill] sm:$0xff] %v8927_v40  ;;  %v8930_v34 = vld [vmem:[#allocation5 + $0x440] sm:$0xff]  }
 0xf2f   :  { %6941 = vmatprep.subr.bf16.mxu0 %v8918_v18  ;;  %9550 = vst [vmem:[#allocation63_spill] sm:$0xff] %v8930_v34  ;;  %v8933_v3 = vld [vmem:[#allocation5 + $0x380] sm:$0xff]   ;;  %v9352_v18 = vunpack.c.l.bf16 %v8813_v1 }
 0xf30   :  { %9551 = vst [vmem:[#allocation64_spill] sm:$0xff] %v8933_v3 }
 0xf31   :  { %6920 = vmatpush3.bf16.msra.mxu1 %v8921_v44  ;;  %v8940_v44 = vld [vmem:[#allocation5 + $0x3c8] sm:$0xff]  }
 0xf32   :  { %6942 = vmatpush3.bf16.msra.mxu0 %v8924_v23  ;;  %6921 = vmatprep.subr.bf16.mxu1 %v8927_v40  ;;  %9553 = vst [vmem:[#allocation66_spill] sm:$0xff] %v8940_v44  ;;  %v9355_v40 = vunpack.c.l.bf16 %v8819_v19  ;;  %v8944_v23 = vld [vmem:[#allocation5 + $0x448] sm:$0xff]  }
 0xf33   :  { %6943 = vmatprep.subr.bf16.mxu0 %v8930_v34  ;;  %9554 = vst [vmem:[#allocation67_spill] sm:$0xff] %v8944_v23  ;;  %v8947_v34 = vld [vmem:[#allocation5 + $0x388] sm:$0xff]  }
 0xf34   :  { %9555 = vst [vmem:[#allocation68_spill] sm:$0xff] %v8947_v34 }
 0xf35   :  { %6922 = vmatpush3.bf16.msra.mxu1 %v8933_v3  ;;  %v3995_v3 = vrot.slane %v9352_v18, %v8613_v52 }
 0xf36   :  { %6944 = vmatpush3.bf16.msra.mxu0 %v8937_v5  ;;  %6923 = vmatprep.subr.bf16.mxu1 %v8940_v44  ;;  %v8956_v5 = vld [vmem:[#allocation5 + $0x3d0] sm:$0xff]  }
 0xf37   :  { %6945 = vmatprep.subr.bf16.mxu0 %v8944_v23  ;;  %9557 = vst [vmem:[#allocation70_spill] sm:$0xff] %v8956_v5  ;;  %v4003_v23 = vrot.slane %v9355_v40, %v8613_v52  ;;  %v8962_v44 = vld [vmem:[#allocation5 + $0x450] sm:$0xff]   ;;  %v4452_v18 = vadd.f32 %v8706_v43, %v3995_v3  ;;  %v8976_v40 = vld [vmem:[#allocation5 + $0x458] sm:$0xff]   ;;  %v8985_v3 = vld [vmem:[#allocation5 + $0x3e0] sm:$0xff]  }
 0xf38   :  { %9558 = vst [vmem:[#allocation71_spill] sm:$0xff] %v8962_v44  ;;  %9562 = vst [vmem:[#allocation75_spill] sm:$0xff] %v8976_v40  ;;  %v8982_v43 = vld [vmem:[#allocation5 + $0x418] sm:$0xff]  }
 0xf39   :  { %6924 = vmatpush3.bf16.msra.mxu1 %v8947_v34  ;;  %v8965_v34 = vld [vmem:[#allocation5 + $0x390] sm:$0xff]   ;;  %v4493_v52 = vadd.f32 %v8708_v54, %v4003_v23  ;;  %9564 = vst [vmem:[#allocation77_spill] sm:$0xff] %v8982_v43  ;;  %9565 = vst [vmem:[#allocation78_spill] sm:$0xff] %v8985_v3  ;;  %v8991_v54 = vld [vmem:[#allocation5 + $0x3a0] sm:$0xff]  }
 0xf3a   :  { %6946 = vmatpush3.bf16.msra.mxu0 %v8953_v53  ;;  %6925 = vmatprep.subr.bf16.mxu1 %v8956_v5  ;;  %9559 = vst [vmem:[#allocation72_spill] sm:$0xff] %v8965_v34  ;;  %v8972_v53 = vld [vmem:[#allocation5 + $0x3d8] sm:$0xff]   ;;  %9567 = vst [vmem:[#allocation80_spill] sm:$0xff] %v8991_v54 }
 0xf3b   :  { %6947 = vmatprep.subr.bf16.mxu0 %v8962_v44  ;;  %9561 = vst [vmem:[#allocation74_spill] sm:$0xff] %v8972_v53  ;;  %v8979_v44 = vld [vmem:[#allocation5 + $0x398] sm:$0xff]  }
 0xf3c   :  { %9563 = vst [vmem:[#allocation76_spill] sm:$0xff] %v8979_v44 }
 0xf3d   :  { %6926 = vmatpush3.bf16.msra.mxu1 %v8965_v34  ;;  %v4511_v34 = vmax.f32 %v4452_v18, 0.0 }
 0xf3e   :  { %6948 = vmatpush3.bf16.msra.mxu0 %v8969_v20  ;;  %6927 = vmatprep.subr.bf16.mxu1 %v8972_v53  ;;  %v4513_v53 = vmax.f32 %v4493_v52, 0.0  ;;  %v8988_v20 = vld [vmem:[#allocation5 + $0x460] sm:$0xff]  }
 0xf3f   :  { %6949 = vmatprep.subr.bf16.mxu0 %v8976_v40  ;;  %9566 = vst [vmem:[#allocation79_spill] sm:$0xff] %v8988_v20  ;;  %v4527_v23 = vpack.c.bf16 %v4511_v34, %v4511_v34 }
 0xf40   :  { %v4529_v18 = vpack.c.bf16 %v4513_v53, %v4513_v53 }
 0xf41   :  { %6928 = vmatpush3.bf16.msra.mxu1 %v8979_v44  ;;  %v8994_v44 = vld [vmem:[#allocation5 + $0x420] sm:$0xff]  }
 0xf42   :  { %6950 = vmatpush3.bf16.msra.mxu0 %v8982_v43  ;;  %6929 = vmatprep.subr.bf16.mxu1 %v8985_v3  ;;  %9568 = vst [vmem:[#allocation81_spill] sm:$0xff] %v8994_v44 }
 0xf43   :  { %6951 = vmatprep.subr.bf16.mxu0 %v8988_v20 }
 0xf45   :  { %6930 = vmatpush3.bf16.msra.mxu1 %v8991_v54 }
 0xf46   :  { %6952 = vmatpush3.bf16.msra.mxu0 %v8994_v44 }
 0xf48   :  { %4804 = vmatmul.mubr.bf16.vlgmr.msra.gmra.mrb[104].mxu1 %v4527_v23 }
 0xf49   :  { %4844 = vmatmul.mubr.bf16.vlgmr.msra.gmra.mrb[104].mxu0 %v4529_v18  ;;  %5255 = vmatprep.mubr.bf16.mxu1 %v9398_v51 }
 0xf4a   :  { %5296 = vmatprep.mubr.bf16.mxu0 %v9398_v51 }
 0xfbb   :  { %v6799_v52 = vpop.f32.mrb[92].mxu1  ;;  %v6821_v3 = vpop.f32.mrb[92].mxu0 }
 0xfbc   :  { %v6800_v43 = vpop.f32.mrb[93].mxu1  ;;  %v6822_v20 = vpop.f32.mrb[93].mxu0 }
 0xfbd   :  { %v6801_v40 = vadd.f32 %v6800_v43, %v6799_v52  ;;  %v6823_v5 = vadd.f32 %v6822_v20, %v6821_v3  ;;  %v6802_v35 = vpop.f32.mrb[94].mxu1  ;;  %v6824_v54 = vpop.f32.mrb[94].mxu0 }
 0xfbe   :  { %v6803_v34 = vpop.f32.mrb[95].mxu1  ;;  %v6825_v61 = vpop.f32.mrb[95].mxu0 }
 0xfbf   :  { %v4606_v47 = vadd.f32 %v6823_v5, %v6801_v40 }
 0xfdb   :  { %v6843_v12 = vpop.f32.mrb[96].mxu1  ;;  %v6865_v44 = vpop.f32.mrb[96].mxu0 }
 0xfdc   :  { %v6844_v53 = vpop.f32.mrb[97].mxu1  ;;  %v6866_v23 = vpop.f32.mrb[97].mxu0 }
 0xfdd   :  { %v6845_v18 = vadd.f32 %v6844_v53, %v6843_v12  ;;  %v6867_v7 = vadd.f32 %v6866_v23, %v6865_v44  ;;  %v6846_v4 = vpop.f32.mrb[98].mxu1  ;;  %v6868_v17 = vpop.f32.mrb[98].mxu0 }
 0xfde   :  { %v6847_v19 = vpop.f32.mrb[99].mxu1  ;;  %v6869_v1 = vpop.f32.mrb[99].mxu0 }
 0xfdf   :  { %v4646_v0 = vadd.f32 %v6845_v18, %v4606_v47 }
 0xfe1   :  { %v4686_v33 = vadd.f32 %v6867_v7, %v4646_v0 }
 0xffb   :  { %v6887_v16 = vpop.f32.mrb[100].mxu1 }
 0xffc   :  { %v6909_v43 = vpop.f32.mrb[100].mxu0  ;;  %v6888_v20 = vpop.f32.mrb[101].mxu1 }
 0xffd   :  { %v6889_v35 = vadd.f32 %v6888_v20, %v6887_v16  ;;  %v6910_v3 = vpop.f32.mrb[101].mxu0  ;;  %v6890_v54 = vpop.f32.mrb[102].mxu1 }
 0xffe   :  { %v6911_v61 = vadd.f32 %v6910_v3, %v6909_v43  ;;  %v6912_v5 = vpop.f32.mrb[102].mxu0  ;;  %v6891_v40 = vpop.f32.mrb[103].mxu1 }
 0xfff   :  { %v4726_v52 = vadd.f32 %v6889_v35, %v4686_v33  ;;  %v6913_v34 = vpop.f32.mrb[103].mxu0  ;;  %v4858_v16 = vpop.permute.xlu0 %4857 }
0x1001   :  { %v4766_v48 = vadd.f32 %v6911_v61, %v4726_v52  ;;  %v6366_v61 = vld [vmem:[#allocation8 + $0x58] ss:$0 sm:$0xff] }
0x101b   :  { %v6931_v12 = vpop.f32.mrb[104].mxu1 }
0x101c   :  { %v6953_v44 = vpop.f32.mrb[104].mxu0  ;;  %v6932_v4 = vpop.f32.mrb[105].mxu1 }
0x101d   :  { %v6933_v17 = vadd.f32 %v6932_v4, %v6931_v12  ;;  %v6954_v19 = vpop.f32.mrb[105].mxu0  ;;  %v6934_v1 = vpop.f32.mrb[106].mxu1 }
0x101e   :  { %v6955_v47 = vadd.f32 %v6954_v19, %v6953_v44  ;;  %v6956_v7 = vpop.f32.mrb[106].mxu0  ;;  %v6935_v0 = vpop.f32.mrb[107].mxu1  ;;  %v6363_v1 = vld [vmem:[#allocation8 + $0x56] ss:$0 sm:$0xff] }
0x101f   :  { %v4806_v53 = vadd.f32 %v6933_v17, %v4766_v48  ;;  %v6957_v23 = vpop.f32.mrb[107].mxu0  ;;  %v6362_v17 = vld [vmem:[#allocation8 + $0x55] ss:$0 sm:$0xff] }
0x1021   :  { %v4846_v18 = vadd.f32 %v6955_v47, %v4806_v53 }
0x1023   :  { %v4860_v20 = vadd.f32 %v4858_v16, %v4846_v18 }
0x1025   :  { %4862 = vrot.lane.b32.xlu1 %v4860_v20, %s7725_s25  ;;  %s7741_s25 = smov [#allocation10]  }
0x1097   :  { %v4863_v43 = vpop.permute.xlu1 %4862 }
0x1098   :  { %v4865_v33 = vadd.f32 %v4863_v43, %v8545_v2 }
0x109a   :  { %v4868_v35 = vsel %vm566_vm3, %v4865_v33, 0.0  ;;  %v4872_v3 = vmul.f32 %v4865_v33, %v4865_v33 }
0x109b   :  { %4869 = vadd.xlane.f32.xlu0 %v4868_v35 }
0x109c   :  { %v4873_v54 = vsel %vm566_vm3, %v4872_v3, 0.0 }
0x109d   :  { %4874 = vadd.xlane.f32.xlu1 %v4873_v54 }
0x10b1   :  { %4927 = vrot.lane.b32.xlu0 %v6366_v61, %s7738_s3 }
0x1128   :  { %v4870_v48 = vpop.xlane.xlu0 %4869 }
0x1129   :  { %v4871_v5 = vmul.f32 0.03125, %v4870_v48 }
0x112a   :  { %v4875_v40 = vpop.xlane.xlu1 %4874 }
0x112b   :  { %v4877_v52 = vmul.f32 %v4871_v5, %v4871_v5  ;;  %v4876_v34 = vmul.f32 0.03125, %v4875_v40  ;;  %v4879_v4 = vsub.f32 %v4865_v33, %v4871_v5 }
0x112c   :  { %v4928_v18 = vpop.permute.xlu0 %4927 }
0x112d   :  { %v4878_v12 = vsub.f32 %v4876_v34, %v4877_v52  ;;  %v4930_v20 = vadd.f32 %v4928_v18, %v8539_v46  ;;  %v6364_v52 = vld [vmem:[#allocation8 + $0x59] ss:$0 sm:$0xff] }
0x112f   :  { %v4880_v44 = vadd.f32 1e-05, %v4878_v12  ;;  %v6365_v12 = vld [vmem:[#allocation8 + $0x5a] ss:$0 sm:$0xff] }
0x1131   :  { %7381 = vrsqrt.f32 %v4880_v44 }
0x113b   :  { %v7382_v2 = vpop.eup %7381 }
0x113c   :  { %v4882_v19 = vmul.f32 %v7382_v2, %v4879_v4 }
0x113e   :  { %v4887_v47 = vmul.f32 %v6362_v17, %v4882_v19 }
0x1140   :  { %v4892_v7 = vadd.f32 %v6363_v1, %v4887_v47  ;;  %v4963_v47 = vld [vmem:[#allocation7 + $0x300] sm:$0xff] }
0x1142   :  { %v4893_v0 = vadd.f32 %v4892_v7, %v4892_v7  ;;  %v4971_v7 = vld [vmem:[#allocation7 + $0x340] sm:$0xff] }
0x1144   :  { %v4896_v53 = vsel %vm566_vm3, %v4893_v0, 0.0  ;;  %v4900_v23 = vmul.f32 %v4893_v0, %v4893_v0 }
0x1145   :  { %4897 = vadd.xlane.f32.xlu1 %v4896_v53  ;;  %v4964_v53 = vld [vmem:[#allocation7 + $0x308] sm:$0xff] }
0x1146   :  { %v4901_v16 = vsel %vm566_vm3, %v4900_v23, 0.0  ;;  %v6370_v23 = vcombine.high %v4963_v47, %v4971_v7 }
0x1148   :  { %5223 = vmatprep.subr.bf16.mxu1 %v6370_v23 }
0x1149   :  { %4902 = vadd.xlane.f32.xlu1 %v4901_v16  ;;  %v6369_v16 = vcombine.low %v4963_v47, %v4971_v7 }
0x114b   :  { %5224 = vmatpush1.bf16.msra.mxu1 %v6369_v16 }
0x115a   :  { %4932 = vrot.lane.b32.xlu1 %v4930_v20, %s7728_s1 }
0x11d2   :  { %v4898_v43 = vpop.xlane.xlu1 %4897 }
0x11d3   :  { %v4899_v33 = vmul.f32 0.03125, %v4898_v43  ;;  %v4979_v43 = vld [vmem:[#allocation7 + $0x380] sm:$0xff] }
0x11d5   :  { %v4905_v3 = vmul.f32 %v4899_v33, %v4899_v33  ;;  %v4907_v5 = vsub.f32 %v4893_v0, %v4899_v33  ;;  %v4972_v0 = vld [vmem:[#allocation7 + $0x348] sm:$0xff]  ;;  %v4987_v33 = vld [vmem:[#allocation7 + $0x3c0] sm:$0xff] }
0x11d6   :  { %v4903_v35 = vpop.xlane.xlu1 %4902  ;;  %v6371_v18 = vcombine.low %v4964_v53, %v4972_v0  ;;  %v6372_v20 = vcombine.high %v4964_v53, %v4972_v0 }
0x11d7   :  { %v4904_v54 = vmul.f32 0.03125, %v4903_v35  ;;  %v4980_v35 = vld [vmem:[#allocation7 + $0x388] sm:$0xff] }
0x11d8   :  { %5264 = vmatprep.subr.bf16.mxu0 %v6372_v20  ;;  %v6367_v20 = vld [vmem:[#allocation8 + $0x5b] ss:$0 sm:$0xff] }
0x11d9   :  { %v4906_v61 = vsub.f32 %v4904_v54, %v4905_v3  ;;  %5265 = vmatpush1.bf16.msra.mxu0 %v6371_v18  ;;  %v6386_v3 = vcombine.high %v4979_v43, %v4987_v33  ;;  %v4988_v54 = vld [vmem:[#allocation7 + $0x3c8] sm:$0xff] }
0x11da   :  { %v4933_v2 = vpop.permute.xlu1 %4932 }
0x11db   :  { %v4908_v48 = vadd.f32 1e-05, %v4906_v61  ;;  %v6385_v61 = vcombine.low %v4979_v43, %v4987_v33  ;;  %5225 = vmatprep.subr.bf16.mxu1 %v6386_v3  ;;  %v6368_v33 = vld [vmem:[#allocation8 + $0x5c] ss:$0 sm:$0xff]  ;;  %v4981_v3 = vld [vmem:[#allocation7 + $0x390] sm:$0xff] }
0x11dd   :  { %7383 = vrsqrt.f32 %v4908_v48  ;;  %v6387_v48 = vcombine.low %v4980_v35, %v4988_v54  ;;  %5226 = vmatpush1.bf16.msra.mxu1 %v6385_v61  ;;  %v4982_v61 = vld [vmem:[#allocation7 + $0x398] sm:$0xff] }
0x11e7   :  { %v7384_v40 = vpop.eup %7383 }
0x11e8   :  { %v4910_v34 = vmul.f32 %v7384_v40, %v4907_v5  ;;  %v6388_v5 = vcombine.high %v4980_v35, %v4988_v54  ;;  %v4965_v40 = vld [vmem:[#allocation7 + $0x310] sm:$0xff] }
0x11e9   :  { %v4989_v54 = vld [vmem:[#allocation7 + $0x3d0] sm:$0xff] }
0x11ea   :  { %v4915_v44 = vmul.f32 %v6364_v52, %v4910_v34  ;;  %5266 = vmatprep.subr.bf16.mxu0 %v6388_v5  ;;  %v4973_v52 = vld [vmem:[#allocation7 + $0x350] sm:$0xff]  ;;  %v4966_v34 = vld [vmem:[#allocation7 + $0x318] sm:$0xff] }
0x11eb   :  { %5267 = vmatpush1.bf16.msra.mxu0 %v6387_v48  ;;  %v4990_v48 = vld [vmem:[#allocation7 + $0x3d8] sm:$0xff] }
0x11ec   :  { %v4920_v4 = vadd.f32 %v6365_v12, %v4915_v44  ;;  %v6373_v12 = vcombine.low %v4965_v40, %v4973_v52  ;;  %v6374_v44 = vcombine.high %v4965_v40, %v4973_v52  ;;  %v6390_v52 = vcombine.high %v4981_v3, %v4989_v54 }
0x11ee   :  { %v4935_v17 = vadd.f32 %v4933_v2, %v4920_v4  ;;  %v4974_v4 = vld [vmem:[#allocation7 + $0x358] sm:$0xff]  ;;  %5305 = vmatprep.subr.bf16.mxu1 %v6374_v44  ;;  %v4967_v44 = vld [vmem:[#allocation7 + $0x320] sm:$0xff] }
0x11ef   :  { %v6375_v2 = vcombine.low %v4966_v34, %v4974_v4 }
0x11f0   :  { %v4938_v46 = vsel %vm566_vm3, %v4935_v17, 0.0  ;;  %v4942_v19 = vmul.f32 %v4935_v17, %v4935_v17 }
0x11f1   :  { %4939 = vadd.xlane.f32.xlu0 %v4938_v46  ;;  %v6376_v46 = vcombine.high %v4966_v34, %v4974_v4  ;;  %v6392_v34 = vcombine.high %v4982_v61, %v4990_v48  ;;  %v4975_v4 = vld [vmem:[#allocation7 + $0x360] sm:$0xff] }
0x11f2   :  { %v4943_v1 = vsel %vm566_vm3, %v4942_v19, 0.0 }
0x11f3   :  { %4944 = vadd.xlane.f32.xlu1 %v4943_v1  ;;  %5346 = vmatprep.subr.bf16.mxu0 %v6376_v46  ;;  %v4976_v46 = vld [vmem:[#allocation7 + $0x368] sm:$0xff] }
0x127e   :  { %v4940_v19 = vpop.xlane.xlu0 %4939 }
0x127f   :  { %v4941_v1 = vmul.f32 0.03125, %v4940_v19  ;;  %v6389_v19 = vcombine.low %v4981_v3, %v4989_v54  ;;  %v4978_v3 = vld [vmem:[#allocation7 + $0x378] sm:$0xff] }
0x1280   :  { %v4945_v47 = vpop.xlane.xlu1 %4944 }
0x1281   :  { %v4947_v7 = vmul.f32 %v4941_v1, %v4941_v1  ;;  %v4946_v53 = vmul.f32 0.03125, %v4945_v47  ;;  %v4949_v16 = vsub.f32 %v4935_v17, %v4941_v1  ;;  %v4968_v17 = vld [vmem:[#allocation7 + $0x328] sm:$0xff]  ;;  %v6391_v1 = vcombine.low %v4982_v61, %v4990_v48 }
0x1282   :  { %v6378_v47 = vcombine.high %v4967_v44, %v4975_v4 }
0x1283   :  { %v4948_v23 = vsub.f32 %v4946_v53, %v4947_v7  ;;  %v6380_v7 = vcombine.high %v4968_v17, %v4976_v46  ;;  %v4983_v53 = vld [vmem:[#allocation7 + $0x3a0] sm:$0xff] }
0x1285   :  { %v4950_v0 = vadd.f32 1e-05, %v4948_v23  ;;  %v4991_v23 = vld [vmem:[#allocation7 + $0x3e0] sm:$0xff] }
0x1286   :  { %v6393_v54 = vcombine.low %v4983_v53, %v4991_v23 }
0x1287   :  { %7385 = vrsqrt.f32 %v4950_v0  ;;  %v4984_v0 = vld [vmem:[#allocation7 + $0x3a8] sm:$0xff] }
0x1291   :  { %v7386_v18 = vpop.eup %7385 }
0x1292   :  { %v4952_v43 = vmul.f32 %v7386_v18, %v4949_v16  ;;  %v4992_v16 = vld [vmem:[#allocation7 + $0x3e8] sm:$0xff]  ;;  %v6377_v18 = vcombine.low %v4967_v44, %v4975_v4  ;;  %v4993_v44 = vld [vmem:[#allocation7 + $0x3f0] sm:$0xff]  ;;  %v4986_v4 = vld [vmem:[#allocation7 + $0x3b8] sm:$0xff] }
0x1293   :  { %v6395_v61 = vcombine.low %v4984_v0, %v4992_v16 }
0x1294   :  { %v4957_v35 = vmul.f32 %v6367_v20, %v4952_v43  ;;  %v6379_v20 = vcombine.low %v4968_v17, %v4976_v46  ;;  %v4969_v43 = vld [vmem:[#allocation7 + $0x330] sm:$0xff]  ;;  %v4994_v17 = vld [vmem:[#allocation7 + $0x3f8] sm:$0xff] }
0x1296   :  { %v9010_v5 = vadd.f32 %v6368_v33, %v4957_v35  ;;  %v4977_v33 = vld [vmem:[#allocation7 + $0x370] sm:$0xff]  ;;  %v4970_v35 = vld [vmem:[#allocation7 + $0x338] sm:$0xff] }
0x1297   :  { %v6382_v48 = vcombine.high %v4969_v43, %v4977_v33  ;;  %v6381_v46 = vcombine.low %v4969_v43, %v4977_v33  ;;  %v7580_v43 = vld [vmem:[#allocation5 + $0xb8] sm:$0xff]  }
0x1298   :  { %v9014_v40 = vpack.c.bf16 %v9010_v5, %v9010_v5  ;;  %v7581_v33 = vld [vmem:[#allocation5 + $0x138] sm:$0xff]  }
0x129a   :  { %6401 = vmatmul.mubr.msk.bf16.vlgmr.msra.gmra.mrb[108].mxu1 %vm483_vm2, %v9014_v40  ;;  %6402 = vmatmul.mubr.msk.bf16.vlgmr.msra.gmra.mrb[108].mxu0 %vm483_vm2, %v9014_v40 }
0x129b   :  { %5306 = vmatpush1.bf16.msra.mxu1 %v6373_v12  ;;  %5347 = vmatpush1.bf16.msra.mxu0 %v6375_v2  ;;  %v6394_v12 = vcombine.high %v4983_v53, %v4991_v23  ;;  %v6396_v2 = vcombine.high %v4984_v0, %v4992_v16  ;;  %v6399_v53 = vcombine.low %v4986_v4, %v4994_v17  ;;  %v7572_v23 = vld [vmem:[#allocation5 + $0xa8] sm:$0xff]  }
0x129c   :  { %5307 = vmatprep.subr.bf16.mxu1 %v6390_v52  ;;  %5348 = vmatprep.subr.bf16.mxu0 %v6392_v34  ;;  %v6384_v52 = vcombine.high %v4970_v35, %v4978_v3  ;;  %v4985_v34 = vld [vmem:[#allocation7 + $0x3b0] sm:$0xff]  ;;  %v7573_v0 = vld [vmem:[#allocation5 + $0x128] sm:$0xff]  }
0x129d   :  { %5337 = vmatprep.mubr.bf16.mxu1 %v9398_v51  ;;  %5378 = vmatprep.mubr.bf16.mxu0 %v9398_v51  ;;  %v7574_v16 = vld [vmem:[#allocation5 + $0x68] sm:$0xff]  }
0x129f   :  { %5308 = vmatpush1.bf16.msra.mxu1 %v6389_v19  ;;  %5349 = vmatpush1.bf16.msra.mxu0 %v6391_v1  ;;  %v6383_v19 = vcombine.low %v4970_v35, %v4978_v3  ;;  %v6398_v1 = vcombine.high %v4985_v34, %v4993_v44  ;;  %v7582_v35 = vld [vmem:[#allocation5 + $0x78] sm:$0xff]  }
0x12a0   :  { %5387 = vmatprep.subr.bf16.mxu1 %v6378_v47  ;;  %5428 = vmatprep.subr.bf16.mxu0 %v6380_v7  ;;  %v6400_v47 = vcombine.high %v4986_v4, %v4994_v17  ;;  %v6397_v7 = vcombine.low %v4985_v34, %v4993_v44  ;;  %v7583_v3 = vld [vmem:[#allocation5 + $0xf8] sm:$0xff]   ;;  %v7589_v34 = vld [vmem:[#allocation5 + $0x148] sm:$0xff]   ;;  %v7592_v17 = vld [vmem:[#allocation5 + $0xd0] sm:$0xff]  }
0x12a1   :  { %v7590_v44 = vld [vmem:[#allocation5 + $0x88] sm:$0xff]  }
0x12a2   :  { %6403 = vmatmul.mubr.msk.bf16.vlgmr.msra.gmra.mrb[112].mxu1 %vm483_vm2, %v9014_v40  ;;  %6404 = vmatmul.mubr.msk.bf16.vlgmr.msra.gmra.mrb[112].mxu0 %vm483_vm2, %v9014_v40  ;;  %v7591_v4 = vld [vmem:[#allocation5 + $0x108] sm:$0xff]  }
0x12a3   :  { %5388 = vmatpush1.bf16.msra.mxu1 %v6377_v18  ;;  %5429 = vmatpush1.bf16.msra.mxu0 %v6379_v20  ;;  %v7575_v18 = vld [vmem:[#allocation5 + $0xe8] sm:$0xff]   ;;  %v7576_v20 = vld [vmem:[#allocation5 + $0xb0] sm:$0xff]  }
0x12a4   :  { %5389 = vmatprep.subr.bf16.mxu1 %v6394_v12  ;;  %5430 = vmatprep.subr.bf16.mxu0 %v6396_v2  ;;  %v7577_v12 = vld [vmem:[#allocation5 + $0x130] sm:$0xff]  }
0x12a5   :  { %5419 = vmatprep.mubr.bf16.mxu1 %v9398_v51  ;;  %5460 = vmatprep.mubr.bf16.mxu0 %v9398_v51  ;;  %v7579_v2 = vld [vmem:[#allocation5 + $0xf0] sm:$0xff]  }
0x12a7   :  { %5390 = vmatpush1.bf16.msra.mxu1 %v6393_v54  ;;  %5431 = vmatpush1.bf16.msra.mxu0 %v6395_v61  ;;  %v7585_v54 = vld [vmem:[#allocation5 + $0x140] sm:$0xff]  }
0x12a8   :  { %5469 = vmatprep.subr.bf16.mxu1 %v6382_v48  ;;  %5510 = vmatprep.subr.bf16.mxu0 %v6384_v52  ;;  %v7586_v61 = vld [vmem:[#allocation5 + $0x80] sm:$0xff]   ;;  %v7588_v52 = vld [vmem:[#allocation5 + $0xc8] sm:$0xff]  }
0x12a9   :  { %v7587_v48 = vld [vmem:[#allocation5 + $0x100] sm:$0xff]  }
0x12aa   :  { %6405 = vmatmul.mubr.msk.bf16.vlgmr.msra.gmra.mrb[116].mxu1 %vm483_vm2, %v9014_v40  ;;  %6406 = vmatmul.mubr.msk.bf16.vlgmr.msra.gmra.mrb[116].mxu0 %vm483_vm2, %v9014_v40 }
0x12ab   :  { %5470 = vmatpush1.bf16.msra.mxu1 %v6381_v46  ;;  %5511 = vmatpush1.bf16.msra.mxu0 %v6383_v19  ;;  %v7593_v46 = vld [vmem:[#allocation5 + $0x150] sm:$0xff]  }
0x12ac   :  { %5471 = vmatprep.subr.bf16.mxu1 %v6398_v1  ;;  %5512 = vmatprep.subr.bf16.mxu0 %v6400_v47  ;;  %v7594_v19 = vld [vmem:[#allocation5 + $0x90] sm:$0xff]   ;;  %v7596_v47 = vld [vmem:[#allocation5 + $0xd8] sm:$0xff]  }
0x12ad   :  { %5501 = vmatprep.mubr.bf16.mxu1 %v9398_v51  ;;  %5542 = vmatprep.mubr.bf16.mxu0 %v9398_v51  ;;  %v7578_v51 = vld [vmem:[#allocation5 + $0x70] sm:$0xff]  }
0x12ae   :  { %v7595_v1 = vld [vmem:[#allocation5 + $0x110] sm:$0xff]  }
0x12af   :  { %5472 = vmatpush1.bf16.msra.mxu1 %v6397_v7  ;;  %5513 = vmatpush1.bf16.msra.mxu0 %v6399_v53  ;;  %v7597_v7 = vld [vmem:[#allocation5 + $0x158] sm:$0xff]  }
0x12b0   :  { %6959 = vmatprep.subr.bf16.mxu1 %v7572_v23  ;;  %6981 = vmatprep.subr.bf16.mxu0 %v7573_v0  ;;  %v7598_v53 = vld [vmem:[#allocation5 + $0x98] sm:$0xff]   ;;  %v7600_v0 = vld [vmem:[#allocation5 + $0xe0] sm:$0xff]  }
0x12b1   :  { %v7599_v23 = vld [vmem:[#allocation5 + $0x118] sm:$0xff]  }
0x12b2   :  { %6407 = vmatmul.mubr.msk.bf16.vlgmr.msra.gmra.mrb[120].mxu1 %vm483_vm2, %v9014_v40  ;;  %6408 = vmatmul.mubr.msk.bf16.vlgmr.msra.gmra.mrb[120].mxu0 %vm483_vm2, %v9014_v40  ;;  %v7584_v40 = vld [vmem:[#allocation5 + $0xc0] sm:$0xff]  }
0x12b3   :  { %6960 = vmatpush3.bf16.msra.mxu1 %v7574_v16  ;;  %6982 = vmatpush3.bf16.msra.mxu0 %v7575_v18  ;;  %v7601_v16 = vld [vmem:[#allocation5 + $0x160] sm:$0xff]  }
0x12b4   :  { %6961 = vmatprep.subr.bf16.mxu1 %v7576_v20  ;;  %6983 = vmatprep.subr.bf16.mxu0 %v7577_v12  ;;  %v7602_v18 = vld [vmem:[#allocation5 + $0xa0] sm:$0xff]   ;;  %v7604_v12 = vld [vmem:[#allocation5 + $0x1a8] sm:$0xff]  }
0x12b5   :  { %v7603_v20 = vld [vmem:[#allocation5 + $0x120] sm:$0xff]  }
0x12b7   :  { %6962 = vmatpush3.bf16.msra.mxu1 %v7578_v51  ;;  %6984 = vmatpush3.bf16.msra.mxu0 %v7579_v2  ;;  %v7605_v51 = vld [vmem:[#allocation5 + $0x228] sm:$0xff]   ;;  %v6409_v2 = vld [vmem:[#allocation8 + $0x5f] ss:$0 sm:$0xff] }
0x12b8   :  { %6963 = vmatprep.subr.bf16.mxu1 %v7580_v43  ;;  %6985 = vmatprep.subr.bf16.mxu0 %v7581_v33  ;;  %v9040_v43 = vsub.s32 3, %v9497_v29  ;;  %v9569_v33 = vunpack.c.l.bf16 %v8608_v49 }
0x12b9   :  { %5909 = vrot.lane.b32.xlu0 %v6409_v2, %s7738_s3  ;;  %v9574_v2 = vunpack.c.h.bf16 %v8633_v13 }
0x12bb   :  { %6964 = vmatpush3.bf16.msra.mxu1 %v7582_v35  ;;  %6986 = vmatpush3.bf16.msra.mxu0 %v7583_v3  ;;  %v4999_v35 = vrot.slane %v9569_v33, %v9040_v43  ;;  %v9570_v3 = vunpack.c.l.bf16 %v8610_v26  ;;  %v5027_v33 = vrot.slane %v9574_v2, %v9040_v43  ;;  %v9582_v2 = vld [vmem:[#allocation21_spill] sm:$0xff] }
0x12bc   :  { %6965 = vmatprep.subr.bf16.mxu1 %v7584_v40  ;;  %6987 = vmatprep.subr.bf16.mxu0 %v7585_v54  ;;  %v9571_v54 = vunpack.c.h.bf16 %v8608_v49 }
0x12bd   :  { %v5007_v40 = vrot.slane %v9570_v3, %v9040_v43 }
0x12bf   :  { %6966 = vmatpush3.bf16.msra.mxu1 %v7586_v61  ;;  %6988 = vmatpush3.bf16.msra.mxu0 %v7587_v48  ;;  %v5003_v61 = vrot.slane %v9571_v54, %v9040_v43  ;;  %v9572_v48 = vunpack.c.h.bf16 %v8610_v26  ;;  %v9573_v26 = vunpack.c.h.bf16 %v8631_v31 }
0x12c0   :  { %6967 = vmatprep.subr.bf16.mxu1 %v7588_v52  ;;  %6989 = vmatprep.subr.bf16.mxu0 %v7589_v34 }
0x12c1   :  { %v5011_v52 = vrot.slane %v9572_v48, %v9040_v43 }
0x12c3   :  { %6968 = vmatpush3.bf16.msra.mxu1 %v7590_v44  ;;  %6990 = vmatpush3.bf16.msra.mxu0 %v7591_v4 }
0x12c4   :  { %6969 = vmatprep.subr.bf16.mxu1 %v7592_v17  ;;  %6991 = vmatprep.subr.bf16.mxu0 %v7593_v46 }
0x12c7   :  { %6970 = vmatpush3.bf16.msra.mxu1 %v7594_v19  ;;  %6992 = vmatpush3.bf16.msra.mxu0 %v7595_v1 }
0x12c8   :  { %6971 = vmatprep.subr.bf16.mxu1 %v7596_v47  ;;  %6993 = vmatprep.subr.bf16.mxu0 %v7597_v7 }
0x12cb   :  { %6972 = vmatpush3.bf16.msra.mxu1 %v7598_v53  ;;  %6994 = vmatpush3.bf16.msra.mxu0 %v7599_v23 }
0x12cc   :  { %6973 = vmatprep.subr.bf16.mxu1 %v7600_v0  ;;  %6995 = vmatprep.subr.bf16.mxu0 %v7601_v16 }
0x12cf   :  { %6974 = vmatpush3.bf16.msra.mxu1 %v7602_v18  ;;  %6996 = vmatpush3.bf16.msra.mxu0 %v7603_v20 }
0x12d0   :  { %7003 = vmatprep.subr.bf16.mxu1 %v7604_v12  ;;  %7025 = vmatprep.subr.bf16.mxu0 %v7605_v51  ;;  %v5019_v51 = vrot.slane %v9573_v26, %v9040_v43  ;;  %v9580_v26 = vld [vmem:[#allocation19_spill] sm:$0xff] }
0x136d   :  { %v5257_v34 = vpop.f32.mrb[108].mxu1  ;;  %v5298_v44 = vpop.f32.mrb[108].mxu0 }
0x136e   :  { %v5258_v29 = vadd.f32 %v5257_v34, %v4999_v35  ;;  %v5299_v4 = vadd.f32 %v5298_v44, %v5007_v40  ;;  %v5259_v17 = vpop.f32.mrb[109].mxu1  ;;  %v5300_v46 = vpop.f32.mrb[109].mxu0 }
0x136f   :  { %v5260_v19 = vadd.f32 %v5259_v17, %v5003_v61  ;;  %v5301_v1 = vadd.f32 %v5300_v46, %v5011_v52  ;;  %v5261_v47 = vpop.f32.mrb[110].mxu1  ;;  %v5302_v7 = vpop.f32.mrb[110].mxu0 }
0x1370   :  { %v5551_v53 = vmax.f32 %v5258_v29, 0.0  ;;  %v5553_v23 = vmax.f32 %v5299_v4, 0.0  ;;  %v5262_v0 = vpop.f32.mrb[111].mxu1  ;;  %v5303_v16 = vpop.f32.mrb[111].mxu0 }
0x1371   :  { %v5552_v49 = vmax.f32 %v5260_v19, 0.0  ;;  %v5554_v18 = vmax.f32 %v5301_v1, 0.0  ;;  %v9578_v16 = vunpack.c.h.bf16 %v8689_v24 }
0x1372   :  { %v5567_v35 = vpack.c.bf16 %v5551_v53, %v5551_v53  ;;  %v5569_v3 = vpack.c.bf16 %v5553_v23, %v5553_v23 }
0x1373   :  { %v5568_v20 = vpack.c.bf16 %v5552_v49, %v5552_v49  ;;  %v5570_v12 = vpack.c.bf16 %v5554_v18, %v5554_v18  ;;  %v5043_v49 = vrot.slane %v9578_v16, %v9040_v43 }
0x1375   :  { %v5339_v40 = vpop.f32.mrb[112].mxu1  ;;  %v5380_v54 = vpop.f32.mrb[112].mxu0  ;;  %5615 = vmatprep.mubr.bf16.mxu1 %v5568_v20  ;;  %5655 = vmatprep.mubr.bf16.mxu0 %v5570_v12  ;;  %v9579_v12 = vld [vmem:[#allocation18_spill] sm:$0xff] }
0x1376   :  { %v5341_v61 = vpop.f32.mrb[113].mxu1  ;;  %v5382_v48 = vpop.f32.mrb[113].mxu0  ;;  %5616 = vmatmul.mubr.bf16.vlgmr.msra.gmra.mrb[124].mxu1 %v5567_v35  ;;  %5656 = vmatmul.mubr.bf16.vlgmr.msra.gmra.mrb[124].mxu0 %v5569_v3  ;;  %v9587_v35 = vld [vmem:[#allocation26_spill] sm:$0xff]  ;;  %v9588_v3 = vld [vmem:[#allocation27_spill] sm:$0xff] }
0x1377   :  { %v5342_v52 = vadd.f32 %v5341_v61, %v5019_v51  ;;  %v5383_v34 = vadd.f32 %v5382_v48, %v5027_v33  ;;  %7004 = vmatpush3.bf16.msra.mxu1 %v8647_v30  ;;  %7026 = vmatpush3.bf16.msra.mxu0 %v8650_v62  ;;  %v5343_v44 = vpop.f32.mrb[114].mxu1  ;;  %v5384_v29 = vpop.f32.mrb[114].mxu0  ;;  %v9581_v51 = vld [vmem:[#allocation20_spill] sm:$0xff]  ;;  %v9586_v33 = vld [vmem:[#allocation25_spill] sm:$0xff] }
0x1378   :  { %v5344_v4 = vpop.f32.mrb[115].mxu1  ;;  %v5385_v17 = vpop.f32.mrb[115].mxu0  ;;  %7005 = vmatprep.subr.bf16.mxu1 %v8653_v9  ;;  %7027 = vmatprep.subr.bf16.mxu0 %v8656_v10  ;;  %v9591_v61 = vld [vmem:[#allocation16_spill] sm:$0xff]  ;;  %v9592_v48 = vld [vmem:[#allocation17_spill] sm:$0xff]  ;;  %v9595_v44 = vld [vmem:[#allocation34_spill] sm:$0xff] }
0x1379   :  { %v5556_v46 = vmax.f32 %v5342_v52, 0.0  ;;  %v5558_v19 = vmax.f32 %v5383_v34, 0.0  ;;  %v9593_v52 = vld [vmem:[#allocation30_spill] sm:$0xff]  ;;  %v9594_v34 = vld [vmem:[#allocation32_spill] sm:$0xff]  ;;  %v9596_v29 = vld [vmem:[#allocation35_spill] sm:$0xff] }
0x137a   :  { %v9597_v4 = vld [vmem:[#allocation36_spill] sm:$0xff]  ;;  %v9598_v17 = vld [vmem:[#allocation37_spill] sm:$0xff] }
0x137b   :  { %v5572_v1 = vpack.c.bf16 %v5556_v46, %v5556_v46  ;;  %v5574_v47 = vpack.c.bf16 %v5558_v19, %v5558_v19  ;;  %7006 = vmatpush3.bf16.msra.mxu1 %v8659_v41  ;;  %7028 = vmatpush3.bf16.msra.mxu0 %v8662_v42  ;;  %v9599_v46 = vunpack.c.l.bf16 %v8687_v36 }
0x137c   :  { %7007 = vmatprep.subr.bf16.mxu1 %v8665_v58  ;;  %7029 = vmatprep.subr.bf16.mxu0 %v8668_v60 }
0x137d   :  { %v9068_v30 = vpop.f32.mrb[116].mxu1  ;;  %v9070_v62 = vpop.f32.mrb[116].mxu0  ;;  %5695 = vmatprep.mubr.bf16.mxu1 %v5572_v1  ;;  %5735 = vmatprep.mubr.bf16.mxu0 %v5574_v47  ;;  %v5031_v19 = vrot.slane %v9599_v46, %v9040_v43  ;;  %v9600_v1 = vld [vmem:[#allocation38_spill] sm:$0xff]  ;;  %v9601_v47 = vld [vmem:[#allocation39_spill] sm:$0xff] }
0x137e   :  { %v5423_v9 = vpop.f32.mrb[117].mxu1  ;;  %v5464_v10 = vpop.f32.mrb[117].mxu0  ;;  %v9641_v46 = vld [vmem:[#allocation71_spill] sm:$0xff] }
0x137f   :  { %7008 = vmatpush3.bf16.msra.mxu1 %v8675_v25  ;;  %7030 = vmatpush3.bf16.msra.mxu0 %v8678_v56  ;;  %v5425_v7 = vpop.f32.mrb[118].mxu1  ;;  %v5466_v41 = vpop.f32.mrb[118].mxu0 }
0x1380   :  { %v5426_v53 = vpop.f32.mrb[119].mxu1  ;;  %v5467_v42 = vpop.f32.mrb[119].mxu0  ;;  %7009 = vmatprep.subr.bf16.mxu1 %v8681_v11  ;;  %7031 = vmatprep.subr.bf16.mxu0 %v8684_v37  ;;  %v9603_v7 = vld [vmem:[#allocation40_spill] sm:$0xff]  ;;  %v9604_v41 = vld [vmem:[#allocation31_spill] sm:$0xff] }
0x1381   :  { %v9605_v53 = vunpack.c.h.bf16 %v9604_v41 }
0x1383   :  { %7010 = vmatpush3.bf16.msra.mxu1 %v8691_v59  ;;  %7032 = vmatpush3.bf16.msra.mxu0 %v8694_v39  ;;  %v9575_v59 = vunpack.c.l.bf16 %v8631_v31  ;;  %v5051_v42 = vrot.slane %v9605_v53, %v9040_v43 }
0x1384   :  { %7011 = vmatprep.subr.bf16.mxu1 %v8699_v55  ;;  %7033 = vmatprep.subr.bf16.mxu0 %v8702_v38  ;;  %v9576_v55 = vunpack.c.l.bf16 %v8633_v13 }
0x1385   :  { %v9080_v58 = vpop.f32.mrb[120].mxu1  ;;  %v9082_v60 = vpop.f32.mrb[120].mxu0  ;;  %v5015_v39 = vrot.slane %v9575_v59, %v9040_v43 }
0x1386   :  { %v9084_v25 = vpop.f32.mrb[121].mxu1  ;;  %v9086_v56 = vpop.f32.mrb[121].mxu0  ;;  %v5023_v38 = vrot.slane %v9576_v55, %v9040_v43  ;;  %v9609_v55 = vld [vmem:[#allocation42_spill] sm:$0xff] }
0x1387   :  { %7012 = vmatpush3.bf16.msra.mxu1 %v8715_v45  ;;  %7034 = vmatpush3.bf16.msra.mxu0 %v8718_v57  ;;  %v5507_v11 = vpop.f32.mrb[122].mxu1  ;;  %v5548_v37 = vpop.f32.mrb[122].mxu0  ;;  %v9577_v45 = vunpack.c.h.bf16 %v8687_v36  ;;  %v5340_v31 = vadd.f32 %v5339_v40, %v5015_v39  ;;  %v9589_v40 = vld [vmem:[#allocation28_spill] sm:$0xff]  ;;  %v9608_v36 = vld [vmem:[#allocation41_spill] sm:$0xff]  ;;  %v5422_v39 = vadd.f32 %v9068_v30, %v5031_v19 }
0x1388   :  { %v5508_v23 = vpop.f32.mrb[123].mxu1  ;;  %v5549_v0 = vpop.f32.mrb[123].mxu0  ;;  %7013 = vmatprep.subr.bf16.mxu1 %v8727_v22  ;;  %7035 = vmatprep.subr.bf16.mxu0 %v8730_v32  ;;  %v5381_v13 = vadd.f32 %v5380_v54, %v5023_v38  ;;  %v5465_v32 = vadd.f32 %v5464_v10, %v5043_v49  ;;  %v9590_v54 = vld [vmem:[#allocation29_spill] sm:$0xff]  ;;  %v9610_v38 = vld [vmem:[#allocation43_spill] sm:$0xff]  ;;  %v9613_v49 = vld [vmem:[#allocation46_spill] sm:$0xff] }
0x1389   :  { %v5035_v57 = vrot.slane %v9577_v45, %v9040_v43  ;;  %v5555_v18 = vmax.f32 %v5340_v31, 0.0  ;;  %v9606_v11 = vld [vmem:[#allocation33_spill] sm:$0xff]  ;;  %v9611_v23 = vld [vmem:[#allocation44_spill] sm:$0xff]  ;;  %v5506_v0 = vadd.f32 %v9084_v25, %v5051_v42  ;;  %v5559_v16 = vmax.f32 %v5422_v39, 0.0  ;;  %v9614_v31 = vld [vmem:[#allocation47_spill] sm:$0xff] }
0x138a   :  { %v5557_v20 = vmax.f32 %v5381_v13, 0.0  ;;  %v9607_v37 = vunpack.c.h.bf16 %v9606_v11  ;;  %v9615_v13 = vld [vmem:[#allocation48_spill] sm:$0xff]  ;;  %v9618_v25 = vld [vmem:[#allocation51_spill] sm:$0xff]  ;;  %v9647_v42 = vld [vmem:[#allocation77_spill] sm:$0xff]  ;;  %v9652_v39 = vmov 0.0|0.0  }
0x138b   :  { %7014 = vmatpush3.bf16.msra.mxu1 %v8739_v14  ;;  %7036 = vmatpush3.bf16.msra.mxu0 %v8742_v8  ;;  %v5424_v22 = vadd.f32 %v5423_v9, %v5035_v57  ;;  %v5562_v8 = vmax.f32 %v5465_v32, 0.0  ;;  %v9602_v9 = vunpack.c.l.bf16 %v8689_v24  ;;  %v9612_v57 = vld [vmem:[#allocation45_spill] sm:$0xff]  ;;  %v9642_v19 = vld [vmem:[#allocation72_spill] sm:$0xff] }
0x138c   :  { %7015 = vmatprep.subr.bf16.mxu1 %v8747_v63  ;;  %7037 = vmatprep.subr.bf16.mxu0 %v8750_v28  ;;  %v5571_v63 = vpack.c.bf16 %v5555_v18, %v5555_v18  ;;  %v5573_v28 = vpack.c.bf16 %v5557_v20, %v5557_v20  ;;  %v5059_v59 = vrot.slane %v9607_v37, %v9040_v43  ;;  %v9616_v18 = vld [vmem:[#allocation49_spill] sm:$0xff]  ;;  %v9617_v20 = vld [vmem:[#allocation50_spill] sm:$0xff]  ;;  %v9649_v37 = vld [vmem:[#allocation79_spill] sm:$0xff] }
0x138d   :  { %v5560_v14 = vmax.f32 %v5424_v22, 0.0  ;;  %v5039_v10 = vrot.slane %v9602_v9, %v9040_v43  ;;  %v5564_v22 = vmax.f32 %v5506_v0, 0.0  ;;  %v9644_v9 = vld [vmem:[#allocation74_spill] sm:$0xff] }
0x138e   :  { %v5547_v45 = vadd.f32 %v9086_v56, %v5059_v59  ;;  %v9650_v59 = vld [vmem:[#allocation80_spill] sm:$0xff] }
0x138f   :  { %7016 = vmatpush3.bf16.msra.mxu1 %v8753_v15  ;;  %7038 = vmatpush3.bf16.msra.mxu0 %v8756_v50  ;;  %v5576_v15 = vpack.c.bf16 %v5560_v14, %v5560_v14  ;;  %v5578_v50 = vpack.c.bf16 %v5562_v8, %v5562_v8  ;;  %v5463_v24 = vadd.f32 %v9070_v62, %v5039_v10  ;;  %v9619_v14 = vld [vmem:[#allocation52_spill] sm:$0xff] }
0x1390   :  { %7017 = vmatprep.subr.bf16.mxu1 %v8759_v27  ;;  %7039 = vmatprep.subr.bf16.mxu0 %v8762_v6  ;;  %v9583_v27 = vld [vmem:[#allocation22_spill] sm:$0xff]  ;;  %v9584_v6 = vld [vmem:[#allocation23_spill] sm:$0xff]  ;;  %v5566_v32 = vmax.f32 %v5547_v45, 0.0  ;;  %v5575_v62 = vpack.c.bf16 %v5559_v16, %v5559_v16  ;;  %v5580_v8 = vpack.c.bf16 %v5564_v22, %v5564_v22 }
0x1391   :  { %v5561_v30 = vmax.f32 %v5463_v24, 0.0 }
0x1393   :  { %7018 = vmatpush3.bf16.msra.mxu1 %v8765_v21  ;;  %7040 = vmatpush3.bf16.msra.mxu0 %v9579_v12  ;;  %v9585_v21 = vld [vmem:[#allocation24_spill] sm:$0xff]  ;;  %v5577_v56 = vpack.c.bf16 %v5561_v30, %v5561_v30  ;;  %v5582_v12 = vpack.c.bf16 %v5566_v32, %v5566_v32 }
0x1394   :  { %7047 = vmatprep.subr.bf16.mxu1 %v9580_v26  ;;  %7069 = vmatprep.subr.bf16.mxu0 %v9581_v51  ;;  %v9622_v26 = vld [vmem:[#allocation55_spill] sm:$0xff]  ;;  %v9623_v51 = vld [vmem:[#allocation56_spill] sm:$0xff] }
0x1396   :  { %5696 = vmatmul.mubr.bf16.vlgmr.msra.gmra.mrb[128].mxu1 %v5571_v63  ;;  %5736 = vmatmul.mubr.bf16.vlgmr.msra.gmra.mrb[128].mxu0 %v5573_v28  ;;  %v9620_v63 = vld [vmem:[#allocation53_spill] sm:$0xff]  ;;  %v9621_v28 = vld [vmem:[#allocation54_spill] sm:$0xff] }
0x1397   :  { %7048 = vmatpush3.bf16.msra.mxu1 %v9582_v2  ;;  %5775 = vmatprep.mubr.bf16.mxu1 %v5576_v15  ;;  %v9624_v15 = vld [vmem:[#allocation57_spill] sm:$0xff]  ;;  %v9626_v2 = vld [vmem:[#allocation59_spill] sm:$0xff] }
0x1398   :  { %7070 = vmatpush3.bf16.msra.mxu0 %v9583_v27  ;;  %5815 = vmatprep.mubr.bf16.mxu0 %v5578_v50  ;;  %v9625_v50 = vld [vmem:[#allocation58_spill] sm:$0xff]  ;;  %v9627_v27 = vld [vmem:[#allocation60_spill] sm:$0xff] }
0x1399   :  { %7049 = vmatprep.subr.bf16.mxu1 %v9584_v6  ;;  %7071 = vmatprep.subr.bf16.mxu0 %v9585_v21  ;;  %v9628_v6 = vld [vmem:[#allocation61_spill] sm:$0xff]  ;;  %v9629_v21 = vld [vmem:[#allocation62_spill] sm:$0xff] }
0x139b   :  { %7050 = vmatpush3.bf16.msra.mxu1 %v9586_v33  ;;  %v9630_v33 = vld [vmem:[#allocation15_spill] sm:$0xff] }
0x139c   :  { %7072 = vmatpush3.bf16.msra.mxu0 %v9587_v35  ;;  %7051 = vmatprep.subr.bf16.mxu1 %v9588_v3  ;;  %v9631_v35 = vld [vmem:[#allocation63_spill] sm:$0xff]  ;;  %v9632_v3 = vld [vmem:[#allocation64_spill] sm:$0xff] }
0x139d   :  { %7073 = vmatprep.subr.bf16.mxu0 %v9589_v40  ;;  %v9633_v40 = vld [vmem:[#allocation65_spill] sm:$0xff] }
0x139f   :  { %7052 = vmatpush3.bf16.msra.mxu1 %v9590_v54  ;;  %v9634_v54 = vld [vmem:[#allocation66_spill] sm:$0xff] }
0x13a0   :  { %7074 = vmatpush3.bf16.msra.mxu0 %v9591_v61  ;;  %7053 = vmatprep.subr.bf16.mxu1 %v9592_v48  ;;  %v9635_v61 = vld [vmem:[#allocation67_spill] sm:$0xff]  ;;  %v9636_v48 = vld [vmem:[#allocation68_spill] sm:$0xff] }
0x13a1   :  { %7075 = vmatprep.subr.bf16.mxu0 %v9593_v52  ;;  %v9637_v52 = vunpack.c.l.bf16 %v9604_v41  ;;  %v9646_v41 = vld [vmem:[#allocation76_spill] sm:$0xff] }
0x13a3   :  { %7054 = vmatpush3.bf16.msra.mxu1 %v9594_v34  ;;  %v5047_v34 = vrot.slane %v9637_v52, %v9040_v43 }
0x13a4   :  { %7076 = vmatpush3.bf16.msra.mxu0 %v9595_v44  ;;  %7055 = vmatprep.subr.bf16.mxu1 %v9596_v29  ;;  %v9638_v44 = vld [vmem:[#allocation69_spill] sm:$0xff]  ;;  %v9639_v29 = vld [vmem:[#allocation70_spill] sm:$0xff] }
0x13a5   :  { %7077 = vmatprep.subr.bf16.mxu0 %v9597_v4  ;;  %v9640_v4 = vunpack.c.l.bf16 %v9606_v11 }
0x13a7   :  { %7056 = vmatpush3.bf16.msra.mxu1 %v9598_v17  ;;  %v5055_v17 = vrot.slane %v9640_v4, %v9040_v43  ;;  %v9648_v43 = vld [vmem:[#allocation78_spill] sm:$0xff] }
0x13a8   :  { %7078 = vmatpush3.bf16.msra.mxu0 %v9600_v1  ;;  %7057 = vmatprep.subr.bf16.mxu1 %v9601_v47  ;;  %v5504_v1 = vadd.f32 %v9080_v58, %v5047_v34  ;;  %v9643_v47 = vld [vmem:[#allocation73_spill] sm:$0xff] }
0x13a9   :  { %7079 = vmatprep.subr.bf16.mxu0 %v9603_v7  ;;  %v5545_v10 = vadd.f32 %v9082_v60, %v5055_v17  ;;  %v9645_v7 = vld [vmem:[#allocation75_spill] sm:$0xff] }
0x13aa   :  { %v5563_v53 = vmax.f32 %v5504_v1, 0.0  ;;  %v5910_v1 = vpop.permute.xlu0 %5909 }
0x13ab   :  { %7058 = vmatpush3.bf16.msra.mxu1 %v9608_v36  ;;  %v5565_v11 = vmax.f32 %v5545_v10, 0.0  ;;  %v9651_v36 = vld [vmem:[#allocation81_spill] sm:$0xff] }
0x13ac   :  { %7080 = vmatpush3.bf16.msra.mxu0 %v9609_v55  ;;  %7059 = vmatprep.subr.bf16.mxu1 %v9610_v38  ;;  %v5579_v58 = vpack.c.bf16 %v5563_v53, %v5563_v53  ;;  %v9653_v55 = vmov 0.0  }
0x13ad   :  { %7081 = vmatprep.subr.bf16.mxu0 %v9611_v23  ;;  %v5581_v60 = vpack.c.bf16 %v5565_v11, %v5565_v11 }
0x13af   :  { %7060 = vmatpush3.bf16.msra.mxu1 %v9612_v57 }
0x13b0   :  { %7082 = vmatpush3.bf16.msra.mxu0 %v9613_v49  ;;  %7061 = vmatprep.subr.bf16.mxu1 %v9614_v31 }
0x13b1   :  { %7083 = vmatprep.subr.bf16.mxu0 %v9615_v13 }
0x13b3   :  { %7062 = vmatpush3.bf16.msra.mxu1 %v9616_v18 }
0x13b4   :  { %7084 = vmatpush3.bf16.msra.mxu0 %v9617_v20  ;;  %7091 = vmatprep.subr.bf16.mxu1 %v9618_v25 }
0x13b5   :  { %7113 = vmatprep.subr.bf16.mxu0 %v9619_v14 }
0x13b6   :  { %5776 = vmatmul.mubr.bf16.vlgmr.msra.gmra.mrb[132].mxu1 %v5575_v62 }
0x13b7   :  { %5816 = vmatmul.mubr.bf16.vlgmr.msra.gmra.mrb[132].mxu0 %v5577_v56  ;;  %7092 = vmatpush3.bf16.msra.mxu1 %v9620_v63 }
0x13b8   :  { %5855 = vmatprep.mubr.bf16.mxu1 %v5580_v8  ;;  %7114 = vmatpush3.bf16.msra.mxu0 %v9621_v28 }
0x13b9   :  { %5895 = vmatprep.mubr.bf16.mxu0 %v5582_v12  ;;  %7093 = vmatprep.subr.bf16.mxu1 %v9622_v26 }
0x13ba   :  { %7115 = vmatprep.subr.bf16.mxu0 %v9623_v51 }
0x13bb   :  { %7094 = vmatpush3.bf16.msra.mxu1 %v9624_v15 }
0x13bc   :  { %7116 = vmatpush3.bf16.msra.mxu0 %v9625_v50  ;;  %7095 = vmatprep.subr.bf16.mxu1 %v9626_v2 }
0x13bd   :  { %7117 = vmatprep.subr.bf16.mxu0 %v9627_v27 }
0x13bf   :  { %7096 = vmatpush3.bf16.msra.mxu1 %v9628_v6 }
0x13c0   :  { %7118 = vmatpush3.bf16.msra.mxu0 %v9629_v21  ;;  %7097 = vmatprep.subr.bf16.mxu1 %v9630_v33 }
0x13c1   :  { %7119 = vmatprep.subr.bf16.mxu0 %v9631_v35 }
0x13c3   :  { %7098 = vmatpush3.bf16.msra.mxu1 %v9632_v3 }
0x13c4   :  { %7120 = vmatpush3.bf16.msra.mxu0 %v9633_v40  ;;  %7099 = vmatprep.subr.bf16.mxu1 %v9634_v54 }
0x13c5   :  { %7121 = vmatprep.subr.bf16.mxu0 %v9635_v61 }
0x13c7   :  { %7100 = vmatpush3.bf16.msra.mxu1 %v9636_v48 }
0x13c8   :  { %7122 = vmatpush3.bf16.msra.mxu0 %v9638_v44  ;;  %7101 = vmatprep.subr.bf16.mxu1 %v9639_v29 }
0x13c9   :  { %7123 = vmatprep.subr.bf16.mxu0 %v9641_v46 }
0x13cb   :  { %7102 = vmatpush3.bf16.msra.mxu1 %v9642_v19 }
0x13cc   :  { %7124 = vmatpush3.bf16.msra.mxu0 %v9643_v47  ;;  %7103 = vmatprep.subr.bf16.mxu1 %v9644_v9 }
0x13cd   :  { %7125 = vmatprep.subr.bf16.mxu0 %v9645_v7 }
0x13cf   :  { %7104 = vmatpush3.bf16.msra.mxu1 %v9646_v41 }
0x13d0   :  { %7126 = vmatpush3.bf16.msra.mxu0 %v9647_v42  ;;  %7105 = vmatprep.subr.bf16.mxu1 %v9648_v43 }
0x13d1   :  { %7127 = vmatprep.subr.bf16.mxu0 %v9649_v37 }
0x13d3   :  { %7106 = vmatpush3.bf16.msra.mxu1 %v9650_v59 }
0x13d4   :  { %7128 = vmatpush3.bf16.msra.mxu0 %v9651_v36  ;;  %7202 = vmatprep.subr.bf16.mxu1 %v9652_v39 }
0x13d6   :  { %5856 = vmatmul.mubr.bf16.vlgmr.msra.gmra.mrb[136].mxu1 %v5579_v58 }
0x13d7   :  { %5896 = vmatmul.mubr.bf16.vlgmr.msra.gmra.mrb[136].mxu0 %v5581_v60  ;;  %7181 = vmatprep.mubr.msk.f32.mxu1 %vm7739_vm1, %v9653_v55 }
0x1449   :  { %v6975_v38 = vpop.f32.mrb[124].mxu1  ;;  %v6997_v24 = vpop.f32.mrb[124].mxu0 }
0x144a   :  { %v6976_v23 = vpop.f32.mrb[125].mxu1  ;;  %v6998_v0 = vpop.f32.mrb[125].mxu0 }
0x144b   :  { %v6977_v45 = vadd.f32 %v6976_v23, %v6975_v38  ;;  %v6999_v57 = vadd.f32 %v6998_v0, %v6997_v24  ;;  %v6978_v16 = vpop.f32.mrb[126].mxu1  ;;  %v7000_v49 = vpop.f32.mrb[126].mxu0  ;;  %v6410_v24 = vld [vmem:[#allocation8 + $0x5d] ss:$0 sm:$0xff] }
0x144c   :  { %v6979_v31 = vpop.f32.mrb[127].mxu1  ;;  %v7001_v30 = vpop.f32.mrb[127].mxu0 }
0x144d   :  { %v5658_v13 = vadd.f32 %v6999_v57, %v6977_v45  ;;  %v78_v31 = vld [vmem:[#allocation8 + $0x20] sm:$0xff]  ;;  %v79_v30 = vld [vmem:[#allocation8 + $0x28] sm:$0xff] }
0x1469   :  { %v7019_v22 = vpop.f32.mrb[128].mxu1  ;;  %v7041_v32 = vpop.f32.mrb[128].mxu0 }
0x146a   :  { %v7020_v18 = vpop.f32.mrb[129].mxu1  ;;  %v7042_v62 = vpop.f32.mrb[129].mxu0 }
0x146b   :  { %v7021_v20 = vadd.f32 %v7020_v18, %v7019_v22  ;;  %v7043_v25 = vadd.f32 %v7042_v62, %v7041_v32  ;;  %v7022_v56 = vpop.f32.mrb[130].mxu1  ;;  %v7044_v14 = vpop.f32.mrb[130].mxu0  ;;  %v80_v22 = vld [vmem:[#allocation8 + $0x30] sm:$0xff]  ;;  %v81_v32 = vld [vmem:[#allocation8 + $0x38] sm:$0xff] }
0x146c   :  { %v7023_v8 = vpop.f32.mrb[131].mxu1  ;;  %v7045_v12 = vpop.f32.mrb[131].mxu0  ;;  %v7206_v18 = vpack.c.bf16 %v81_v32, %v80_v22 }
0x146d   :  { %v5698_v63 = vadd.f32 %v7021_v20, %v5658_v13  ;;  %v7203_v13 = vpack.c.bf16 %v79_v30, %v78_v31 }
0x146f   :  { %v5738_v28 = vadd.f32 %v7043_v25, %v5698_v63  ;;  %7204 = vmatpush3.bf16.msra.mxu1 %v7203_v13 }
0x1470   :  { %7205 = vmatprep.subr.bf16.mxu1 %v9652_v39 }
0x1473   :  { %7207 = vmatpush3.bf16.msra.mxu1 %v7206_v18 }
0x1489   :  { %v7063_v26 = vpop.f32.mrb[132].mxu1 }
0x148a   :  { %v7085_v51 = vpop.f32.mrb[132].mxu0  ;;  %v7064_v15 = vpop.f32.mrb[133].mxu1 }
0x148b   :  { %v7065_v50 = vadd.f32 %v7064_v15, %v7063_v26  ;;  %v7086_v2 = vpop.f32.mrb[133].mxu0  ;;  %v7066_v27 = vpop.f32.mrb[134].mxu1  ;;  %v6412_v26 = vld [vmem:[#allocation8 + $0x60] ss:$0 sm:$0xff]  ;;  %v6413_v15 = vld [vmem:[#allocation8 + $0x61] ss:$0 sm:$0xff] }
0x148c   :  { %v7087_v6 = vadd.f32 %v7086_v2, %v7085_v51  ;;  %v7088_v21 = vpop.f32.mrb[134].mxu0  ;;  %v7067_v33 = vpop.f32.mrb[135].mxu1  ;;  %v6414_v27 = vld [vmem:[#allocation8 + $0x62] ss:$0 sm:$0xff] }
0x148d   :  { %v5778_v35 = vadd.f32 %v7065_v50, %v5738_v28  ;;  %v7089_v3 = vpop.f32.mrb[135].mxu0 }
0x148f   :  { %v5818_v40 = vadd.f32 %v7087_v6, %v5778_v35 }
0x14a9   :  { %v7107_v54 = vpop.f32.mrb[136].mxu1 }
0x14aa   :  { %v7129_v61 = vpop.f32.mrb[136].mxu0  ;;  %v7108_v48 = vpop.f32.mrb[137].mxu1 }
0x14ab   :  { %v7109_v52 = vadd.f32 %v7108_v48, %v7107_v54  ;;  %v7130_v34 = vpop.f32.mrb[137].mxu0  ;;  %v7110_v44 = vpop.f32.mrb[138].mxu1 }
0x14ac   :  { %v7131_v29 = vadd.f32 %v7130_v34, %v7129_v61  ;;  %v7132_v4 = vpop.f32.mrb[138].mxu0  ;;  %v7111_v17 = vpop.f32.mrb[139].mxu1 }
0x14ad   :  { %v5858_v46 = vadd.f32 %v7109_v52, %v5818_v40  ;;  %v7133_v19 = vpop.f32.mrb[139].mxu0 }
0x14af   :  { %v5898_v47 = vadd.f32 %v7131_v29, %v5858_v46 }
0x14b1   :  { %v5912_v9 = vadd.f32 %v5910_v1, %v5898_v47 }
0x14b3   :  { %5914 = vrot.lane.b32.xlu1 %v5912_v9, %s7728_s1  ;;  %s6057_s1 = sshll.u32 %s7741_s25, 4  ;;  %s6058_s1 = int_to_ptr.vmem [resolvable:$true] %s6057_s1 }
0x14b4   :  { %s7694_s16 = scalar_lea.vmem %s6058_s1, 32  ;;  %p7699_p5 = scmp.lt.s32.totalorder %s6058_s1, %s6058_s1 }
0x14b5   :  { %p7695_p4 = scmp.ne.s32.totalorder %s6058_s1, %s7694_s16  ;;  %p7700_p6 = scmp.lt.s32.totalorder %s7694_s16, %s7694_s16 }
0x14b7   :  { %p7701_p7 = por %p7700_p6, %p7699_p5 }
0x14b9   :  { %p7702_p8 = pnand %p7701_p7, %p7695_p4 }
0x1525   :  { %v5915_v10 = vpop.permute.xlu1 %5914 }
0x1526   :  { %v5917_v7 = vadd.f32 %v5915_v10, %v9010_v5  ;;  %v6411_v5 = vld [vmem:[#allocation8 + $0x5e] ss:$0 sm:$0xff] }
0x1528   :  { %v5920_v41 = vsel %vm566_vm3, %v5917_v7, 0.0  ;;  %v5924_v53 = vmul.f32 %v5917_v7, %v5917_v7 }
0x1529   :  { %5921 = vadd.xlane.f32.xlu0 %v5920_v41 }
0x152a   :  { %v5925_v42 = vsel %vm566_vm3, %v5924_v53, 0.0 }
0x152b   :  { %5926 = vadd.xlane.f32.xlu1 %v5925_v42 }
0x15b6   :  { %v5922_v43 = vpop.xlane.xlu0 %5921 }
0x15b7   :  { %v5923_v11 = vmul.f32 0.03125, %v5922_v43 }
0x15b8   :  { %v5927_v37 = vpop.xlane.xlu1 %5926 }
0x15b9   :  { %v5929_v59 = vmul.f32 %v5923_v11, %v5923_v11  ;;  %v5928_v58 = vmul.f32 0.03125, %v5927_v37  ;;  %v5931_v55 = vsub.f32 %v5917_v7, %v5923_v11 }
0x15bb   :  { %v5930_v36 = vsub.f32 %v5928_v58, %v5929_v59 }
0x15bd   :  { %v5932_v60 = vadd.f32 1e-05, %v5930_v36 }
0x15bf   :  { %7387 = vrsqrt.f32 %v5932_v60 }
0x15c9   :  { %v7388_v38 = vpop.eup %7387 }
0x15ca   :  { %v5934_v23 = vmul.f32 %v7388_v38, %v5931_v55 }
0x15cc   :  { %v5939_v0 = vmul.f32 %v6410_v24, %v5934_v23 }
0x15ce   :  { %v5944_v45 = vadd.f32 %v6411_v5, %v5939_v0 }
0x15d0   :  { %v5947_v57 = vsel %vm566_vm3, %v5944_v45, 0.0  ;;  %v5951_v16 = vmul.f32 %v5944_v45, %v5944_v45 }
0x15d1   :  { %5948 = vadd.xlane.f32.xlu0 %v5947_v57 }
0x15d2   :  { %v5952_v49 = vsel %vm566_vm3, %v5951_v16, 0.0 }
0x15d5   :  { %5953 = vadd.xlane.f32.xlu0 %v5952_v49 }
0x165e   :  { %v5949_v62 = vpop.xlane.xlu0 %5948 }
0x165f   :  { %v5950_v20 = vmul.f32 0.03125, %v5949_v62 }
0x1661   :  { %v5956_v56 = vmul.f32 %v5950_v20, %v5950_v20  ;;  %v5958_v63 = vsub.f32 %v5944_v45, %v5950_v20 }
0x1662   :  { %v5954_v25 = vpop.xlane.xlu0 %5953 }
0x1663   :  { %v5955_v14 = vmul.f32 0.03125, %v5954_v25 }
0x1665   :  { %v5957_v8 = vsub.f32 %v5955_v14, %v5956_v56 }
0x1667   :  { %v5959_v12 = vadd.f32 1e-05, %v5957_v8 }
0x1669   :  { %7389 = vrsqrt.f32 %v5959_v12 }
0x1673   :  { %v7390_v28 = vpop.eup %7389 }
0x1674   :  { %v5961_v51 = vmul.f32 %v7390_v28, %v5958_v63 }
0x1676   :  { %v5966_v50 = vmul.f32 %v6412_v26, %v5961_v51 }
0x1678   :  { %v5971_v2 = vadd.f32 %v6413_v15, %v5966_v50 }
0x167a   :  { %7182 = vmatmul.mubr.msk.f32.vlgmr.msra.gmra.mrb[42].mxu1 %vm483_vm2, %v5971_v2 }
0x174d   :  { %v6046_v39 = vpop.f32.mrb[42].mxu1 }
0x174e   :  { %v6047_v6 = vadd.f32 %v6414_v27, %v6046_v39  ;;  %v7183_v21 = vpop.f32.mrb[43].mxu1 }
0x1750   :  { %6050 = vst [vmem:[#allocation10] sm:$0x3] %v6047_v6 }
0x1751   :  { %7705 = shalt.err (!%p7702_p8)
}
0x1752   :  { %s7706_s19 = scalar_lea.hbm %s9229_s4, 32 }
0x1753   :  { %p7707_p9 = scmp.ne.s32.totalorder %s9229_s4, %s7706_s19  ;;  %p7710_p10 = scmp.lt.u32.totalorder %s7706_s19, %s9229_s4 }
0x1755   :  { %p7712_p11 = pnand %p7710_p10, %p7707_p9 }
0x1757   :  { %7715 = shalt.err (!%p7712_p11)
}
0x1758   :  { %6060 = dma.vmem_to_hbm [thread:$0]  %s6058_s1, 32, %s9229_s4, [#allocation4]  }
0x1759   :  { %7722 = dma.done.wait [#allocation4], 32  }
0x175a   :  { %7723 = vsyncadd [#allocation4], 4294967264 }
0x175b   :  { %6064 = vsyncpa [#allocation3], 1 }
0x175c   :  { %6065 = vsyncpa [#allocation6], 1 }
0x175d   :  { %6066 = vsyncpa [#allocation9], 1 }
0x175e   :  { %6067 = vsyncpa [#allocation4], 1 }

</bundles_post_ra>
